<compile_context>
chip_gen: v6e
topology: v6e:2x2x1
jax: 0.10.0
libtpu: 0.0.40
codegen_flags: <defaults>
</compile_context>

<pallas_src>
import jax
import jax.numpy as jnp
from jax.experimental import pallas as pl
from jax.experimental.pallas import tpu as pltpu

SEQ_LEN = 28
NUM_SEQS = 4
L0 = SEQ_LEN // 2                # 14 (even / odd de-interleaved length)
L1 = (SEQ_LEN - 5) // 2 + 1      # 12
L2 = L1 - 3 + 1                  # 10
L3 = L2 - 5 + 1                  # 6
FC1_IN = 64 * L3                 # 384


def ssl_kernel(x8_ref,
               w1_ref, b1_ref,
               w2_ref, b2_ref,
               w3_ref, b3_ref,
               fw1_ref, fb1_ref,
               fw2_ref, fb2_ref,
               out_ref):
    bt = out_ref.shape[-1]                    # batch tile on the lane axis

    x8 = x8_ref[...]                          # (8, 14*bt); row = parity*4 + c

    # conv1: Cin=4 -> Cout=8, k=5, stride=2.  Even/odd parity is folded into
    # the 8 input rows, so each lane shift m is ONE (8,8)@(8,12*bt) MXU dot
    # (tap k=4 has its odd half zero-padded in the paired weight).
    acc1 = None
    for m in range(3):                        # static, tiny unroll over shifts
        term = jnp.dot(w1_ref[m], x8[:, m * bt:(m + L1) * bt],
                       preferred_element_type=jnp.float32)
        acc1 = term if acc1 is None else acc1 + term
    h1 = jnp.maximum(acc1 + b1_ref[...], 0.0).astype(w2_ref.dtype)   # (8, 12*bt)

    # conv2: 8 -> 16, k=3, stride=1
    acc2 = None
    for k in range(3):
        term = jnp.dot(w2_ref[k], h1[:, k * bt:(k + L2) * bt],
                       preferred_element_type=jnp.float32)
        acc2 = term if acc2 is None else acc2 + term
    h2 = jnp.maximum(acc2 + b2_ref[...], 0.0).astype(w3_ref.dtype)   # (16, 10*bt)

    # conv3: 16 -> 64, k=5, stride=1
    acc3 = None
    for k in range(5):
        term = jnp.dot(w3_ref[k], h2[:, k * bt:(k + L3) * bt],
                       preferred_element_type=jnp.float32)
        acc3 = term if acc3 is None else acc3 + term
    h3 = jnp.maximum(acc3 + b3_ref[...], 0.0).astype(fw1_ref.dtype)  # (64, 6*bt)

    # fc1 over the torch-style flatten (index = c*6 + l), batch on lanes:
    #   fc1(flat)[:, b] = sum_l W[:, :, l] @ h3[:, l*bt + b]
    acc4 = None
    for l in range(L3):
        term = jnp.dot(fw1_ref[l], h3[:, l * bt:(l + 1) * bt],
                       preferred_element_type=jnp.float32)
        acc4 = term if acc4 is None else acc4 + term
    y1 = jnp.maximum(acc4 + fb1_ref[...], 0.0)                       # (64, bt) f32

    # fc2: 64 -> 1 as a VPU multiply + cross-sublane (XLU) reduce — no MXU.
    y2 = jnp.sum(y1 * fw2_ref[...], axis=0, keepdims=True) + fb2_ref[...]
    out_ref[...] = jnp.maximum(y2, 0.0).astype(out_ref.dtype)        # (1, bt)


def _const_spec(shape):
    nd = len(shape)
    return pl.BlockSpec(shape, lambda t, _nd=nd: (0,) * _nd)


def prepare_params(params, compute_dtype=jnp.float32):
    """One-time weight prep (tap pairing / transposes) hoisted off the hot path."""
    cd = compute_dtype
    w1 = params["w1"].astype(jnp.float32)                      # (8, 4, 5)
    w1e = w1[:, :, 0::2]                                       # taps k=0,2,4 (parity 0)
    w1o = jnp.concatenate(
        [w1[:, :, 1::2], jnp.zeros((8, NUM_SEQS, 1), jnp.float32)], axis=2)
    w1p = jnp.concatenate([w1e, w1o], axis=1)                  # (8, 8, 3): in = p*4 + c
    return {
        "w1p": jnp.transpose(w1p, (2, 0, 1)).astype(cd),               # (3, 8, 8)
        "b1": params["b1"].reshape(8, 1).astype(jnp.float32),
        "w2": jnp.transpose(params["w2"], (2, 0, 1)).astype(cd),       # (3, 16, 8)
        "b2": params["b2"].reshape(16, 1).astype(jnp.float32),
        "w3": jnp.transpose(params["w3"], (2, 0, 1)).astype(cd),       # (5, 64, 16)
        "b3": params["b3"].reshape(64, 1).astype(jnp.float32),
        "fw1": jnp.transpose(params["fc1_w"].reshape(64, 64, L3),
                             (2, 0, 1)).astype(cd),                    # (6, 64, 64)
        "fb1": params["fc1_b"].reshape(64, 1).astype(jnp.float32),
        "fw2c": params["fc2_w"].reshape(64, 1).astype(jnp.float32),    # column, f32
        "fb2": params["fc2_b"].reshape(1, 1).astype(jnp.float32),
    }


def ssl_forward(x, prepped, b_tile=None):
    """x: (B, 4, 28); prepped = prepare_params(raw_params[, compute_dtype]).
    Returns (None, (B, 1)) like SslModel.forward in eval mode."""
    x = x.astype(jnp.float32)
    B = x.shape[0]
    cd = prepped["w1p"].dtype

    if b_tile is None:
        # Lane-aligned tiles targeting nbt >= 2 (so v7x can shard batch tiles
        # across both TensorCores); cap at 2048 lanes (~15 MiB f32 working
        # set, inside the explicit 48 MiB VMEM limit below on every gen).
        half = -(-B // 2)
        b_tile = min(2048, max(128, ((half + 127) // 128) * 128))
    nbt = -(-B // b_tile)
    Bp = nbt * b_tile
    if Bp != B:
        x = jnp.pad(x, ((0, Bp - B), (0, 0), (0, 0)))

    # Single fused relayout: de-interleave stride-2 even/odd positions into
    # 8 channel rows and pack the batch tile onto the lane axis:
    #   x8[t, p*4 + c, l*b_tile + b] = x[t*b_tile + b, c, 2*l + p]
    x5 = x.reshape(nbt, b_tile, NUM_SEQS, L0, 2)       # (t, b, c, l, p)
    x8 = jnp.transpose(x5, (0, 4, 2, 3, 1))            # (t, p, c, l, b)
    x8 = x8.reshape(nbt, 2 * NUM_SEQS, L0 * b_tile).astype(cd)

    in_arrays = (x8, prepped["w1p"], prepped["b1"], prepped["w2"], prepped["b2"],
                 prepped["w3"], prepped["b3"], prepped["fw1"], prepped["fb1"],
                 prepped["fw2c"], prepped["fb2"])
    in_specs = [pl.BlockSpec((None, 2 * NUM_SEQS, L0 * b_tile),
                             lambda t: (t, 0, 0))]
    in_specs += [_const_spec(a.shape) for a in in_arrays[1:]]

    out = pl.pallas_call(
        ssl_kernel,
        out_shape=jax.ShapeDtypeStruct((nbt, 1, b_tile), jnp.float32),
        grid=(nbt,),
        in_specs=in_specs,
        out_specs=pl.BlockSpec((None, 1, b_tile), lambda t: (t, 0, 0)),
        compiler_params=pltpu.CompilerParams(
            dimension_semantics=("parallel",),
            vmem_limit_bytes=48 * 1024 * 1024),
    )(*in_arrays)

    out = out.reshape(Bp)[:B].reshape(B, 1)

    masked_out = None  # eval mode: self.training is False -> masked branch skipped
    return masked_out, out


def make_params(key):
    ks = jax.random.split(key, 10)
    scale = 0.1
    p = {
        "w1": scale * jax.random.normal(ks[0], (8, NUM_SEQS, 5), jnp.float32),
        "b1": scale * jax.random.normal(ks[1], (8,), jnp.float32),
        "w2": scale * jax.random.normal(ks[2], (16, 8, 3), jnp.float32),
        "b2": scale * jax.random.normal(ks[3], (16,), jnp.float32),
        "w3": scale * jax.random.normal(ks[4], (64, 16, 5), jnp.float32),
        "b3": scale * jax.random.normal(ks[5], (64,), jnp.float32),
        "fc1_w": scale * jax.random.normal(ks[6], (64, FC1_IN), jnp.float32),
        "fc1_b": scale * jax.random.normal(ks[7], (64,), jnp.float32),
        "fc2_w": scale * jax.random.normal(ks[8], (1, 64), jnp.float32),
        "fc2_b": scale * jax.random.normal(ks[9], (1,), jnp.float32),
    }
    # TODO(synk): decoder / masked-input branch (ChannelFC + ConvTranspose1d
    # stack) only runs in training mode; not needed for the eval forward here.
    return p


# ----------------------------- pure-JAX reference -----------------------------
def conv1d_ref(x, w, b, stride):
    B, Cin, L = x.shape
    Co, _, K = w.shape
    Lout = (L - K) // stride + 1
    cols = jnp.stack(
        [x[:, :, k:k + stride * (Lout - 1) + 1:stride] for k in range(K)], axis=-1
    )  # (B, Cin, Lout, K)
    return jnp.einsum("bclk,ock->bol", cols, w) + b[None, :, None]


def ssl_forward_ref(x, p):
    x = x.astype(jnp.float32)
    h = jax.nn.relu(conv1d_ref(x, p["w1"], p["b1"], 2))
    h = jax.nn.relu(conv1d_ref(h, p["w2"], p["b2"], 1))
    h = jax.nn.relu(conv1d_ref(h, p["w3"], p["b3"], 1))
    flat = h.reshape(h.shape[0], -1)
    y = jax.nn.relu(flat @ p["fc1_w"].T + p["fc1_b"])
    y = jax.nn.relu(y @ p["fc2_w"].T + p["fc2_b"])
    return y


if __name__ == "__main__":
    key = jax.random.PRNGKey(0)
    kp, kx, kx2 = jax.random.split(key, 3)
    params = make_params(kp)

    # --- small default-shape check (B=2), f32 path ---------------------------
    x = jax.random.normal(kx, (2, NUM_SEQS, SEQ_LEN), jnp.float32)
    prepped = prepare_params(params)                      # one-time weight prep
    fwd = jax.jit(lambda inp: ssl_forward(inp, prepped))
    masked_out, out = fwd(x)
    out = jax.block_until_ready(out)
    ref = ssl_forward_ref(x, params)
    assert masked_out is None
    assert out.shape == (2, 1)
    assert jnp.allclose(out, ref, atol=1e-4, rtol=1e-4), (out, ref)

    # --- multi-tile grid + padded-batch path (grid=(2,), Bp > B) -------------
    xb = jax.random.normal(kx2, (300, NUM_SEQS, SEQ_LEN), jnp.float32)
    _, outb = jax.jit(lambda inp: ssl_forward(inp, prepped))(xb)
    outb = jax.block_until_ready(outb)
    refb = ssl_forward_ref(xb, params)
    assert outb.shape == (300, 1)
    assert jnp.allclose(outb, refb, atol=1e-4, rtol=1e-4)

    # --- optional bf16-operand / f32-accumulate path (looser tolerance) ------
    prepped_bf16 = prepare_params(params, jnp.bfloat16)
    _, out16 = jax.jit(lambda inp: ssl_forward(inp, prepped_bf16))(x)
    out16 = jax.block_until_ready(out16)
    assert out16.shape == (2, 1)
    assert jnp.allclose(out16, ref, atol=1e-1, rtol=1e-1)

    print("KERNEL_OK")
</pallas_src>

<mosaic_0001>
module attributes {stable_mosaic.version = 11 : i64} {
  func.func @ssl_kernel(%arg0: i32, %arg1: memref<1x8x1792xf32, #tpu.memory_space<vmem>>, %arg2: memref<3x8x8xf32, #tpu.memory_space<vmem>>, %arg3: memref<8x1xf32, #tpu.memory_space<vmem>>, %arg4: memref<3x16x8xf32, #tpu.memory_space<vmem>>, %arg5: memref<16x1xf32, #tpu.memory_space<vmem>>, %arg6: memref<5x64x16xf32, #tpu.memory_space<vmem>>, %arg7: memref<64x1xf32, #tpu.memory_space<vmem>>, %arg8: memref<6x64x64xf32, #tpu.memory_space<vmem>>, %arg9: memref<64x1xf32, #tpu.memory_space<vmem>>, %arg10: memref<64x1xf32, #tpu.memory_space<vmem>>, %arg11: memref<1x1xf32, #tpu.memory_space<vmem>>, %arg12: memref<1x1x128xf32, #tpu.memory_space<vmem>>) attributes {dimension_semantics = [#tpu.dimension_semantics<parallel>], iteration_bounds = array<i64: 1>, scalar_prefetch = 0 : i64, scratch_operands = 0 : i64, tpu.core_type = #tpu.core_type<tc>, window_params = [{transform_indices = @transform_0, window_bounds = array<i64: 1, 8, 1792>}, {pipeline_mode = #tpu.pipeline_mode<synchronous>, transform_indices = @transform_1, window_bounds = array<i64: 3, 8, 8>}, {pipeline_mode = #tpu.pipeline_mode<synchronous>, transform_indices = @transform_2, window_bounds = array<i64: 8, 1>}, {pipeline_mode = #tpu.pipeline_mode<synchronous>, transform_indices = @transform_3, window_bounds = array<i64: 3, 16, 8>}, {pipeline_mode = #tpu.pipeline_mode<synchronous>, transform_indices = @transform_4, window_bounds = array<i64: 16, 1>}, {pipeline_mode = #tpu.pipeline_mode<synchronous>, transform_indices = @transform_5, window_bounds = array<i64: 5, 64, 16>}, {pipeline_mode = #tpu.pipeline_mode<synchronous>, transform_indices = @transform_6, window_bounds = array<i64: 64, 1>}, {pipeline_mode = #tpu.pipeline_mode<synchronous>, transform_indices = @transform_7, window_bounds = array<i64: 6, 64, 64>}, {pipeline_mode = #tpu.pipeline_mode<synchronous>, transform_indices = @transform_8, window_bounds = array<i64: 64, 1>}, {pipeline_mode = #tpu.pipeline_mode<synchronous>, transform_indices = @transform_9, window_bounds = array<i64: 64, 1>}, {pipeline_mode = #tpu.pipeline_mode<synchronous>, transform_indices = @transform_10, window_bounds = array<i64: 1, 1>}, {transform_indices = @transform_11, window_bounds = array<i64: 1, 1, 128>}]} {
    %c0 = arith.constant 0 : index
    %c0_0 = arith.constant 0 : index
    %c0_1 = arith.constant 0 : index
    %0 = vector.load %arg1[%c0, %c0_0, %c0_1] : memref<1x8x1792xf32, #tpu.memory_space<vmem>>, vector<1x8x1792xf32>
    %1 = vector.shape_cast %0 : vector<1x8x1792xf32> to vector<8x1792xf32>
    %c0_2 = arith.constant 0 : index
    %c0_3 = arith.constant 0 : index
    %c0_4 = arith.constant 0 : index
    %2 = vector.load %arg2[%c0_2, %c0_3, %c0_4] : memref<3x8x8xf32, #tpu.memory_space<vmem>>, vector<1x8x8xf32>
    %3 = vector.shape_cast %2 : vector<1x8x8xf32> to vector<8x8xf32>
    %4 = vector.extract_strided_slice %1 {offsets = [0, 0], sizes = [8, 1536], strides = [1, 1]} : vector<8x1792xf32> to vector<8x1536xf32>
    %cst = arith.constant dense<0.000000e+00> : vector<8x1536xf32>
    %5 = tpu.matmul %3, %4, %cst {dimension_numbers = #tpu.dot_dimension_numbers<[1], [0], [0], [1], [0, 0, 1, 1], [], []>} : vector<8x8xf32>, vector<8x1536xf32>, vector<8x1536xf32> -> vector<8x1536xf32>
    %c1 = arith.constant 1 : index
    %c0_5 = arith.constant 0 : index
    %c0_6 = arith.constant 0 : index
    %6 = vector.load %arg2[%c1, %c0_5, %c0_6] : memref<3x8x8xf32, #tpu.memory_space<vmem>>, vector<1x8x8xf32>
    %7 = vector.shape_cast %6 : vector<1x8x8xf32> to vector<8x8xf32>
    %8 = vector.extract_strided_slice %1 {offsets = [0, 128], sizes = [8, 1536], strides = [1, 1]} : vector<8x1792xf32> to vector<8x1536xf32>
    %cst_7 = arith.constant dense<0.000000e+00> : vector<8x1536xf32>
    %9 = tpu.matmul %7, %8, %cst_7 {dimension_numbers = #tpu.dot_dimension_numbers<[1], [0], [0], [1], [0, 0, 1, 1], [], []>} : vector<8x8xf32>, vector<8x1536xf32>, vector<8x1536xf32> -> vector<8x1536xf32>
    %10 = arith.addf %5, %9 : vector<8x1536xf32>
    %c2 = arith.constant 2 : index
    %c0_8 = arith.constant 0 : index
    %c0_9 = arith.constant 0 : index
    %11 = vector.load %arg2[%c2, %c0_8, %c0_9] : memref<3x8x8xf32, #tpu.memory_space<vmem>>, vector<1x8x8xf32>
    %12 = vector.shape_cast %11 : vector<1x8x8xf32> to vector<8x8xf32>
    %13 = vector.extract_strided_slice %1 {offsets = [0, 256], sizes = [8, 1536], strides = [1, 1]} : vector<8x1792xf32> to vector<8x1536xf32>
    %cst_10 = arith.constant dense<0.000000e+00> : vector<8x1536xf32>
    %14 = tpu.matmul %12, %13, %cst_10 {dimension_numbers = #tpu.dot_dimension_numbers<[1], [0], [0], [1], [0, 0, 1, 1], [], []>} : vector<8x8xf32>, vector<8x1536xf32>, vector<8x1536xf32> -> vector<8x1536xf32>
    %15 = arith.addf %10, %14 : vector<8x1536xf32>
    %c0_11 = arith.constant 0 : index
    %c0_12 = arith.constant 0 : index
    %16 = vector.load %arg3[%c0_11, %c0_12] : memref<8x1xf32, #tpu.memory_space<vmem>>, vector<8x1xf32>
    %17 = vector.broadcast %16 : vector<8x1xf32> to vector<8x1536xf32>
    %18 = arith.addf %15, %17 : vector<8x1536xf32>
    %cst_13 = arith.constant 0.000000e+00 : f32
    %19 = vector.broadcast %cst_13 : f32 to vector<8x1536xf32>
    %20 = arith.maximumf %18, %19 : vector<8x1536xf32>
    %c0_14 = arith.constant 0 : index
    %c0_15 = arith.constant 0 : index
    %c0_16 = arith.constant 0 : index
    %21 = vector.load %arg4[%c0_14, %c0_15, %c0_16] : memref<3x16x8xf32, #tpu.memory_space<vmem>>, vector<1x16x8xf32>
    %22 = vector.shape_cast %21 : vector<1x16x8xf32> to vector<16x8xf32>
    %23 = vector.extract_strided_slice %20 {offsets = [0, 0], sizes = [8, 1280], strides = [1, 1]} : vector<8x1536xf32> to vector<8x1280xf32>
    %cst_17 = arith.constant dense<0.000000e+00> : vector<16x1280xf32>
    %24 = tpu.matmul %22, %23, %cst_17 {dimension_numbers = #tpu.dot_dimension_numbers<[1], [0], [0], [1], [0, 0, 1, 1], [], []>} : vector<16x8xf32>, vector<8x1280xf32>, vector<16x1280xf32> -> vector<16x1280xf32>
    %c1_18 = arith.constant 1 : index
    %c0_19 = arith.constant 0 : index
    %c0_20 = arith.constant 0 : index
    %25 = vector.load %arg4[%c1_18, %c0_19, %c0_20] : memref<3x16x8xf32, #tpu.memory_space<vmem>>, vector<1x16x8xf32>
    %26 = vector.shape_cast %25 : vector<1x16x8xf32> to vector<16x8xf32>
    %27 = vector.extract_strided_slice %20 {offsets = [0, 128], sizes = [8, 1280], strides = [1, 1]} : vector<8x1536xf32> to vector<8x1280xf32>
    %cst_21 = arith.constant dense<0.000000e+00> : vector<16x1280xf32>
    %28 = tpu.matmul %26, %27, %cst_21 {dimension_numbers = #tpu.dot_dimension_numbers<[1], [0], [0], [1], [0, 0, 1, 1], [], []>} : vector<16x8xf32>, vector<8x1280xf32>, vector<16x1280xf32> -> vector<16x1280xf32>
    %29 = arith.addf %24, %28 : vector<16x1280xf32>
    %c2_22 = arith.constant 2 : index
    %c0_23 = arith.constant 0 : index
    %c0_24 = arith.constant 0 : index
    %30 = vector.load %arg4[%c2_22, %c0_23, %c0_24] : memref<3x16x8xf32, #tpu.memory_space<vmem>>, vector<1x16x8xf32>
    %31 = vector.shape_cast %30 : vector<1x16x8xf32> to vector<16x8xf32>
    %32 = vector.extract_strided_slice %20 {offsets = [0, 256], sizes = [8, 1280], strides = [1, 1]} : vector<8x1536xf32> to vector<8x1280xf32>
    %cst_25 = arith.constant dense<0.000000e+00> : vector<16x1280xf32>
    %33 = tpu.matmul %31, %32, %cst_25 {dimension_numbers = #tpu.dot_dimension_numbers<[1], [0], [0], [1], [0, 0, 1, 1], [], []>} : vector<16x8xf32>, vector<8x1280xf32>, vector<16x1280xf32> -> vector<16x1280xf32>
    %34 = arith.addf %29, %33 : vector<16x1280xf32>
    %c0_26 = arith.constant 0 : index
    %c0_27 = arith.constant 0 : index
    %35 = vector.load %arg5[%c0_26, %c0_27] : memref<16x1xf32, #tpu.memory_space<vmem>>, vector<16x1xf32>
    %36 = vector.broadcast %35 : vector<16x1xf32> to vector<16x1280xf32>
    %37 = arith.addf %34, %36 : vector<16x1280xf32>
    %cst_28 = arith.constant 0.000000e+00 : f32
    %38 = vector.broadcast %cst_28 : f32 to vector<16x1280xf32>
    %39 = arith.maximumf %37, %38 : vector<16x1280xf32>
    %c0_29 = arith.constant 0 : index
    %c0_30 = arith.constant 0 : index
    %c0_31 = arith.constant 0 : index
    %40 = vector.load %arg6[%c0_29, %c0_30, %c0_31] : memref<5x64x16xf32, #tpu.memory_space<vmem>>, vector<1x64x16xf32>
    %41 = vector.shape_cast %40 : vector<1x64x16xf32> to vector<64x16xf32>
    %42 = vector.extract_strided_slice %39 {offsets = [0, 0], sizes = [16, 768], strides = [1, 1]} : vector<16x1280xf32> to vector<16x768xf32>
    %cst_32 = arith.constant dense<0.000000e+00> : vector<64x768xf32>
    %43 = tpu.matmul %41, %42, %cst_32 {dimension_numbers = #tpu.dot_dimension_numbers<[1], [0], [0], [1], [0, 0, 1, 1], [], []>} : vector<64x16xf32>, vector<16x768xf32>, vector<64x768xf32> -> vector<64x768xf32>
    %c1_33 = arith.constant 1 : index
    %c0_34 = arith.constant 0 : index
    %c0_35 = arith.constant 0 : index
    %44 = vector.load %arg6[%c1_33, %c0_34, %c0_35] : memref<5x64x16xf32, #tpu.memory_space<vmem>>, vector<1x64x16xf32>
    %45 = vector.shape_cast %44 : vector<1x64x16xf32> to vector<64x16xf32>
    %46 = vector.extract_strided_slice %39 {offsets = [0, 128], sizes = [16, 768], strides = [1, 1]} : vector<16x1280xf32> to vector<16x768xf32>
    %cst_36 = arith.constant dense<0.000000e+00> : vector<64x768xf32>
    %47 = tpu.matmul %45, %46, %cst_36 {dimension_numbers = #tpu.dot_dimension_numbers<[1], [0], [0], [1], [0, 0, 1, 1], [], []>} : vector<64x16xf32>, vector<16x768xf32>, vector<64x768xf32> -> vector<64x768xf32>
    %48 = arith.addf %43, %47 : vector<64x768xf32>
    %c2_37 = arith.constant 2 : index
    %c0_38 = arith.constant 0 : index
    %c0_39 = arith.constant 0 : index
    %49 = vector.load %arg6[%c2_37, %c0_38, %c0_39] : memref<5x64x16xf32, #tpu.memory_space<vmem>>, vector<1x64x16xf32>
    %50 = vector.shape_cast %49 : vector<1x64x16xf32> to vector<64x16xf32>
    %51 = vector.extract_strided_slice %39 {offsets = [0, 256], sizes = [16, 768], strides = [1, 1]} : vector<16x1280xf32> to vector<16x768xf32>
    %cst_40 = arith.constant dense<0.000000e+00> : vector<64x768xf32>
    %52 = tpu.matmul %50, %51, %cst_40 {dimension_numbers = #tpu.dot_dimension_numbers<[1], [0], [0], [1], [0, 0, 1, 1], [], []>} : vector<64x16xf32>, vector<16x768xf32>, vector<64x768xf32> -> vector<64x768xf32>
    %53 = arith.addf %48, %52 : vector<64x768xf32>
    %c3 = arith.constant 3 : index
    %c0_41 = arith.constant 0 : index
    %c0_42 = arith.constant 0 : index
    %54 = vector.load %arg6[%c3, %c0_41, %c0_42] : memref<5x64x16xf32, #tpu.memory_space<vmem>>, vector<1x64x16xf32>
    %55 = vector.shape_cast %54 : vector<1x64x16xf32> to vector<64x16xf32>
    %56 = vector.extract_strided_slice %39 {offsets = [0, 384], sizes = [16, 768], strides = [1, 1]} : vector<16x1280xf32> to vector<16x768xf32>
    %cst_43 = arith.constant dense<0.000000e+00> : vector<64x768xf32>
    %57 = tpu.matmul %55, %56, %cst_43 {dimension_numbers = #tpu.dot_dimension_numbers<[1], [0], [0], [1], [0, 0, 1, 1], [], []>} : vector<64x16xf32>, vector<16x768xf32>, vector<64x768xf32> -> vector<64x768xf32>
    %58 = arith.addf %53, %57 : vector<64x768xf32>
    %c4 = arith.constant 4 : index
    %c0_44 = arith.constant 0 : index
    %c0_45 = arith.constant 0 : index
    %59 = vector.load %arg6[%c4, %c0_44, %c0_45] : memref<5x64x16xf32, #tpu.memory_space<vmem>>, vector<1x64x16xf32>
    %60 = vector.shape_cast %59 : vector<1x64x16xf32> to vector<64x16xf32>
    %61 = vector.extract_strided_slice %39 {offsets = [0, 512], sizes = [16, 768], strides = [1, 1]} : vector<16x1280xf32> to vector<16x768xf32>
    %cst_46 = arith.constant dense<0.000000e+00> : vector<64x768xf32>
    %62 = tpu.matmul %60, %61, %cst_46 {dimension_numbers = #tpu.dot_dimension_numbers<[1], [0], [0], [1], [0, 0, 1, 1], [], []>} : vector<64x16xf32>, vector<16x768xf32>, vector<64x768xf32> -> vector<64x768xf32>
    %63 = arith.addf %58, %62 : vector<64x768xf32>
    %c0_47 = arith.constant 0 : index
    %c0_48 = arith.constant 0 : index
    %64 = vector.load %arg7[%c0_47, %c0_48] : memref<64x1xf32, #tpu.memory_space<vmem>>, vector<64x1xf32>
    %65 = vector.broadcast %64 : vector<64x1xf32> to vector<64x768xf32>
    %66 = arith.addf %63, %65 : vector<64x768xf32>
    %cst_49 = arith.constant 0.000000e+00 : f32
    %67 = vector.broadcast %cst_49 : f32 to vector<64x768xf32>
    %68 = arith.maximumf %66, %67 : vector<64x768xf32>
    %c0_50 = arith.constant 0 : index
    %c0_51 = arith.constant 0 : index
    %c0_52 = arith.constant 0 : index
    %69 = vector.load %arg8[%c0_50, %c0_51, %c0_52] : memref<6x64x64xf32, #tpu.memory_space<vmem>>, vector<1x64x64xf32>
    %70 = vector.shape_cast %69 : vector<1x64x64xf32> to vector<64x64xf32>
    %71 = vector.extract_strided_slice %68 {offsets = [0, 0], sizes = [64, 128], strides = [1, 1]} : vector<64x768xf32> to vector<64x128xf32>
    %cst_53 = arith.constant dense<0.000000e+00> : vector<64x128xf32>
    %72 = tpu.matmul %70, %71, %cst_53 {dimension_numbers = #tpu.dot_dimension_numbers<[1], [0], [0], [1], [0, 0, 1, 1], [], []>} : vector<64x64xf32>, vector<64x128xf32>, vector<64x128xf32> -> vector<64x128xf32>
    %c1_54 = arith.constant 1 : index
    %c0_55 = arith.constant 0 : index
    %c0_56 = arith.constant 0 : index
    %73 = vector.load %arg8[%c1_54, %c0_55, %c0_56] : memref<6x64x64xf32, #tpu.memory_space<vmem>>, vector<1x64x64xf32>
    %74 = vector.shape_cast %73 : vector<1x64x64xf32> to vector<64x64xf32>
    %75 = vector.extract_strided_slice %68 {offsets = [0, 128], sizes = [64, 128], strides = [1, 1]} : vector<64x768xf32> to vector<64x128xf32>
    %cst_57 = arith.constant dense<0.000000e+00> : vector<64x128xf32>
    %76 = tpu.matmul %74, %75, %cst_57 {dimension_numbers = #tpu.dot_dimension_numbers<[1], [0], [0], [1], [0, 0, 1, 1], [], []>} : vector<64x64xf32>, vector<64x128xf32>, vector<64x128xf32> -> vector<64x128xf32>
    %77 = arith.addf %72, %76 : vector<64x128xf32>
    %c2_58 = arith.constant 2 : index
    %c0_59 = arith.constant 0 : index
    %c0_60 = arith.constant 0 : index
    %78 = vector.load %arg8[%c2_58, %c0_59, %c0_60] : memref<6x64x64xf32, #tpu.memory_space<vmem>>, vector<1x64x64xf32>
    %79 = vector.shape_cast %78 : vector<1x64x64xf32> to vector<64x64xf32>
    %80 = vector.extract_strided_slice %68 {offsets = [0, 256], sizes = [64, 128], strides = [1, 1]} : vector<64x768xf32> to vector<64x128xf32>
    %cst_61 = arith.constant dense<0.000000e+00> : vector<64x128xf32>
    %81 = tpu.matmul %79, %80, %cst_61 {dimension_numbers = #tpu.dot_dimension_numbers<[1], [0], [0], [1], [0, 0, 1, 1], [], []>} : vector<64x64xf32>, vector<64x128xf32>, vector<64x128xf32> -> vector<64x128xf32>
    %82 = arith.addf %77, %81 : vector<64x128xf32>
    %c3_62 = arith.constant 3 : index
    %c0_63 = arith.constant 0 : index
    %c0_64 = arith.constant 0 : index
    %83 = vector.load %arg8[%c3_62, %c0_63, %c0_64] : memref<6x64x64xf32, #tpu.memory_space<vmem>>, vector<1x64x64xf32>
    %84 = vector.shape_cast %83 : vector<1x64x64xf32> to vector<64x64xf32>
    %85 = vector.extract_strided_slice %68 {offsets = [0, 384], sizes = [64, 128], strides = [1, 1]} : vector<64x768xf32> to vector<64x128xf32>
    %cst_65 = arith.constant dense<0.000000e+00> : vector<64x128xf32>
    %86 = tpu.matmul %84, %85, %cst_65 {dimension_numbers = #tpu.dot_dimension_numbers<[1], [0], [0], [1], [0, 0, 1, 1], [], []>} : vector<64x64xf32>, vector<64x128xf32>, vector<64x128xf32> -> vector<64x128xf32>
    %87 = arith.addf %82, %86 : vector<64x128xf32>
    %c4_66 = arith.constant 4 : index
    %c0_67 = arith.constant 0 : index
    %c0_68 = arith.constant 0 : index
    %88 = vector.load %arg8[%c4_66, %c0_67, %c0_68] : memref<6x64x64xf32, #tpu.memory_space<vmem>>, vector<1x64x64xf32>
    %89 = vector.shape_cast %88 : vector<1x64x64xf32> to vector<64x64xf32>
    %90 = vector.extract_strided_slice %68 {offsets = [0, 512], sizes = [64, 128], strides = [1, 1]} : vector<64x768xf32> to vector<64x128xf32>
    %cst_69 = arith.constant dense<0.000000e+00> : vector<64x128xf32>
    %91 = tpu.matmul %89, %90, %cst_69 {dimension_numbers = #tpu.dot_dimension_numbers<[1], [0], [0], [1], [0, 0, 1, 1], [], []>} : vector<64x64xf32>, vector<64x128xf32>, vector<64x128xf32> -> vector<64x128xf32>
    %92 = arith.addf %87, %91 : vector<64x128xf32>
    %c5 = arith.constant 5 : index
    %c0_70 = arith.constant 0 : index
    %c0_71 = arith.constant 0 : index
    %93 = vector.load %arg8[%c5, %c0_70, %c0_71] : memref<6x64x64xf32, #tpu.memory_space<vmem>>, vector<1x64x64xf32>
    %94 = vector.shape_cast %93 : vector<1x64x64xf32> to vector<64x64xf32>
    %95 = vector.extract_strided_slice %68 {offsets = [0, 640], sizes = [64, 128], strides = [1, 1]} : vector<64x768xf32> to vector<64x128xf32>
    %cst_72 = arith.constant dense<0.000000e+00> : vector<64x128xf32>
    %96 = tpu.matmul %94, %95, %cst_72 {dimension_numbers = #tpu.dot_dimension_numbers<[1], [0], [0], [1], [0, 0, 1, 1], [], []>} : vector<64x64xf32>, vector<64x128xf32>, vector<64x128xf32> -> vector<64x128xf32>
    %97 = arith.addf %92, %96 : vector<64x128xf32>
    %c0_73 = arith.constant 0 : index
    %c0_74 = arith.constant 0 : index
    %98 = vector.load %arg9[%c0_73, %c0_74] : memref<64x1xf32, #tpu.memory_space<vmem>>, vector<64x1xf32>
    %99 = vector.broadcast %98 : vector<64x1xf32> to vector<64x128xf32>
    %100 = arith.addf %97, %99 : vector<64x128xf32>
    %cst_75 = arith.constant 0.000000e+00 : f32
    %101 = vector.broadcast %cst_75 : f32 to vector<64x128xf32>
    %102 = arith.maximumf %100, %101 : vector<64x128xf32>
    %c0_76 = arith.constant 0 : index
    %c0_77 = arith.constant 0 : index
    %103 = vector.load %arg10[%c0_76, %c0_77] : memref<64x1xf32, #tpu.memory_space<vmem>>, vector<64x1xf32>
    %104 = vector.broadcast %103 : vector<64x1xf32> to vector<64x128xf32>
    %105 = arith.mulf %102, %104 : vector<64x128xf32>
    %cst_78 = arith.constant dense<0.000000e+00> : vector<128xf32>
    %106 = vector.multi_reduction <add>, %105, %cst_78 [0] : vector<64x128xf32> to vector<128xf32>
    %107 = vector.shape_cast %106 : vector<128xf32> to vector<1x128xf32>
    %c0_79 = arith.constant 0 : index
    %c0_80 = arith.constant 0 : index
    %108 = vector.load %arg11[%c0_79, %c0_80] : memref<1x1xf32, #tpu.memory_space<vmem>>, vector<1x1xf32>
    %109 = vector.broadcast %108 : vector<1x1xf32> to vector<1x128xf32>
    %110 = arith.addf %107, %109 : vector<1x128xf32>
    %cst_81 = arith.constant 0.000000e+00 : f32
    %111 = vector.broadcast %cst_81 : f32 to vector<1x128xf32>
    %112 = arith.maximumf %110, %111 : vector<1x128xf32>
    %c0_82 = arith.constant 0 : index
    %c0_83 = arith.constant 0 : index
    %c0_84 = arith.constant 0 : index
    %113 = vector.load %arg12[%c0_82, %c0_83, %c0_84] : memref<1x1x128xf32, #tpu.memory_space<vmem>>, vector<1x1x128xf32>
    %114 = vector.shape_cast %113 : vector<1x1x128xf32> to vector<1x128xf32>
    %115 = vector.shape_cast %112 : vector<1x128xf32> to vector<1x1x128xf32>
    tpu.vector_store %arg12[%c0_82, %c0_83, %c0_84], %115 {strides = array<i32>} : memref<1x1x128xf32, #tpu.memory_space<vmem>>, vector<1x1x128xf32>,
    return
  }
  func.func @transform_0(%arg0: i32) -> (i32, i32, i32) {
    %c0_i32 = arith.constant 0 : i32
    %c0_i32_0 = arith.constant 0 : i32
    %c0_i32_1 = arith.constant 0 : i32
    return %arg0, %c0_i32, %c0_i32_0 : i32, i32, i32
  }
  func.func @transform_1(%arg0: i32) -> (i32, i32, i32) {
    %c0_i32 = arith.constant 0 : i32
    %c0_i32_0 = arith.constant 0 : i32
    %c0_i32_1 = arith.constant 0 : i32
    %c0_i32_2 = arith.constant 0 : i32
    return %c0_i32, %c0_i32_0, %c0_i32_1 : i32, i32, i32
  }
  func.func @transform_2(%arg0: i32) -> (i32, i32) {
    %c0_i32 = arith.constant 0 : i32
    %c0_i32_0 = arith.constant 0 : i32
    %c0_i32_1 = arith.constant 0 : i32
    return %c0_i32, %c0_i32_0 : i32, i32
  }
  func.func @transform_3(%arg0: i32) -> (i32, i32, i32) {
    %c0_i32 = arith.constant 0 : i32
    %c0_i32_0 = arith.constant 0 : i32
    %c0_i32_1 = arith.constant 0 : i32
    %c0_i32_2 = arith.constant 0 : i32
    return %c0_i32, %c0_i32_0, %c0_i32_1 : i32, i32, i32
  }
  func.func @transform_4(%arg0: i32) -> (i32, i32) {
    %c0_i32 = arith.constant 0 : i32
    %c0_i32_0 = arith.constant 0 : i32
    %c0_i32_1 = arith.constant 0 : i32
    return %c0_i32, %c0_i32_0 : i32, i32
  }
  func.func @transform_5(%arg0: i32) -> (i32, i32, i32) {
    %c0_i32 = arith.constant 0 : i32
    %c0_i32_0 = arith.constant 0 : i32
    %c0_i32_1 = arith.constant 0 : i32
    %c0_i32_2 = arith.constant 0 : i32
    return %c0_i32, %c0_i32_0, %c0_i32_1 : i32, i32, i32
  }
  func.func @transform_6(%arg0: i32) -> (i32, i32) {
    %c0_i32 = arith.constant 0 : i32
    %c0_i32_0 = arith.constant 0 : i32
    %c0_i32_1 = arith.constant 0 : i32
    return %c0_i32, %c0_i32_0 : i32, i32
  }
  func.func @transform_7(%arg0: i32) -> (i32, i32, i32) {
    %c0_i32 = arith.constant 0 : i32
    %c0_i32_0 = arith.constant 0 : i32
    %c0_i32_1 = arith.constant 0 : i32
    %c0_i32_2 = arith.constant 0 : i32
    return %c0_i32, %c0_i32_0, %c0_i32_1 : i32, i32, i32
  }
  func.func @transform_8(%arg0: i32) -> (i32, i32) {
    %c0_i32 = arith.constant 0 : i32
    %c0_i32_0 = arith.constant 0 : i32
    %c0_i32_1 = arith.constant 0 : i32
    return %c0_i32, %c0_i32_0 : i32, i32
  }
  func.func @transform_9(%arg0: i32) -> (i32, i32) {
    %c0_i32 = arith.constant 0 : i32
    %c0_i32_0 = arith.constant 0 : i32
    %c0_i32_1 = arith.constant 0 : i32
    return %c0_i32, %c0_i32_0 : i32, i32
  }
  func.func @transform_10(%arg0: i32) -> (i32, i32) {
    %c0_i32 = arith.constant 0 : i32
    %c0_i32_0 = arith.constant 0 : i32
    %c0_i32_1 = arith.constant 0 : i32
    return %c0_i32, %c0_i32_0 : i32, i32
  }
  func.func @transform_11(%arg0: i32) -> (i32, i32, i32) {
    %c0_i32 = arith.constant 0 : i32
    %c0_i32_0 = arith.constant 0 : i32
    %c0_i32_1 = arith.constant 0 : i32
    return %arg0, %c0_i32, %c0_i32_0 : i32, i32, i32
  }
}

</mosaic_0001>

<bundles_post_ra>
// kernel: _lambda_.1
= control target key start
LH: loop header
LB: loop body
LE: loop exit
PB: predicated region body
PF: predicated region fallthrough
CT: control target
= control target key end

     0   :  { %s8243_s0 = inlined_call_operand.vmem [shape: f32[1,8,1792], index: 0, kind: input, shape index: {}]   ;;  %s8244_s1 = inlined_call_operand.vmem [shape: f32[3,8,8], index: 1, kind: input, shape index: {}]   ;;  %s8245_s2 = inlined_call_operand.vmem [shape: f32[8,1], index: 2, kind: input, shape index: {}]   ;;  %s8246_s3 = inlined_call_operand.hbm [shape: f32[3,16,8], index: 3, kind: input, shape index: {}]   ;;  %s8247_s4 = inlined_call_operand.hbm [shape: f32[16,1], index: 4, kind: input, shape index: {}]   ;;  %s8248_s5 = inlined_call_operand.vmem [shape: f32[5,64,16], index: 5, kind: input, shape index: {}]   ;;  %s8249_s6 = inlined_call_operand.hbm [shape: f32[64,1], index: 6, kind: input, shape index: {}]   ;;  %s8250_s7 = inlined_call_operand.hbm [shape: f32[6,64,64], index: 7, kind: input, shape index: {}]   ;;  %s8251_s8 = inlined_call_operand.hbm [shape: f32[64,1], index: 8, kind: input, shape index: {}]   ;;  %s8252_s9 = inlined_call_operand.hbm [shape: f32[64,1], index: 9, kind: input, shape index: {}]   ;;  %s8253_s10 = inlined_call_operand.<no memory space> [shape: f32[1,1], index: 10, kind: input, shape index: {}]   ;;  %s8254_s11 = inlined_call_operand.vmem [shape: f32[1,1,128], index: 11, kind: output, shape index: {}]  }
   0x1   :  { %v16_v0 = vstv %s8253_s10 }
   0x2   :  { %17 = vst [vmem:[#allocation2] sm:$0x1] %v16_v0 }
   0x3   :  { %18 = vsyncpa [#allocation4], 0 }
   0x4   :  { %19 = vsyncpa [#allocation6], 0 }
   0x5   :  { %20 = vsyncpa [#allocation9], 0 }
   0x6   :  { %21 = vsyncpa [#allocation12], 0  ;;  %s6540_s19 = smov [#allocation5]   ;;  %s6541_s21 = smov [#allocation8]  }
   0x7   :  { %s45_s20 = sshll.u32 %s6540_s19, 4  ;;  %s71_s22 = sshll.u32 %s6541_s21, 4  ;;  %s46_s20 = int_to_ptr.vmem [resolvable:$true] %s45_s20  ;;  %s72_s22 = int_to_ptr.vmem [resolvable:$true] %s71_s22 }
   0x8   :  { %s6420_s23 = scalar_lea.vmem %s46_s20, 256  ;;  %p6425_p1 = scmp.lt.s32.totalorder %s46_s20, %s46_s20 }
   0x9   :  { %p6421_p0 = scmp.ne.s32.totalorder %s46_s20, %s6420_s23  ;;  %p6426_p2 = scmp.lt.s32.totalorder %s6420_s23, %s6420_s23 }
   0xb   :  { %p6427_p3 = por %p6426_p2, %p6425_p1 }
   0xd   :  { %p6428_p4 = pnand %p6427_p3, %p6421_p0 }
   0xf   :  { %6431 = shalt.err (!%p6428_p4)
}
  0x10   :  { %s6542_s24 = smov 128   ;;  %s6543_s10 = smov 8  }
  0x11   :  { %51 = dma.hbm_to_vmem [thread:$0]  %s8247_s4, 256, %s46_s20, [#allocation6], %s6542_s24, %s6542_s24, %s6543_s10  }
  0x12   :  { %s6440_s27 = scalar_lea.vmem %s72_s22, 6144  ;;  %p6445_p6 = scmp.lt.s32.totalorder %s72_s22, %s72_s22 }
  0x13   :  { %p6441_p5 = scmp.ne.s32.totalorder %s72_s22, %s6440_s27  ;;  %p6446_p7 = scmp.lt.s32.totalorder %s6440_s27, %s6440_s27 }
  0x15   :  { %p6447_p8 = por %p6446_p7, %p6445_p6 }
  0x17   :  { %p6448_p9 = pnand %p6447_p8, %p6441_p5 }
  0x19   :  { %6451 = shalt.err (!%p6448_p9)
}
  0x1a   :  { %77 = dma.hbm_to_vmem [thread:$0]  %s8250_s7, 6144, %s72_s22, [#allocation9], %s6542_s24, %s6542_s24, %s6543_s10  }
  0x1b   :  { %s6544_s30 = smov [#allocation3]   ;;  %s6545_s13 = smov [#allocation7]  }
  0x1c   :  { %s33_s12 = sshll.u32 %s6544_s30, 4  ;;  %s59_s14 = sshll.u32 %s6545_s13, 4  ;;  %s34_s12 = int_to_ptr.vmem [resolvable:$true] %s33_s12  ;;  %s60_s14 = int_to_ptr.vmem [resolvable:$true] %s59_s14 }
  0x1d   :  { %s6460_s4 = scalar_lea.vmem %s34_s12, 768  ;;  %p6465_p11 = scmp.lt.s32.totalorder %s34_s12, %s34_s12 }
  0x1e   :  { %p6461_p10 = scmp.ne.s32.totalorder %s34_s12, %s6460_s4  ;;  %p6466_p12 = scmp.lt.s32.totalorder %s6460_s4, %s6460_s4 }
  0x20   :  { %p6467_p13 = por %p6466_p12, %p6465_p11 }
  0x22   :  { %p6468_p0 = pnand %p6467_p13, %p6461_p10 }
  0x24   :  { %6471 = shalt.err (!%p6468_p0)
}
  0x25   :  { %39 = dma.hbm_to_vmem [thread:$0]  %s8246_s3, 768, %s34_s12, [#allocation4], %s6542_s24, %s6542_s24, %s6543_s10  }
  0x26   :  { %s6480_s7 = scalar_lea.vmem %s60_s14, 1024  ;;  %p6485_p2 = scmp.lt.s32.totalorder %s60_s14, %s60_s14 }
  0x27   :  { %p6481_p1 = scmp.ne.s32.totalorder %s60_s14, %s6480_s7  ;;  %p6486_p3 = scmp.lt.s32.totalorder %s6480_s7, %s6480_s7 }
  0x29   :  { %p6487_p4 = por %p6486_p3, %p6485_p2 }
  0x2b   :  { %p6488_p5 = pnand %p6487_p4, %p6481_p1 }
  0x2d   :  { %6491 = shalt.err (!%p6488_p5)
}
  0x2e   :  { %65 = dma.hbm_to_vmem [thread:$0]  %s8249_s6, 1024, %s60_s14, [#allocation6], %s6542_s24, %s6542_s24, %s6543_s10  }
  0x2f   :  { %s6546_s19 = smov [#allocation10]   ;;  %s6547_s21 = smov [#allocation11]  }
  0x30   :  { %s83_s20 = sshll.u32 %s6546_s19, 4  ;;  %s95_s22 = sshll.u32 %s6547_s21, 4  ;;  %s84_s20 = int_to_ptr.vmem [resolvable:$true] %s83_s20  ;;  %s96_s22 = int_to_ptr.vmem [resolvable:$true] %s95_s22 }
  0x31   :  { %s6500_s3 = scalar_lea.vmem %s84_s20, 1024  ;;  %p6505_p7 = scmp.lt.s32.totalorder %s84_s20, %s84_s20 }
  0x32   :  { %p6501_p6 = scmp.ne.s32.totalorder %s84_s20, %s6500_s3  ;;  %p6506_p8 = scmp.lt.s32.totalorder %s6500_s3, %s6500_s3 }
  0x34   :  { %p6507_p9 = por %p6506_p8, %p6505_p7 }
  0x36   :  { %p6508_p10 = pnand %p6507_p9, %p6501_p6 }
  0x38   :  { %6511 = shalt.err (!%p6508_p10)
}
  0x39   :  { %89 = dma.hbm_to_vmem [thread:$0]  %s8251_s8, 1024, %s84_s20, [#allocation9], %s6542_s24, %s6542_s24, %s6543_s10  }
  0x3a   :  { %s6520_s6 = scalar_lea.vmem %s96_s22, 1024  ;;  %p6525_p12 = scmp.lt.s32.totalorder %s96_s22, %s96_s22 }
  0x3b   :  { %p6521_p11 = scmp.ne.s32.totalorder %s96_s22, %s6520_s6  ;;  %p6526_p13 = scmp.lt.s32.totalorder %s6520_s6, %s6520_s6 }
  0x3d   :  { %p6527_p0 = por %p6526_p13, %p6525_p12 }
  0x3f   :  { %p6528_p1 = pnand %p6527_p0, %p6521_p11 }
  0x41   :  { %6531 = shalt.err (!%p6528_p1)
}
  0x42   :  { %101 = dma.hbm_to_vmem [thread:$0]  %s8252_s9, 1024, %s96_s22, [#allocation12], %s6542_s24, %s6542_s24, %s6543_s10  }
  0x43   :  { %6532 = dma.done.wait [#allocation4], 768  }
  0x44   :  { %6533 = vsyncadd [#allocation4], 4294966528 }
  0x45   :  { %6534 = dma.done.wait [#allocation6], 1280  }
  0x46   :  { %6535 = vsyncadd [#allocation6], 4294966016 }
  0x47   :  { %6536 = dma.done.wait [#allocation9], 7168  }
  0x48   :  { %6537 = vsyncadd [#allocation9], 4294960128 }
  0x49   :  { %6538 = dma.done.wait [#allocation12], 1024  }
  0x4a   :  { %6539 = vsyncadd [#allocation12], 4294966272  ;;  %v6548_v1 = vmov 0.0   ;;  %v6549_v2 = vmov 0   ;;  %v124_v3 = vld [vmem:[%s8243_s0 + $0x10] sm:$0xff]  ;;  %v123_v5 = vld [vmem:[%s8243_s0 + $0x8] sm:$0xff] }
  0x4b   :  { %207 = vmatprep.mubr.f32.mxu1 %v6548_v1  ;;  %349 = vmatprep.mubr.f32.mxu0 %v6548_v1  ;;  %v6657_v4 = vld [vmem:[%s8243_s0 + $0x30] sm:$0xff]  ;;  %vm139_vm0 = vcmask 64512   ;;  %v6666_v6 = vld [vmem:[%s8243_s0 + $0x28] sm:$0xff]  ;;  %v6674_v8 = vld [vmem:[%s8243_s0 + $0x20] sm:$0xff]  ;;  %vm2741_vm1 = vcmask 130048   ;;  %vm4889_vm2 = vcmask 523264  }
  0x4c   :  { %6410 = vset.pattern.permute.xlu0 %v6549_v2  ;;  %6411 = vset.pattern.permute.xlu1 %v6549_v2  ;;  %v5886_v7 = vld [vmem:[%s8244_s1 + $0x8] sm:$0xff]  ;;  %v6680_v9 = vld [vmem:[%s8243_s0 + $0x50] sm:$0xff]  ;;  %v125_v10 = vld [vmem:[%s8243_s0 + $0x18] sm:$0xff] }
  0x4d   :  { %173 = vmatprep.subr.mxu1 %v124_v3  ;;  %315 = vmatprep.subr.mxu0 %v6657_v4  ;;  %v6690_v11 = vld [vmem:[%s8243_s0 + $0x48] sm:$0xff]  ;;  %v130_v12 = vld [vmem:[%s8243_s0 + $0x40] sm:$0xff]  ;;  %v129_v13 = vld [vmem:[%s8243_s0 + $0x38] sm:$0xff] }
  0x4e   :  { %174 = vmatpush1.msra.mxu1 %v123_v5  ;;  %316 = vmatpush1.msra.mxu0 %v6666_v6  ;;  %v122_v14 = vld [vmem:[%s8243_s0] sm:$0xff]  ;;  %v133_v17 = vld [vmem:[%s8243_s0 + $0x58] sm:$0xff]  ;;  %v5899_v18 = vld [vmem:[%s8244_s1 + $0x10] sm:$0xff] }
  0x4f   :  { %5887 = vmatmul.mubr.msk.f32.vlgmr.msra.gmra.mxu1 %vm139_vm0, %v5886_v7  ;;  %5889 = vmatmul.mubr.msk.f32.vlgmr.msra.gmra.mxu0 %vm139_vm0, %v5886_v7  ;;  %v136_v15 = vld [vmem:[%s8244_s1] sm:$0xff]  ;;  %v135_v20 = vld [vmem:[%s8243_s0 + $0x68] sm:$0xff]  ;;  %v4734_v22 = vld [vmem:[#allocation7 + $0x30] sm:$0xff] }
  0x50   :  { %244 = vmatprep.subr.mxu1 %v6674_v8  ;;  %457 = vmatprep.subr.mxu0 %v6680_v9  ;;  %v134_v16 = vld [vmem:[%s8243_s0 + $0x60] sm:$0xff]  ;;  %v4730_v24 = vld [vmem:[#allocation7 + $0x10] sm:$0xff]  ;;  %v5733_v26 = vld [vmem:[#allocation10 + $0x8] sm:$0xff] }
  0x51   :  { %245 = vmatpush1.msra.mxu1 %v125_v10  ;;  %278 = vmatprep.mubr.f32.mxu1 %v6548_v1  ;;  %v1441_v19 = vld [vmem:[%s8245_s2] sm:$0xff]  ;;  %v5797_v28 = vld [vmem:[#allocation11 + $0x8] sm:$0xff]  ;;  %v5798_v29 = vld [vmem:[#allocation11 + $0x10] sm:$0xff] }
  0x52   :  { %458 = vmatpush1.msra.mxu0 %v6690_v11  ;;  %491 = vmatprep.mubr.f32.mxu0 %v6548_v1  ;;  %v2673_v21 = vld [vmem:[#allocation5 + $0x8] sm:$0xff]  ;;  %v4732_v23 = vld [vmem:[#allocation7 + $0x20] sm:$0xff]  ;;  %v5801_v32 = vld [vmem:[#allocation11 + $0x28] sm:$0xff] }
  0x53   :  { %5888 = vmatmul.mubr.msk.f32.vlgmr.msra.gmra.mxu1 %vm139_vm0, %v5886_v7  ;;  %5891 = vmatmul.mubr.msk.f32.vlgmr.msra.gmra.mxu0 %vm139_vm0, %v5886_v7  ;;  %v4728_v25 = vld [vmem:[#allocation7] sm:$0xff]  ;;  %v5735_v27 = vld [vmem:[#allocation10 + $0x18] sm:$0xff]  ;;  %v2672_v34 = vld [vmem:[#allocation5] sm:$0xff] }
  0x54   :  { %386 = vmatprep.subr.mxu1 %v130_v12  ;;  %602 = vmatprep.subr.mxu0 %v123_v5  ;;  %v5799_v30 = vld [vmem:[#allocation11 + $0x18] sm:$0xff]  ;;  %v5800_v31 = vld [vmem:[#allocation11 + $0x20] sm:$0xff]  ;;  %v4733_v36 = vld [vmem:[#allocation7 + $0x28] sm:$0xff] }
  0x55   :  { %387 = vmatpush1.msra.mxu1 %v129_v13  ;;  %420 = vmatprep.mubr.f32.mxu1 %v6548_v1  ;;  %v5803_v33 = vld [vmem:[#allocation11 + $0x38] sm:$0xff]  ;;  %v4729_v38 = vld [vmem:[#allocation7 + $0x8] sm:$0xff]  ;;  %v5732_v39 = vld [vmem:[#allocation10] sm:$0xff] }
  0x56   :  { %603 = vmatpush1.msra.mxu0 %v122_v14  ;;  %636 = vmatprep.mubr.f32.mxu0 %v6548_v1  ;;  %v4735_v35 = vld [vmem:[#allocation7 + $0x38] sm:$0xff]  ;;  %v5734_v40 = vld [vmem:[#allocation10 + $0x10] sm:$0xff]  ;;  %v5796_v41 = vld [vmem:[#allocation11] sm:$0xff] }
  0x57   :  { %5890 = vmatmul.mubr.msk.f32.vlgmr.msra.gmra.mxu1 %vm139_vm0, %v5886_v7  ;;  %5893 = vmatmul.mubr.msk.f32.vlgmr.msra.gmra.mxu0 %vm139_vm0, %v136_v15  ;;  %v4731_v37 = vld [vmem:[#allocation7 + $0x18] sm:$0xff]  ;;  %v5736_v42 = vld [vmem:[#allocation10 + $0x20] sm:$0xff]  ;;  %v5737_v47 = vld [vmem:[#allocation10 + $0x28] sm:$0xff] }
  0x58   :  { %528 = vmatprep.subr.mxu1 %v134_v16  ;;  %744 = vmatprep.subr.mxu0 %v6666_v6  ;;  %v5738_v52 = vld [vmem:[#allocation10 + $0x30] sm:$0xff]  ;;  %v5739_v57 = vld [vmem:[#allocation10 + $0x38] sm:$0xff] }
  0x59   :  { %529 = vmatpush1.msra.mxu1 %v133_v17  ;;  %562 = vmatprep.mubr.f32.mxu1 %v6548_v1  ;;  %v5802_v62 = vld [vmem:[#allocation11 + $0x30] sm:$0xff] }
  0x5a   :  { %745 = vmatpush1.msra.mxu0 %v6674_v8  ;;  %778 = vmatprep.mubr.f32.mxu0 %v6548_v1 }
  0x5b   :  { %5892 = vmatmul.mubr.msk.f32.vlgmr.msra.gmra.mxu1 %vm139_vm0, %v5886_v7  ;;  %5895 = vmatmul.mubr.msk.f32.vlgmr.msra.gmra.mxu0 %vm139_vm0, %v136_v15 }
  0x5c   :  { %673 = vmatprep.subr.mxu1 %v125_v10  ;;  %886 = vmatprep.subr.mxu0 %v6690_v11 }
  0x5d   :  { %674 = vmatpush1.msra.mxu1 %v124_v3  ;;  %707 = vmatprep.mubr.f32.mxu1 %v6548_v1 }
  0x5e   :  { %887 = vmatpush1.msra.mxu0 %v130_v12  ;;  %920 = vmatprep.mubr.f32.mxu0 %v6548_v1 }
  0x5f   :  { %5894 = vmatmul.mubr.msk.f32.vlgmr.msra.gmra.mxu1 %vm139_vm0, %v136_v15  ;;  %5897 = vmatmul.mubr.msk.f32.vlgmr.msra.gmra.mxu0 %vm139_vm0, %v136_v15 }
  0x60   :  { %815 = vmatprep.subr.mxu1 %v129_v13  ;;  %1033 = vmatprep.subr.mxu0 %v125_v10 }
  0x61   :  { %816 = vmatpush1.msra.mxu1 %v6657_v4  ;;  %849 = vmatprep.mubr.f32.mxu1 %v6548_v1 }
  0x62   :  { %1034 = vmatpush1.msra.mxu0 %v124_v3  ;;  %1067 = vmatprep.mubr.f32.mxu0 %v6548_v1 }
  0x63   :  { %5896 = vmatmul.mubr.msk.f32.vlgmr.msra.gmra.mxu1 %vm139_vm0, %v136_v15  ;;  %5900 = vmatmul.mubr.msk.f32.vlgmr.msra.gmra.mxu0 %vm139_vm0, %v5899_v18 }
  0x64   :  { %957 = vmatprep.subr.mxu1 %v133_v17  ;;  %1175 = vmatprep.subr.mxu0 %v129_v13 }
  0x65   :  { %958 = vmatpush1.msra.mxu1 %v6680_v9  ;;  %991 = vmatprep.mubr.f32.mxu1 %v6548_v1 }
  0x66   :  { %1176 = vmatpush1.msra.mxu0 %v6657_v4  ;;  %1209 = vmatprep.mubr.f32.mxu0 %v6548_v1  ;;  %v5865_v4 = vld [vmem:[#allocation2] sm:$0x1] }
  0x67   :  { %5898 = vmatmul.mubr.msk.f32.vlgmr.msra.gmra.mxu1 %vm139_vm0, %v136_v15  ;;  %5902 = vmatmul.mubr.msk.f32.vlgmr.msra.gmra.mxu0 %vm139_vm0, %v5899_v18 }
  0x68   :  { %1104 = vmatprep.subr.mxu1 %v6666_v6  ;;  %1317 = vmatprep.subr.mxu0 %v133_v17 }
  0x69   :  { %1105 = vmatpush1.msra.mxu1 %v6674_v8  ;;  %1138 = vmatprep.mubr.f32.mxu1 %v6548_v1 }
  0x6a   :  { %1318 = vmatpush1.msra.mxu0 %v6680_v9  ;;  %1351 = vmatprep.mubr.f32.mxu0 %v6548_v1 }
  0x6b   :  { %5901 = vmatmul.mubr.msk.f32.vlgmr.msra.gmra.mxu1 %vm139_vm0, %v5899_v18  ;;  %5904 = vmatmul.mubr.msk.f32.vlgmr.msra.gmra.mxu0 %vm139_vm0, %v5899_v18 }
  0x6c   :  { %1246 = vmatprep.subr.mxu1 %v6690_v11  ;;  %1280 = vmatprep.mubr.f32.mxu1 %v6548_v1 }
  0x6d   :  { %1247 = vmatpush1.msra.mxu1 %v130_v12  ;;  %1444 = vperm.xlu0 %6410, %v1441_v19  }
  0x6e   :  { %1388 = vmatprep.subr.mxu1 %v135_v20  ;;  %1546 = vmatprep.mubr.f32.mxu0 %v6548_v1 }
  0x6f   :  { %5903 = vmatmul.mubr.msk.f32.vlgmr.msra.gmra.mxu1 %vm139_vm0, %v5899_v18  ;;  %2676 = vperm.xlu1 %6411, %v2672_v34  }
  0x70   :  { %1389 = vmatpush1.msra.mxu1 %v134_v16  ;;  %1422 = vmatprep.mubr.f32.mxu1 %v6548_v1 }
  0x71   :  { %2681 = vperm.xlu0 %6410, %v2673_v21  }
  0x73   :  { %5905 = vmatmul.mubr.msk.f32.vlgmr.msra.gmra.mxu1 %vm139_vm0, %v5899_v18  ;;  %4773 = vperm.xlu1 %6411, %v4735_v35  }
  0x74   :  { %1623 = vmatprep.mubr.f32.mxu1 %v6548_v1 }
  0x75   :  { %4768 = vperm.xlu0 %6410, %v4734_v22  }
  0x77   :  { %4763 = vperm.xlu1 %6411, %v4733_v36  }
  0x79   :  { %4758 = vperm.xlu0 %6410, %v4732_v23  }
  0x7b   :  { %4753 = vperm.xlu1 %6411, %v4731_v37  }
  0x7d   :  { %4748 = vperm.xlu0 %6410, %v4730_v24  }
  0x7f   :  { %4743 = vperm.xlu1 %6411, %v4729_v38  }
  0x81   :  { %4738 = vperm.xlu0 %6410, %v4728_v25  }
  0x83   :  { %5742 = vperm.xlu1 %6411, %v5732_v39  }
  0x85   :  { %5747 = vperm.xlu0 %6410, %v5733_v26  }
  0x87   :  { %5752 = vperm.xlu1 %6411, %v5734_v40  }
  0x89   :  { %5757 = vperm.xlu0 %6410, %v5735_v27  }
  0x8b   :  { %5806 = vperm.xlu1 %6411, %v5796_v41  }
  0x8d   :  { %5811 = vperm.xlu0 %6410, %v5797_v28  }
  0x8f   :  { %5762 = vperm.xlu1 %6411, %v5736_v42  }
  0x91   :  { %5816 = vperm.xlu0 %6410, %v5798_v29  }
  0x93   :  { %5767 = vperm.xlu1 %6411, %v5737_v47   ;;  %v1474_v47 = vld [vmem:[#allocation3 + $0x10] sm:$0xff] }
  0x95   :  { %5821 = vperm.xlu0 %6410, %v5799_v30  }
  0x97   :  { %5772 = vperm.xlu1 %6411, %v5738_v52  }
  0x99   :  { %5826 = vperm.xlu0 %6410, %v5800_v31  }
  0x9b   :  { %5777 = vperm.xlu1 %6411, %v5739_v57  }
  0x9d   :  { %5831 = vperm.xlu0 %6410, %v5801_v32  }
  0x9f   :  { %5836 = vperm.xlu1 %6411, %v5802_v62  }
  0xa1   :  { %5841 = vperm.xlu0 %6410, %v5803_v33  }
  0xa3   :  { %5868 = vperm.xlu1 %6411, %v5865_v4  }
  0xe8   :  { %v6770_v13 = vpop.permute.xlu0 %1444 }
 0x10f   :  { %v6766_v43 = vpop.f32.mrf.mxu1  ;;  %v351_v44 = vpop.f32.mrf.mxu0 }
 0x111   :  { %v211_v45 = vpop.f32.mrf.mxu1  ;;  %v353_v46 = vpop.f32.mrf.mxu0 }
 0x113   :  { %v280_v48 = vpop.f32.mrf.mxu1  ;;  %v493_v49 = vpop.f32.mrf.mxu0 }
 0x115   :  { %v282_v50 = vpop.f32.mrf.mxu1  ;;  %v495_v51 = vpop.f32.mrf.mxu0 }
 0x117   :  { %v422_v53 = vpop.f32.mrf.mxu1  ;;  %v638_v54 = vpop.f32.mrf.mxu0 }
 0x118   :  { %v639_v41 = vadd.f32 %v638_v54, %v6766_v43 }
 0x119   :  { %v424_v55 = vpop.f32.mrf.mxu1  ;;  %v640_v56 = vpop.f32.mrf.mxu0 }
 0x11a   :  { %v641_v10 = vadd.f32 %v640_v56, %v211_v45 }
 0x11b   :  { %v564_v58 = vpop.f32.mrf.mxu1  ;;  %v780_v59 = vpop.f32.mrf.mxu0 }
 0x11c   :  { %v781_v9 = vadd.f32 %v780_v59, %v351_v44  ;;  %v1475_v59 = vld [vmem:[#allocation3 + $0x18] sm:$0xff] }
 0x11d   :  { %v6768_v60 = vpop.f32.mrf.mxu1  ;;  %v782_v61 = vpop.f32.mrf.mxu0 }
 0x11e   :  { %v783_v21 = vadd.f32 %v782_v61, %v353_v46 }
 0x11f   :  { %v709_v63 = vpop.f32.mrf.mxu1  ;;  %v922_v0 = vpop.f32.mrf.mxu0 }
 0x120   :  { %v710_v18 = vadd.f32 %v709_v63, %v280_v48  ;;  %v923_v19 = vadd.f32 %v922_v0, %v493_v49 }
 0x121   :  { %v711_v2 = vpop.f32.mrf.mxu1  ;;  %v924_v3 = vpop.f32.mrf.mxu0 }
 0x122   :  { %v712_v24 = vadd.f32 %v711_v2, %v282_v50  ;;  %v925_v42 = vadd.f32 %v924_v3, %v495_v51 }
 0x123   :  { %v851_v5 = vpop.f32.mrf.mxu1  ;;  %v1069_v6 = vpop.f32.mrf.mxu0 }
 0x124   :  { %v852_v31 = vadd.f32 %v851_v5, %v422_v53  ;;  %v1429_v43 = vadd.f32 %v1069_v6, %v639_v41  ;;  %v1471_v5 = vld [vmem:[#allocation3] sm:$0xff]  ;;  %v1472_v6 = vld [vmem:[#allocation3 + $0x8] sm:$0xff] }
 0x125   :  { %v853_v7 = vpop.f32.mrf.mxu1  ;;  %v1071_v8 = vpop.f32.mrf.mxu0 }
 0x126   :  { %v1430_v15 = vadd.f32 %v1071_v8, %v641_v10  ;;  %v854_v36 = vadd.f32 %v853_v7, %v424_v55  ;;  %v1447_v0 = vadd.f32 %v6770_v13, %v1429_v43 }
 0x127   :  { %v993_v11 = vpop.f32.mrf.mxu1  ;;  %v1211_v12 = vpop.f32.mrf.mxu0 }
 0x128   :  { %v1433_v14 = vadd.f32 %v1211_v12, %v781_v9  ;;  %v1448_v28 = vadd.f32 %v6770_v13, %v1430_v15  ;;  %v994_v48 = vadd.f32 %v993_v11, %v564_v58  ;;  %v1459_v4 = vmax.f32 %v1447_v0, 0.0  ;;  %v2260_v12 = vld [vmem:[#allocation3 + $0x28] sm:$0xff] }
 0x129   :  { %v6772_v16 = vpop.f32.mrf.mxu1  ;;  %v1213_v17 = vpop.f32.mrf.mxu0 }
 0x12a   :  { %v1451_v20 = vadd.f32 %v6770_v13, %v1433_v14  ;;  %v1434_v29 = vadd.f32 %v1213_v17, %v783_v21  ;;  %v1460_v44 = vmax.f32 %v1448_v28, 0.0  ;;  %v996_v8 = vadd.f32 %v6772_v16, %v6768_v60  ;;  %v2259_v60 = vld [vmem:[#allocation3 + $0x20] sm:$0xff] }
 0x12b   :  { %v1140_v22 = vpop.f32.mrf.mxu1  ;;  %v1353_v23 = vpop.f32.mrf.mxu0 }
 0x12c   :  { %v6775_v25 = vmax.f32 %v1451_v20, 0.0  ;;  %v1431_v26 = vadd.f32 %v1140_v22, %v710_v18  ;;  %v1437_v27 = vadd.f32 %v1353_v23, %v923_v19  ;;  %v1452_v45 = vadd.f32 %v6770_v13, %v1434_v29 }
 0x12d   :  { %v1142_v30 = vpop.f32.mrf.mxu1  ;;  %v1355_v39 = vpop.f32.mrf.mxu0 }
 0x12e   :  { %v1449_v32 = vadd.f32 %v6770_v13, %v1431_v26  ;;  %v1432_v33 = vadd.f32 %v1142_v30, %v712_v24  ;;  %1589 = vmatprep.subr.mxu1 %v6775_v25  ;;  %v1455_v34 = vadd.f32 %v6770_v13, %v1437_v27  ;;  %v1438_v55 = vadd.f32 %v1355_v39, %v925_v42 }
 0x12f   :  { %v1282_v35 = vpop.f32.mrf.mxu1  ;;  %v1464_v58 = vmax.f32 %v1452_v45, 0.0 }
 0x130   :  { %v6781_v37 = vmax.f32 %v1449_v32, 0.0  ;;  %v1450_v38 = vadd.f32 %v6770_v13, %v1432_v33  ;;  %v1435_v40 = vadd.f32 %v1282_v35, %v852_v31  ;;  %v6790_v53 = vmax.f32 %v1455_v34, 0.0 }
 0x131   :  { %v1284_v46 = vpop.f32.mrf.mxu1  ;;  %v1456_v63 = vadd.f32 %v6770_v13, %v1438_v55 }
 0x132   :  { %v6786_v49 = vmax.f32 %v1450_v38, 0.0  ;;  %v1453_v50 = vadd.f32 %v6770_v13, %v1435_v40  ;;  %v1436_v52 = vadd.f32 %v1284_v46, %v854_v36  ;;  %1512 = vmatprep.subr.mxu0 %v6781_v37 }
 0x133   :  { %v1424_v56 = vpop.f32.mrf.mxu1  ;;  %1513 = vmatpush1.msra.mxu0 %v1460_v44  ;;  %v1468_v3 = vmax.f32 %v1456_v63, 0.0 }
 0x134   :  { %v6792_v51 = vmax.f32 %v1453_v50, 0.0  ;;  %v1454_v54 = vadd.f32 %v6770_v13, %v1436_v52  ;;  %v1439_v57 = vadd.f32 %v1424_v56, %v994_v48  ;;  %5906 = vmatmul.mubr.msk.f32.vlgmr.msra.gmra.mxu0 %vm139_vm0, %v1474_v47  ;;  %1590 = vmatpush1.msra.mxu1 %v6786_v49 }
 0x135   :  { %5908 = vmatmul.mubr.msk.f32.vlgmr.msra.gmra.mxu1 %vm139_vm0, %v1474_v47  ;;  %1743 = vmatprep.subr.mxu1 %v6790_v53  ;;  %v1426_v7 = vpop.f32.mrf.mxu1 }
 0x136   :  { %v1466_v61 = vmax.f32 %v1454_v54, 0.0  ;;  %v6800_v62 = vadd.f32 %v6770_v13, %v1439_v57  ;;  %1666 = vmatprep.subr.mxu0 %v6792_v51  ;;  %1552 = vmatprep.mubr.f32.mxu0 %v6548_v1  ;;  %v1440_v9 = vadd.f32 %v1426_v7, %v996_v8  ;;  %v6923_v8 = vpop.permute.xlu1 %2676 }
 0x137   :  { %1667 = vmatpush1.msra.mxu0 %v1464_v58  ;;  %1629 = vmatprep.mubr.f32.mxu1 %v6548_v1 }
 0x138   :  { %v1469_v2 = vmax.f32 %v6800_v62, 0.0  ;;  %5907 = vmatmul.mubr.msk.f32.gmra.mxu0 %vm139_vm0, %v1475_v59  ;;  %1744 = vmatpush1.msra.mxu1 %v1466_v61  ;;  %v1458_v10 = vadd.f32 %v6770_v13, %v1440_v9 }
 0x139   :  { %5909 = vmatmul.mubr.msk.f32.gmra.mxu1 %vm139_vm0, %v1475_v59  ;;  %1903 = vmatprep.subr.mxu1 %v1460_v44 }
 0x13a   :  { %1820 = vmatprep.subr.mxu0 %v1469_v2  ;;  %1700 = vmatprep.mubr.f32.mxu0 %v6548_v1  ;;  %v1470_v11 = vmax.f32 %v1458_v10, 0.0 }
 0x13b   :  { %1777 = vmatprep.mubr.f32.mxu1 %v6548_v1 }
 0x13c   :  { %5910 = vmatmul.mubr.msk.f32.vlgmr.msra.gmra.mxu0 %vm139_vm0, %v1474_v47 }
 0x13d   :  { %1821 = vmatpush1.msra.mxu0 %v1468_v3  ;;  %5912 = vmatmul.mubr.msk.f32.vlgmr.msra.gmra.mxu1 %vm139_vm0, %v1474_v47 }
 0x13e   :  { %1904 = vmatpush1.msra.mxu1 %v1459_v4  ;;  %1980 = vmatprep.subr.mxu0 %v6786_v49 }
 0x13f   :  { %2057 = vmatprep.subr.mxu1 %v1464_v58  ;;  %1706 = vmatprep.mubr.f32.mxu0 %v6548_v1 }
 0x140   :  { %5911 = vmatmul.mubr.msk.f32.gmra.mxu0 %vm139_vm0, %v1475_v59  ;;  %1783 = vmatprep.mubr.f32.mxu1 %v6548_v1 }
 0x141   :  { %5913 = vmatmul.mubr.msk.f32.gmra.mxu1 %vm139_vm0, %v1475_v59  ;;  %1854 = vmatprep.mubr.f32.mxu0 %v6548_v1 }
 0x142   :  { %1937 = vmatprep.mubr.f32.mxu1 %v6548_v1 }
 0x144   :  { %5914 = vmatmul.mubr.msk.f32.vlgmr.msra.gmra.mxu0 %vm139_vm0, %v1474_v47 }
 0x145   :  { %1981 = vmatpush1.msra.mxu0 %v6781_v37  ;;  %5916 = vmatmul.mubr.msk.f32.vlgmr.msra.gmra.mxu1 %vm139_vm0, %v1471_v5 }
 0x146   :  { %2058 = vmatpush1.msra.mxu1 %v6775_v25  ;;  %2134 = vmatprep.subr.mxu0 %v1466_v61 }
 0x147   :  { %2211 = vmatprep.subr.mxu1 %v1468_v3  ;;  %1860 = vmatprep.mubr.f32.mxu0 %v6548_v1 }
 0x148   :  { %5915 = vmatmul.mubr.msk.f32.gmra.mxu0 %vm139_vm0, %v1475_v59  ;;  %1943 = vmatprep.mubr.f32.mxu1 %v6548_v1 }
 0x149   :  { %5917 = vmatmul.mubr.msk.f32.gmra.mxu1 %vm139_vm0, %v1472_v6  ;;  %2014 = vmatprep.mubr.f32.mxu0 %v6548_v1 }
 0x14a   :  { %2091 = vmatprep.mubr.f32.mxu1 %v6548_v1 }
 0x14c   :  { %5918 = vmatmul.mubr.msk.f32.vlgmr.msra.gmra.mxu0 %vm139_vm0, %v1471_v5 }
 0x14d   :  { %2135 = vmatpush1.msra.mxu0 %v6792_v51  ;;  %5920 = vmatmul.mubr.msk.f32.vlgmr.msra.gmra.mxu1 %vm139_vm0, %v1471_v5 }
 0x14e   :  { %2212 = vmatpush1.msra.mxu1 %v6790_v53  ;;  %2297 = vmatprep.subr.mxu0 %v6786_v49 }
 0x14f   :  { %2374 = vmatprep.subr.mxu1 %v1464_v58  ;;  %2020 = vmatprep.mubr.f32.mxu0 %v6548_v1 }
 0x150   :  { %5919 = vmatmul.mubr.msk.f32.gmra.mxu0 %vm139_vm0, %v1472_v6  ;;  %2097 = vmatprep.mubr.f32.mxu1 %v6548_v1 }
 0x151   :  { %5921 = vmatmul.mubr.msk.f32.gmra.mxu1 %vm139_vm0, %v1472_v6  ;;  %2168 = vmatprep.mubr.f32.mxu0 %v6548_v1 }
 0x152   :  { %2245 = vmatprep.mubr.f32.mxu1 %v6548_v1 }
 0x154   :  { %5922 = vmatmul.mubr.msk.f32.vlgmr.msra.gmra.mxu0 %vm139_vm0, %v1471_v5 }
 0x155   :  { %2298 = vmatpush1.msra.mxu0 %v6781_v37  ;;  %5924 = vmatmul.mubr.msk.f32.vlgmr.msra.gmra.mxu1 %vm139_vm0, %v1471_v5  ;;  %v6921_v5 = vpop.permute.xlu0 %2681 }
 0x156   :  { %2375 = vmatpush1.msra.mxu1 %v6775_v25  ;;  %2451 = vmatprep.subr.mxu0 %v1466_v61 }
 0x157   :  { %2528 = vmatprep.subr.mxu1 %v1468_v3  ;;  %2174 = vmatprep.mubr.f32.mxu0 %v6548_v1 }
 0x158   :  { %5923 = vmatmul.mubr.msk.f32.gmra.mxu0 %vm139_vm0, %v1472_v6  ;;  %2251 = vmatprep.mubr.f32.mxu1 %v6548_v1 }
 0x159   :  { %5925 = vmatmul.mubr.msk.f32.gmra.mxu1 %vm139_vm0, %v1472_v6  ;;  %2331 = vmatprep.mubr.f32.mxu0 %v6548_v1 }
 0x15a   :  { %2408 = vmatprep.mubr.f32.mxu1 %v6548_v1 }
 0x15c   :  { %5926 = vmatmul.mubr.msk.f32.vlgmr.msra.gmra.mxu0 %vm139_vm0, %v2259_v60 }
 0x15d   :  { %2452 = vmatpush1.msra.mxu0 %v6792_v51  ;;  %5928 = vmatmul.mubr.msk.f32.vlgmr.msra.gmra.mxu1 %vm139_vm0, %v2259_v60 }
 0x15e   :  { %2529 = vmatpush1.msra.mxu1 %v6790_v53  ;;  %2605 = vmatprep.subr.mxu0 %v1470_v11 }
 0x15f   :  { %2337 = vmatprep.mubr.f32.mxu0 %v6548_v1  ;;  %2414 = vmatprep.mubr.f32.mxu1 %v6548_v1 }
 0x160   :  { %5927 = vmatmul.mubr.msk.f32.gmra.mxu0 %vm139_vm0, %v2260_v12 }
 0x161   :  { %5929 = vmatmul.mubr.msk.f32.gmra.mxu1 %vm139_vm0, %v2260_v12  ;;  %2485 = vmatprep.mubr.f32.mxu0 %v6548_v1 }
 0x162   :  { %2562 = vmatprep.mubr.f32.mxu1 %v6548_v1 }
 0x164   :  { %5930 = vmatmul.mubr.msk.f32.vlgmr.msra.gmra.mxu0 %vm139_vm0, %v2259_v60 }
 0x165   :  { %2606 = vmatpush1.msra.mxu0 %v1469_v2  ;;  %5932 = vmatmul.mubr.msk.f32.vlgmr.msra.gmra.mxu1 %vm139_vm0, %v2259_v60 }
 0x166   :  { %2491 = vmatprep.mubr.f32.mxu0 %v6548_v1  ;;  %2568 = vmatprep.mubr.f32.mxu1 %v6548_v1 }
 0x168   :  { %5931 = vmatmul.mubr.msk.f32.gmra.mxu0 %vm139_vm0, %v2260_v12 }
 0x169   :  { %5933 = vmatmul.mubr.msk.f32.gmra.mxu1 %vm139_vm0, %v2260_v12  ;;  %2639 = vmatprep.mubr.f32.mxu0 %v6548_v1 }
 0x16a   :  { %2830 = vmatprep.mubr.f32.mxu1 %v6548_v1 }
 0x16c   :  { %5934 = vmatmul.mubr.msk.f32.vlgmr.msra.gmra.mxu0 %vm139_vm0, %v2259_v60 }
 0x16d   :  { %2645 = vmatprep.mubr.f32.mxu0 %v6548_v1 }
 0x170   :  { %5935 = vmatmul.mubr.msk.f32.gmra.mxu0 %vm139_vm0, %v2260_v12 }
 0x171   :  { %2943 = vmatprep.mubr.f32.mxu0 %v6548_v1 }
 0x1f4   :  { %v6881_v13 = vpop.f32.mrf.mxu0 }
 0x1f5   :  { %v1625_v14 = vpop.f32.mrf.mxu1 }
 0x1f6   :  { %v1550_v15 = vpop.f32.mrf.mxu0 }
 0x1f7   :  { %v6883_v16 = vpop.f32.mrf.mxu1 }
 0x1f8   :  { %v6885_v17 = vpop.f32.mrf.mxu0 }
 0x1f9   :  { %v1631_v18 = vpop.f32.mrf.mxu1 }
 0x1fa   :  { %v1556_v19 = vpop.f32.mrf.mxu0 }
 0x1fb   :  { %v1633_v20 = vpop.f32.mrf.mxu1 }
 0x1fc   :  { %v1702_v21 = vpop.f32.mrf.mxu0 }
 0x1fd   :  { %v6887_v22 = vpop.f32.mrf.mxu1 }
 0x1fe   :  { %v6889_v23 = vpop.f32.mrf.mxu0 }
 0x1ff   :  { %v6891_v24 = vpop.f32.mrf.mxu1 }
 0x200   :  { %v1708_v25 = vpop.f32.mrf.mxu0 }
 0x201   :  { %v6893_v26 = vpop.f32.mrf.mxu1 }
 0x202   :  { %v6895_v27 = vpop.f32.mrf.mxu0 }
 0x203   :  { %v6897_v28 = vpop.f32.mrf.mxu1 }
 0x204   :  { %v1856_v29 = vpop.f32.mrf.mxu0 }
 0x205   :  { %v6899_v30 = vpop.f32.mrf.mxu1 }
 0x206   :  { %v6901_v31 = vpop.f32.mrf.mxu0 }
 0x207   :  { %v1941_v32 = vpop.f32.mrf.mxu1 }
 0x208   :  { %v1862_v33 = vpop.f32.mrf.mxu0  ;;  %v1942_v59 = vadd.f32 %v1941_v32, %v1550_v15 }
 0x209   :  { %v6903_v34 = vpop.f32.mrf.mxu1 }
 0x20a   :  { %v6905_v35 = vpop.f32.mrf.mxu0 }
 0x20b   :  { %v1947_v36 = vpop.f32.mrf.mxu1 }
 0x20c   :  { %v2016_v37 = vpop.f32.mrf.mxu0  ;;  %v1948_v2 = vadd.f32 %v1947_v36, %v1556_v19 }
 0x20d   :  { %v2093_v38 = vpop.f32.mrf.mxu1  ;;  %v2017_v57 = vadd.f32 %v2016_v37, %v1625_v14 }
 0x20e   :  { %v2018_v39 = vpop.f32.mrf.mxu0  ;;  %v2094_v15 = vadd.f32 %v2093_v38, %v1702_v21 }
 0x20f   :  { %v2095_v40 = vpop.f32.mrf.mxu1  ;;  %v2019_v32 = vadd.f32 %v2018_v39, %v6883_v16 }
 0x210   :  { %v2022_v41 = vpop.f32.mrf.mxu0 }
 0x211   :  { %v2099_v42 = vpop.f32.mrf.mxu1  ;;  %v2023_v62 = vadd.f32 %v2022_v41, %v1631_v18 }
 0x212   :  { %v2024_v44 = vpop.f32.mrf.mxu0 }
 0x213   :  { %v2101_v45 = vpop.f32.mrf.mxu1  ;;  %v2025_v60 = vadd.f32 %v2024_v44, %v1633_v20  ;;  %v2100_v20 = vadd.f32 %v2099_v42, %v1708_v25 }
 0x214   :  { %v2170_v46 = vpop.f32.mrf.mxu0 }
 0x215   :  { %v2247_v47 = vpop.f32.mrf.mxu1  ;;  %v2171_v41 = vadd.f32 %v2170_v46, %v6887_v22 }
 0x216   :  { %v6907_v48 = vadd.f32 %v2247_v47, %v1856_v29  ;;  %v6909_v49 = vpop.f32.mrf.mxu0  ;;  %v2096_v47 = vadd.f32 %v2095_v40, %v6889_v23  ;;  %v6950_v23 = vld [vmem:[%s8248_s5 + $0x40] sm:$0xff] }
 0x217   :  { %v6911_v50 = vpop.f32.mrf.mxu1 }
 0x218   :  { %v2176_v52 = vpop.f32.mrf.mxu0 }
 0x219   :  { %v2253_v53 = vpop.f32.mrf.mxu1 }
 0x21a   :  { %v6913_v55 = vadd.f32 %v2253_v53, %v1862_v33  ;;  %v6915_v56 = vpop.f32.mrf.mxu0  ;;  %v2177_v53 = vadd.f32 %v2176_v52, %v6893_v26  ;;  %v1946_v26 = vadd.f32 %v6903_v34, %v6885_v17 }
 0x21b   :  { %v6917_v43 = vpop.f32.mrf.mxu1 }
 0x21c   :  { %v6919_v51 = vpop.f32.mrf.mxu0 }
 0x21d   :  { %v2410_v54 = vpop.f32.mrf.mxu1 }
 0x21e   :  { %v2335_v58 = vpop.f32.mrf.mxu0  ;;  %v2654_v63 = vadd.f32 %v2410_v54, %v2017_v57  ;;  %v2102_v57 = vadd.f32 %v2101_v45, %v6895_v27 }
 0x21f   :  { %v2412_v61 = vpop.f32.mrf.mxu1  ;;  %v2653_v3 = vadd.f32 %v2335_v58, %v1942_v59 }
 0x220   :  { %v2339_v0 = vpop.f32.mrf.mxu0  ;;  %v2686_v11 = vadd.f32 %v6923_v8, %v2654_v63  ;;  %v2655_v16 = vadd.f32 %v2412_v61, %v2019_v32  ;;  %v5940_v32 = vld [vmem:[%s8248_s5 + $0x60] sm:$0xff] }
 0x221   :  { %v2416_v4 = vpop.f32.mrf.mxu1  ;;  %v6928_v18 = vadd.f32 %v6923_v8, %v2653_v3 }
 0x222   :  { %v2664_v6 = vadd.f32 %v2416_v4, %v2023_v62  ;;  %v2341_v7 = vpop.f32.mrf.mxu0  ;;  %v6942_v54 = vmax.f32 %v2686_v11, 0.0  ;;  %v1940_v62 = vadd.f32 %v6899_v30, %v6881_v13  ;;  %v2687_v63 = vadd.f32 %v6923_v8, %v2655_v16  ;;  %v6972_v13 = vld [vmem:[%s8248_s5 + $0x48] sm:$0xff] }
 0x223   :  { %v2663_v9 = vadd.f32 %v2341_v7, %v1948_v2  ;;  %v2418_v10 = vpop.f32.mrf.mxu1  ;;  %v2705_v25 = vmax.f32 %v6928_v18, 0.0  ;;  %v2662_v2 = vadd.f32 %v2339_v0, %v1946_v26 }
 0x224   :  { %v2696_v12 = vadd.f32 %v6921_v5, %v2664_v6  ;;  %v2487_v14 = vpop.f32.mrf.mxu0  ;;  %v2665_v36 = vadd.f32 %v2418_v10, %v2025_v60  ;;  %v2652_v30 = vadd.f32 %v6919_v51, %v1940_v62  ;;  %v6985_v60 = vmax.f32 %v2687_v63, 0.0  ;;  %v5998_v62 = vld [vmem:[%s8248_s5 + $0xb0] sm:$0xff]  ;;  %v5999_v63 = vld [vmem:[%s8248_s5 + $0xb8] sm:$0xff] }
 0x225   :  { %v6931_v19 = vadd.f32 %v6921_v5, %v2663_v9  ;;  %v2564_v29 = vpop.f32.mrf.mxu1  ;;  %v2656_v21 = vadd.f32 %v2487_v14, %v2094_v15  ;;  %v2694_v11 = vadd.f32 %v6921_v5, %v2662_v2  ;;  %v5938_v15 = vld [vmem:[%s8248_s5 + $0x50] sm:$0xff] }
 0x226   :  { %v6934_v33 = vmax.f32 %v2696_v12, 0.0  ;;  %v2489_v37 = vpop.f32.mrf.mxu0  ;;  %v2658_v22 = vadd.f32 %v2564_v29, %v2171_v41  ;;  %v2697_v40 = vadd.f32 %v6921_v5, %v2665_v36  ;;  %v2684_v12 = vadd.f32 %v6923_v8, %v2652_v30  ;;  %v5939_v29 = vld [vmem:[%s8248_s5 + $0x58] sm:$0xff]  ;;  %v5941_v36 = vld [vmem:[%s8248_s5 + $0x68] sm:$0xff]  ;;  %v2724_v41 = vld [vmem:[%s8248_s5] sm:$0xff] }
 0x227   :  { %v2715_v44 = vmax.f32 %v6931_v19, 0.0  ;;  %v6938_v38 = vpop.f32.mrf.mxu1  ;;  %v2657_v52 = vadd.f32 %v2489_v37, %v2096_v47  ;;  %v2688_v27 = vadd.f32 %v6923_v8, %v2656_v21  ;;  %v2714_v18 = vmax.f32 %v2694_v11, 0.0  ;;  %v5942_v37 = vld [vmem:[%s8248_s5 + $0x70] sm:$0xff]  ;;  %v2727_v47 = vld [vmem:[%s8248_s5 + $0x18] sm:$0xff] }
 0x228   :  { %v2493_v39 = vpop.f32.mrf.mxu0  ;;  %2794 = vmatprep.subr.mxu1 %v6934_v33  ;;  %v2690_v34 = vadd.f32 %v6923_v8, %v2658_v22  ;;  %v6975_v0 = vmax.f32 %v2697_v40, 0.0  ;;  %v2704_v19 = vmax.f32 %v2684_v12, 0.0  ;;  %v2726_v21 = vld [vmem:[%s8248_s5 + $0x10] sm:$0xff]  ;;  %v2731_v22 = vld [vmem:[%s8248_s5 + $0x38] sm:$0xff] }
 0x229   :  { %v2666_v42 = vadd.f32 %v2493_v39, %v2100_v20  ;;  %v2570_v46 = vpop.f32.mrf.mxu1  ;;  %2795 = vmatpush1.msra.mxu1 %v2715_v44  ;;  %v2689_v6 = vadd.f32 %v6923_v8, %v2657_v52  ;;  %v6980_v9 = vmax.f32 %v2688_v27, 0.0  ;;  %v5943_v20 = vld [vmem:[%s8248_s5 + $0x78] sm:$0xff]  ;;  %v2179_v39 = vadd.f32 %v6915_v56, %v6897_v28  ;;  %v2730_v28 = vld [vmem:[%s8248_s5 + $0x30] sm:$0xff]  ;;  %v5993_v52 = vld [vmem:[%s8248_s5 + $0x88] sm:$0xff] }
 0x22a   :  { %v2668_v58 = vadd.f32 %v2570_v46, %v2177_v53  ;;  %v2495_v59 = vpop.f32.mrf.mxu0  ;;  %2796 = vmatprep.subr.mxu1 %v6942_v54  ;;  %v6991_v51 = vmax.f32 %v2690_v34, 0.0  ;;  %v2728_v53 = vld [vmem:[%s8248_s5 + $0x20] sm:$0xff]  ;;  %v5995_v27 = vld [vmem:[%s8248_s5 + $0x98] sm:$0xff] }
 0x22b   :  { %v2698_v45 = vadd.f32 %v6921_v5, %v2666_v42  ;;  %v2667_v61 = vadd.f32 %v2495_v59, %v2102_v57  ;;  %2797 = vmatpush1.msra.mxu1 %v2705_v25  ;;  %v6996_v14 = vmax.f32 %v2689_v6, 0.0  ;;  %v2572_v16 = vpop.f32.mrf.mxu1  ;;  %v2729_v57 = vld [vmem:[%s8248_s5 + $0x28] sm:$0xff]  ;;  %v6027_v30 = vld [vmem:[%s8248_s5 + $0xd8] sm:$0xff] }
 0x22c   :  { %v2700_v17 = vadd.f32 %v6921_v5, %v2668_v58  ;;  %5944 = vmatmul.mubr.msk.f32.vlgmr.msra.gmra.mxu1 %vm2741_vm1, %v6950_v23  ;;  %v5994_v58 = vld [vmem:[%s8248_s5 + $0x90] sm:$0xff]  ;;  %v6031_v12 = vld [vmem:[%s8248_s5 + $0xf8] sm:$0xff] }
 0x22d   :  { %v6965_v3 = vmax.f32 %v2698_v45, 0.0  ;;  %v2699_v4 = vadd.f32 %v6921_v5, %v2667_v61  ;;  %2836 = vmatprep.mubr.f32.mxu1 %v6548_v1  ;;  %v5996_v45 = vld [vmem:[%s8248_s5 + $0xa0] sm:$0xff]  ;;  %v5997_v61 = vld [vmem:[%s8248_s5 + $0xa8] sm:$0xff] }
 0x22e   :  { %v6978_v7 = vmax.f32 %v2700_v17, 0.0 }
 0x22f   :  { %v6982_v10 = vmax.f32 %v2699_v4, 0.0  ;;  %2907 = vmatprep.subr.mxu0 %v6965_v3  ;;  %v6025_v4 = vld [vmem:[%s8248_s5 + $0xc8] sm:$0xff] }
 0x230   :  { %5945 = vmatmul.mubr.msk.f32.gmra.mxu1 %vm2741_vm1, %v6972_v13  ;;  %2908 = vmatpush1.msra.mxu0 %v6975_v0 }
 0x231   :  { %3020 = vmatprep.subr.mxu1 %v6978_v7  ;;  %2909 = vmatprep.subr.mxu0 %v6980_v9 }
 0x232   :  { %3021 = vmatpush1.msra.mxu1 %v6982_v10  ;;  %2910 = vmatpush1.msra.mxu0 %v6985_v60 }
 0x233   :  { %3022 = vmatprep.subr.mxu1 %v6991_v51  ;;  %2842 = vmatprep.mubr.f32.mxu1 %v6548_v1 }
 0x234   :  { %5952 = vmatmul.mubr.msk.f32.vlgmr.msra.gmra.mxu0 %vm2741_vm1, %v6950_v23  ;;  %3023 = vmatpush1.msra.mxu1 %v6996_v14 }
 0x235   :  { %3157 = vmatprep.subr.mxu0 %v2715_v44  ;;  %5946 = vmatmul.mubr.msk.f32.gmra.mxu1 %vm2741_vm1, %v5938_v15  ;;  %v2725_v44 = vld [vmem:[%s8248_s5 + $0x8] sm:$0xff] }
 0x236   :  { %3158 = vmatpush1.msra.mxu0 %v2714_v18  ;;  %3270 = vmatprep.subr.mxu1 %v6975_v0 }
 0x237   :  { %3159 = vmatprep.subr.mxu0 %v2705_v25  ;;  %2949 = vmatprep.mubr.f32.mxu0 %v6548_v1  ;;  %v2669_v25 = vadd.f32 %v2572_v16, %v2179_v39 }
 0x238   :  { %3160 = vmatpush1.msra.mxu0 %v2704_v19  ;;  %2848 = vmatprep.mubr.f32.mxu1 %v6548_v1  ;;  %v7391_v19 = vld [vmem:[%s8248_s5 + $0x110] sm:$0xff] }
 0x239   :  { %5953 = vmatmul.mubr.msk.f32.gmra.mxu0 %vm2741_vm1, %v6972_v13  ;;  %3383 = vmatprep.subr.mxu0 %v6982_v10  ;;  %v2701_v56 = vadd.f32 %v6921_v5, %v2669_v25  ;;  %v7446_v25 = vld [vmem:[%s8248_s5 + $0x128] sm:$0xff] }
 0x23a   :  { %5947 = vmatmul.mubr.msk.f32.gmra.mxu1 %vm2741_vm1, %v5939_v29  ;;  %2955 = vmatprep.mubr.f32.mxu0 %v6548_v1 }
 0x23b   :  { %2854 = vmatprep.mubr.f32.mxu1 %v6548_v1  ;;  %v7124_v42 = vmax.f32 %v2701_v56, 0.0 }
 0x23d   :  { %5954 = vmatmul.mubr.msk.f32.gmra.mxu0 %vm2741_vm1, %v5938_v15 }
 0x23e   :  { %5948 = vmatmul.mubr.msk.f32.gmra.mxu1 %vm2741_vm1, %v5940_v32  ;;  %2961 = vmatprep.mubr.f32.mxu0 %v6548_v1 }
 0x23f   :  { %2860 = vmatprep.mubr.f32.mxu1 %v6548_v1 }
 0x241   :  { %5955 = vmatmul.mubr.msk.f32.gmra.mxu0 %vm2741_vm1, %v5939_v29 }
 0x242   :  { %5949 = vmatmul.mubr.msk.f32.gmra.mxu1 %vm2741_vm1, %v5941_v36  ;;  %2967 = vmatprep.mubr.f32.mxu0 %v6548_v1 }
 0x243   :  { %2866 = vmatprep.mubr.f32.mxu1 %v6548_v1 }
 0x245   :  { %5956 = vmatmul.mubr.msk.f32.gmra.mxu0 %vm2741_vm1, %v5940_v32 }
 0x246   :  { %5950 = vmatmul.mubr.msk.f32.gmra.mxu1 %vm2741_vm1, %v5942_v37  ;;  %2973 = vmatprep.mubr.f32.mxu0 %v6548_v1 }
 0x247   :  { %2872 = vmatprep.mubr.f32.mxu1 %v6548_v1 }
 0x249   :  { %5957 = vmatmul.mubr.msk.f32.gmra.mxu0 %vm2741_vm1, %v5941_v36 }
 0x24a   :  { %5951 = vmatmul.mubr.msk.f32.gmra.mxu1 %vm2741_vm1, %v5943_v20  ;;  %2979 = vmatprep.mubr.f32.mxu0 %v6548_v1 }
 0x24b   :  { %3056 = vmatprep.mubr.f32.mxu1 %v6548_v1 }
 0x24d   :  { %5958 = vmatmul.mubr.msk.f32.gmra.mxu0 %vm2741_vm1, %v5942_v37 }
 0x24e   :  { %5960 = vmatmul.mubr.msk.f32.vlgmr.msra.gmra.mxu1 %vm2741_vm1, %v6950_v23  ;;  %2985 = vmatprep.mubr.f32.mxu0 %v6548_v1 }
 0x24f   :  { %3271 = vmatpush1.msra.mxu1 %v6934_v33  ;;  %3062 = vmatprep.mubr.f32.mxu1 %v6548_v1 }
 0x250   :  { %3272 = vmatprep.subr.mxu1 %v6985_v60 }
 0x251   :  { %3273 = vmatpush1.msra.mxu1 %v6942_v54  ;;  %5959 = vmatmul.mubr.msk.f32.gmra.mxu0 %vm2741_vm1, %v5943_v20 }
 0x252   :  { %3529 = vmatprep.subr.mxu1 %v6975_v0  ;;  %5961 = vmatmul.mubr.msk.f32.gmra.mxu1 %vm2741_vm1, %v6972_v13  ;;  %v6026_v13 = vld [vmem:[%s8248_s5 + $0xd0] sm:$0xff] }
 0x253   :  { %3193 = vmatprep.mubr.f32.mxu0 %v6548_v1  ;;  %3068 = vmatprep.mubr.f32.mxu1 %v6548_v1 }
 0x255   :  { %5968 = vmatmul.mubr.msk.f32.vlgmr.msra.gmra.mxu0 %vm2741_vm1, %v2724_v41 }
 0x256   :  { %3384 = vmatpush1.msra.mxu0 %v6965_v3  ;;  %5962 = vmatmul.mubr.msk.f32.gmra.mxu1 %vm2741_vm1, %v5938_v15 }
 0x257   :  { %3385 = vmatprep.subr.mxu0 %v6996_v14  ;;  %3199 = vmatprep.mubr.f32.mxu0 %v6548_v1 }
 0x258   :  { %3386 = vmatpush1.msra.mxu0 %v6980_v9  ;;  %3074 = vmatprep.mubr.f32.mxu1 %v6548_v1 }
 0x259   :  { %3642 = vmatprep.subr.mxu0 %v6982_v10  ;;  %5969 = vmatmul.mubr.msk.f32.gmra.mxu0 %vm2741_vm1, %v2725_v44 }
 0x25a   :  { %5963 = vmatmul.mubr.msk.f32.gmra.mxu1 %vm2741_vm1, %v5939_v29  ;;  %3205 = vmatprep.mubr.f32.mxu0 %v6548_v1 }
 0x25b   :  { %3080 = vmatprep.mubr.f32.mxu1 %v6548_v1 }
 0x25d   :  { %5970 = vmatmul.mubr.msk.f32.gmra.mxu0 %vm2741_vm1, %v2726_v21 }
 0x25e   :  { %5964 = vmatmul.mubr.msk.f32.gmra.mxu1 %vm2741_vm1, %v5940_v32  ;;  %3211 = vmatprep.mubr.f32.mxu0 %v6548_v1 }
 0x25f   :  { %3086 = vmatprep.mubr.f32.mxu1 %v6548_v1 }
 0x261   :  { %5971 = vmatmul.mubr.msk.f32.gmra.mxu0 %vm2741_vm1, %v2727_v47 }
 0x262   :  { %5965 = vmatmul.mubr.msk.f32.gmra.mxu1 %vm2741_vm1, %v5941_v36  ;;  %3217 = vmatprep.mubr.f32.mxu0 %v6548_v1 }
 0x263   :  { %3092 = vmatprep.mubr.f32.mxu1 %v6548_v1 }
 0x265   :  { %5972 = vmatmul.mubr.msk.f32.gmra.mxu0 %vm2741_vm1, %v2728_v53 }
 0x266   :  { %5966 = vmatmul.mubr.msk.f32.gmra.mxu1 %vm2741_vm1, %v5942_v37  ;;  %3223 = vmatprep.mubr.f32.mxu0 %v6548_v1 }
 0x267   :  { %3098 = vmatprep.mubr.f32.mxu1 %v6548_v1 }
 0x269   :  { %5973 = vmatmul.mubr.msk.f32.gmra.mxu0 %vm2741_vm1, %v2729_v57 }
 0x26a   :  { %5967 = vmatmul.mubr.msk.f32.gmra.mxu1 %vm2741_vm1, %v5943_v20  ;;  %3229 = vmatprep.mubr.f32.mxu0 %v6548_v1  ;;  %v7410_v20 = vld [vmem:[%s8248_s5 + $0x118] sm:$0xff] }
 0x26b   :  { %3306 = vmatprep.mubr.f32.mxu1 %v6548_v1 }
 0x26d   :  { %5974 = vmatmul.mubr.msk.f32.gmra.mxu0 %vm2741_vm1, %v2730_v28 }
 0x26e   :  { %5976 = vmatmul.mubr.msk.f32.vlgmr.msra.gmra.mxu1 %vm2741_vm1, %v2724_v41  ;;  %3235 = vmatprep.mubr.f32.mxu0 %v6548_v1 }
 0x26f   :  { %3530 = vmatpush1.msra.mxu1 %v6934_v33  ;;  %3312 = vmatprep.mubr.f32.mxu1 %v6548_v1  ;;  %v2173_v33 = vadd.f32 %v6909_v49, %v6891_v24  ;;  %v5992_v24 = vld [vmem:[%s8248_s5 + $0x80] sm:$0xff] }
 0x270   :  { %3531 = vmatprep.subr.mxu1 %v6985_v60 }
 0x271   :  { %3532 = vmatpush1.msra.mxu1 %v6942_v54  ;;  %5975 = vmatmul.mubr.msk.f32.gmra.mxu0 %vm2741_vm1, %v2731_v22  ;;  %v7154_v54 = vpop.f32.mrf.mxu0  ;;  %v2659_v46 = vadd.f32 %v6938_v38, %v2173_v33  ;;  %v7465_v33 = vld [vmem:[%s8248_s5 + $0x130] sm:$0xff] }
 0x272   :  { %3755 = vmatprep.subr.mxu1 %v7124_v42  ;;  %5977 = vmatmul.mubr.msk.f32.gmra.mxu1 %vm2741_vm1, %v2725_v44  ;;  %v2660_v2 = vadd.f32 %v7154_v54, %v6907_v48  ;;  %v6024_v48 = vld [vmem:[%s8248_s5 + $0xc0] sm:$0xff] }
 0x273   :  { %3419 = vmatprep.mubr.f32.mxu0 %v6548_v1  ;;  %3318 = vmatprep.mubr.f32.mxu1 %v6548_v1  ;;  %v7161_v23 = vpop.f32.mrf.mxu0  ;;  %v2691_v26 = vadd.f32 %v6923_v8, %v2659_v46 }
 0x274   :  { %v7249_v17 = vadd.f32 %v6923_v8, %v2660_v2 }
 0x275   :  { %5984 = vmatmul.mubr.msk.f32.vlgmr.msra.gmra.mxu0 %vm2741_vm1, %v2724_v41  ;;  %v2647_v49 = vpop.f32.mrf.mxu0  ;;  %v7173_v38 = vmax.f32 %v2691_v26, 0.0 }
 0x276   :  { %3643 = vmatpush1.msra.mxu0 %v6965_v3  ;;  %5978 = vmatmul.mubr.msk.f32.gmra.mxu1 %vm2741_vm1, %v2726_v21  ;;  %v2670_v40 = vadd.f32 %v2647_v49, %v6913_v55  ;;  %v2712_v34 = vmax.f32 %v7249_v17, 0.0 }
 0x277   :  { %3644 = vmatprep.subr.mxu0 %v6996_v14  ;;  %3425 = vmatprep.mubr.f32.mxu0 %v6548_v1  ;;  %v2649_v6 = vpop.f32.mrf.mxu0 }
 0x278   :  { %3645 = vmatpush1.msra.mxu0 %v6980_v9  ;;  %3324 = vmatprep.mubr.f32.mxu1 %v6548_v1  ;;  %v7188_v55 = vadd.f32 %v6921_v5, %v2670_v40 }
 0x279   :  { %3949 = vmatprep.subr.mxu0 %v6965_v3  ;;  %5985 = vmatmul.mubr.msk.f32.gmra.mxu0 %vm2741_vm1, %v2725_v44 }
 0x27a   :  { %5979 = vmatmul.mubr.msk.f32.gmra.mxu1 %vm2741_vm1, %v2727_v47  ;;  %3431 = vmatprep.mubr.f32.mxu0 %v6548_v1  ;;  %v2722_v59 = vmax.f32 %v7188_v55, 0.0 }
 0x27b   :  { %3330 = vmatprep.mubr.f32.mxu1 %v6548_v1 }
 0x27d   :  { %5986 = vmatmul.mubr.msk.f32.gmra.mxu0 %vm2741_vm1, %v2726_v21 }
 0x27e   :  { %5980 = vmatmul.mubr.msk.f32.gmra.mxu1 %vm2741_vm1, %v2728_v53  ;;  %3437 = vmatprep.mubr.f32.mxu0 %v6548_v1 }
 0x27f   :  { %3336 = vmatprep.mubr.f32.mxu1 %v6548_v1 }
 0x281   :  { %5987 = vmatmul.mubr.msk.f32.gmra.mxu0 %vm2741_vm1, %v2727_v47  ;;  %v7427_v47 = vld [vmem:[%s8248_s5 + $0x120] sm:$0xff] }
 0x282   :  { %5981 = vmatmul.mubr.msk.f32.gmra.mxu1 %vm2741_vm1, %v2729_v57  ;;  %3443 = vmatprep.mubr.f32.mxu0 %v6548_v1 }
 0x283   :  { %3342 = vmatprep.mubr.f32.mxu1 %v6548_v1 }
 0x285   :  { %5988 = vmatmul.mubr.msk.f32.gmra.mxu0 %vm2741_vm1, %v2728_v53 }
 0x286   :  { %5982 = vmatmul.mubr.msk.f32.gmra.mxu1 %vm2741_vm1, %v2730_v28  ;;  %3449 = vmatprep.mubr.f32.mxu0 %v6548_v1 }
 0x287   :  { %3348 = vmatprep.mubr.f32.mxu1 %v6548_v1 }
 0x289   :  { %5989 = vmatmul.mubr.msk.f32.gmra.mxu0 %vm2741_vm1, %v2729_v57 }
 0x28a   :  { %5983 = vmatmul.mubr.msk.f32.gmra.mxu1 %vm2741_vm1, %v2731_v22  ;;  %3455 = vmatprep.mubr.f32.mxu0 %v6548_v1 }
 0x28b   :  { %3565 = vmatprep.mubr.f32.mxu1 %v6548_v1 }
 0x28d   :  { %5990 = vmatmul.mubr.msk.f32.gmra.mxu0 %vm2741_vm1, %v2730_v28 }
 0x28e   :  { %6000 = vmatmul.mubr.msk.f32.vlgmr.msra.gmra.mxu1 %vm2741_vm1, %v5992_v24  ;;  %3461 = vmatprep.mubr.f32.mxu0 %v6548_v1 }
 0x28f   :  { %3756 = vmatpush1.msra.mxu1 %v6978_v7  ;;  %3571 = vmatprep.mubr.f32.mxu1 %v6548_v1 }
 0x290   :  { %3757 = vmatprep.subr.mxu1 %v7173_v38 }
 0x291   :  { %3758 = vmatpush1.msra.mxu1 %v6991_v51  ;;  %5991 = vmatmul.mubr.msk.f32.gmra.mxu0 %vm2741_vm1, %v2731_v22 }
 0x292   :  { %4062 = vmatprep.subr.mxu1 %v6978_v7  ;;  %6001 = vmatmul.mubr.msk.f32.gmra.mxu1 %vm2741_vm1, %v5993_v52 }
 0x293   :  { %3678 = vmatprep.mubr.f32.mxu0 %v6548_v1  ;;  %3577 = vmatprep.mubr.f32.mxu1 %v6548_v1 }
 0x295   :  { %6008 = vmatmul.mubr.msk.f32.vlgmr.msra.gmra.mxu0 %vm2741_vm1, %v5992_v24 }
 0x296   :  { %3950 = vmatpush1.msra.mxu0 %v6975_v0  ;;  %6002 = vmatmul.mubr.msk.f32.gmra.mxu1 %vm2741_vm1, %v5994_v58  ;;  %v6028_v0 = vld [vmem:[%s8248_s5 + $0xe0] sm:$0xff] }
 0x297   :  { %3951 = vmatprep.subr.mxu0 %v6980_v9  ;;  %3684 = vmatprep.mubr.f32.mxu0 %v6548_v1 }
 0x298   :  { %3952 = vmatpush1.msra.mxu0 %v6985_v60  ;;  %3583 = vmatprep.mubr.f32.mxu1 %v6548_v1  ;;  %v6029_v60 = vld [vmem:[%s8248_s5 + $0xe8] sm:$0xff] }
 0x299   :  { %4175 = vmatprep.subr.mxu0 %v2722_v59  ;;  %6009 = vmatmul.mubr.msk.f32.gmra.mxu0 %vm2741_vm1, %v5993_v52 }
 0x29a   :  { %6003 = vmatmul.mubr.msk.f32.gmra.mxu1 %vm2741_vm1, %v5995_v27  ;;  %3690 = vmatprep.mubr.f32.mxu0 %v6548_v1 }
 0x29b   :  { %3589 = vmatprep.mubr.f32.mxu1 %v6548_v1 }
 0x29d   :  { %6010 = vmatmul.mubr.msk.f32.gmra.mxu0 %vm2741_vm1, %v5994_v58 }
 0x29e   :  { %6004 = vmatmul.mubr.msk.f32.gmra.mxu1 %vm2741_vm1, %v5996_v45  ;;  %3696 = vmatprep.mubr.f32.mxu0 %v6548_v1 }
 0x29f   :  { %3595 = vmatprep.mubr.f32.mxu1 %v6548_v1 }
 0x2a1   :  { %6011 = vmatmul.mubr.msk.f32.gmra.mxu0 %vm2741_vm1, %v5995_v27 }
 0x2a2   :  { %6005 = vmatmul.mubr.msk.f32.gmra.mxu1 %vm2741_vm1, %v5997_v61  ;;  %3702 = vmatprep.mubr.f32.mxu0 %v6548_v1 }
 0x2a3   :  { %3601 = vmatprep.mubr.f32.mxu1 %v6548_v1 }
 0x2a5   :  { %6012 = vmatmul.mubr.msk.f32.gmra.mxu0 %vm2741_vm1, %v5996_v45 }
 0x2a6   :  { %6006 = vmatmul.mubr.msk.f32.gmra.mxu1 %vm2741_vm1, %v5998_v62  ;;  %3708 = vmatprep.mubr.f32.mxu0 %v6548_v1 }
 0x2a7   :  { %3607 = vmatprep.mubr.f32.mxu1 %v6548_v1 }
 0x2a9   :  { %6013 = vmatmul.mubr.msk.f32.gmra.mxu0 %vm2741_vm1, %v5997_v61 }
 0x2aa   :  { %6007 = vmatmul.mubr.msk.f32.gmra.mxu1 %vm2741_vm1, %v5999_v63  ;;  %3714 = vmatprep.mubr.f32.mxu0 %v6548_v1 }
 0x2ab   :  { %3791 = vmatprep.mubr.f32.mxu1 %v6548_v1 }
 0x2ad   :  { %6014 = vmatmul.mubr.msk.f32.gmra.mxu0 %vm2741_vm1, %v5998_v62 }
 0x2ae   :  { %6016 = vmatmul.mubr.msk.f32.vlgmr.msra.gmra.mxu1 %vm2741_vm1, %v5992_v24  ;;  %3720 = vmatprep.mubr.f32.mxu0 %v6548_v1  ;;  %v7484_v24 = vld [vmem:[%s8248_s5 + $0x138] sm:$0xff] }
 0x2af   :  { %4063 = vmatpush1.msra.mxu1 %v6982_v10  ;;  %3797 = vmatprep.mubr.f32.mxu1 %v6548_v1 }
 0x2b0   :  { %4064 = vmatprep.subr.mxu1 %v6991_v51 }
 0x2b1   :  { %4065 = vmatpush1.msra.mxu1 %v6996_v14  ;;  %6015 = vmatmul.mubr.msk.f32.gmra.mxu0 %vm2741_vm1, %v5999_v63 }
 0x2b2   :  { %4369 = vmatprep.subr.mxu1 %v6982_v10  ;;  %6017 = vmatmul.mubr.msk.f32.gmra.mxu1 %vm2741_vm1, %v5993_v52  ;;  %v2256_v10 = vadd.f32 %v6917_v43, %v6905_v35  ;;  %v6030_v35 = vld [vmem:[%s8248_s5 + $0xf0] sm:$0xff] }
 0x2b3   :  { %3985 = vmatprep.mubr.f32.mxu0 %v6548_v1  ;;  %3803 = vmatprep.mubr.f32.mxu1 %v6548_v1 }
 0x2b4   :  { %v2671_v11 = vadd.f32 %v2649_v6, %v2256_v10 }
 0x2b5   :  { %6032 = vmatmul.mubr.msk.f32.vlgmr.msra.gmra.mxu0 %vm2741_vm1, %v6024_v48 }
 0x2b6   :  { %4176 = vmatpush1.msra.mxu0 %v7124_v42  ;;  %6018 = vmatmul.mubr.msk.f32.gmra.mxu1 %vm2741_vm1, %v5994_v58  ;;  %v2703_v43 = vadd.f32 %v6921_v5, %v2671_v11  ;;  %v2250_v5 = vadd.f32 %v6911_v50, %v6901_v31  ;;  %v7359_v31 = vld [vmem:[%s8248_s5 + $0x100] sm:$0xff] }
 0x2b7   :  { %4177 = vmatprep.subr.mxu0 %v2712_v34  ;;  %3991 = vmatprep.mubr.f32.mxu0 %v6548_v1 }
 0x2b8   :  { %4178 = vmatpush1.msra.mxu0 %v7173_v38  ;;  %3809 = vmatprep.mubr.f32.mxu1 %v6548_v1  ;;  %v2723_v15 = vmax.f32 %v2703_v43, 0.0 }
 0x2b9   :  { %4482 = vmatprep.subr.mxu0 %v7124_v42  ;;  %6033 = vmatmul.mubr.msk.f32.gmra.mxu0 %vm2741_vm1, %v6025_v4 }
 0x2ba   :  { %6019 = vmatmul.mubr.msk.f32.gmra.mxu1 %vm2741_vm1, %v5995_v27  ;;  %3997 = vmatprep.mubr.f32.mxu0 %v6548_v1 }
 0x2bb   :  { %3815 = vmatprep.mubr.f32.mxu1 %v6548_v1 }
 0x2bd   :  { %6034 = vmatmul.mubr.msk.f32.gmra.mxu0 %vm2741_vm1, %v6026_v13 }
 0x2be   :  { %6020 = vmatmul.mubr.msk.f32.gmra.mxu1 %vm2741_vm1, %v5996_v45  ;;  %4003 = vmatprep.mubr.f32.mxu0 %v6548_v1 }
 0x2bf   :  { %3821 = vmatprep.mubr.f32.mxu1 %v6548_v1 }
 0x2c1   :  { %6035 = vmatmul.mubr.msk.f32.gmra.mxu0 %vm2741_vm1, %v6027_v30 }
 0x2c2   :  { %6021 = vmatmul.mubr.msk.f32.gmra.mxu1 %vm2741_vm1, %v5997_v61  ;;  %4009 = vmatprep.mubr.f32.mxu0 %v6548_v1 }
 0x2c3   :  { %3827 = vmatprep.mubr.f32.mxu1 %v6548_v1 }
 0x2c5   :  { %6036 = vmatmul.mubr.msk.f32.gmra.mxu0 %vm2741_vm1, %v6028_v0 }
 0x2c6   :  { %6022 = vmatmul.mubr.msk.f32.gmra.mxu1 %vm2741_vm1, %v5998_v62  ;;  %4015 = vmatprep.mubr.f32.mxu0 %v6548_v1 }
 0x2c7   :  { %3833 = vmatprep.mubr.f32.mxu1 %v6548_v1 }
 0x2c9   :  { %6037 = vmatmul.mubr.msk.f32.gmra.mxu0 %vm2741_vm1, %v6029_v60 }
 0x2ca   :  { %6023 = vmatmul.mubr.msk.f32.gmra.mxu1 %vm2741_vm1, %v5999_v63  ;;  %4021 = vmatprep.mubr.f32.mxu0 %v6548_v1 }
 0x2cb   :  { %4098 = vmatprep.mubr.f32.mxu1 %v6548_v1 }
 0x2cd   :  { %6038 = vmatmul.mubr.msk.f32.gmra.mxu0 %vm2741_vm1, %v6030_v35 }
 0x2ce   :  { %6040 = vmatmul.mubr.msk.f32.vlgmr.msra.gmra.mxu1 %vm2741_vm1, %v6024_v48  ;;  %4027 = vmatprep.mubr.f32.mxu0 %v6548_v1 }
 0x2cf   :  { %4370 = vmatpush1.msra.mxu1 %v6965_v3  ;;  %4104 = vmatprep.mubr.f32.mxu1 %v6548_v1  ;;  %v2661_v3 = vadd.f32 %v7161_v23, %v2250_v5 }
 0x2d0   :  { %4371 = vmatprep.subr.mxu1 %v6996_v14 }
 0x2d1   :  { %4372 = vmatpush1.msra.mxu1 %v6980_v9  ;;  %6039 = vmatmul.mubr.msk.f32.gmra.mxu0 %vm2741_vm1, %v6031_v12 }
 0x2d2   :  { %4595 = vmatprep.subr.mxu1 %v2723_v15  ;;  %6041 = vmatmul.mubr.msk.f32.gmra.mxu1 %vm2741_vm1, %v6025_v4 }
 0x2d3   :  { %4211 = vmatprep.mubr.f32.mxu0 %v6548_v1  ;;  %4110 = vmatprep.mubr.f32.mxu1 %v6548_v1 }
 0x2d5   :  { %6048 = vmatmul.mubr.msk.f32.vlgmr.msra.gmra.mxu0 %vm2741_vm1, %v6024_v48 }
 0x2d6   :  { %4483 = vmatpush1.msra.mxu0 %v6978_v7  ;;  %6042 = vmatmul.mubr.msk.f32.gmra.mxu1 %vm2741_vm1, %v6026_v13  ;;  %v2693_v7 = vadd.f32 %v6923_v8, %v2661_v3 }
 0x2d7   :  { %4484 = vmatprep.subr.mxu0 %v7173_v38  ;;  %4217 = vmatprep.mubr.f32.mxu0 %v6548_v1 }
 0x2d8   :  { %4485 = vmatpush1.msra.mxu0 %v6991_v51  ;;  %4116 = vmatprep.mubr.f32.mxu1 %v6548_v1  ;;  %v2713_v9 = vmax.f32 %v2693_v7, 0.0  ;;  %v7375_v51 = vld [vmem:[%s8248_s5 + $0x108] sm:$0xff] }
 0x2d9   :  { %6049 = vmatmul.mubr.msk.f32.gmra.mxu0 %vm2741_vm1, %v6025_v4 }
 0x2da   :  { %6043 = vmatmul.mubr.msk.f32.gmra.mxu1 %vm2741_vm1, %v6027_v30  ;;  %4223 = vmatprep.mubr.f32.mxu0 %v6548_v1 }
 0x2db   :  { %4122 = vmatprep.mubr.f32.mxu1 %v6548_v1 }
 0x2dd   :  { %6050 = vmatmul.mubr.msk.f32.gmra.mxu0 %vm2741_vm1, %v6026_v13 }
 0x2de   :  { %6044 = vmatmul.mubr.msk.f32.gmra.mxu1 %vm2741_vm1, %v6028_v0  ;;  %4229 = vmatprep.mubr.f32.mxu0 %v6548_v1 }
 0x2df   :  { %4128 = vmatprep.mubr.f32.mxu1 %v6548_v1 }
 0x2e1   :  { %6051 = vmatmul.mubr.msk.f32.gmra.mxu0 %vm2741_vm1, %v6027_v30 }
 0x2e2   :  { %6045 = vmatmul.mubr.msk.f32.gmra.mxu1 %vm2741_vm1, %v6029_v60  ;;  %4235 = vmatprep.mubr.f32.mxu0 %v6548_v1 }
 0x2e3   :  { %4134 = vmatprep.mubr.f32.mxu1 %v6548_v1 }
 0x2e5   :  { %6052 = vmatmul.mubr.msk.f32.gmra.mxu0 %vm2741_vm1, %v6028_v0 }
 0x2e6   :  { %6046 = vmatmul.mubr.msk.f32.gmra.mxu1 %vm2741_vm1, %v6030_v35  ;;  %4241 = vmatprep.mubr.f32.mxu0 %v6548_v1 }
 0x2e7   :  { %4140 = vmatprep.mubr.f32.mxu1 %v6548_v1 }
 0x2e9   :  { %6053 = vmatmul.mubr.msk.f32.gmra.mxu0 %vm2741_vm1, %v6029_v60 }
 0x2ea   :  { %6047 = vmatmul.mubr.msk.f32.gmra.mxu1 %vm2741_vm1, %v6031_v12  ;;  %4247 = vmatprep.mubr.f32.mxu0 %v6548_v1 }
 0x2eb   :  { %4405 = vmatprep.mubr.f32.mxu1 %v6548_v1 }
 0x2ec   :  { %v7361_v50 = vpop.f32.mrf.mxu1 }
 0x2ed   :  { %6054 = vmatmul.mubr.msk.f32.gmra.mxu0 %vm2741_vm1, %v6030_v35 }
 0x2ee   :  { %6064 = vmatmul.mubr.msk.f32.vlgmr.msra.gmra.mxu1 %vm2741_vm1, %v7359_v31  ;;  %v7366_v8 = vpop.f32.mrf.mxu1  ;;  %4253 = vmatprep.mubr.f32.mxu0 %v6548_v1 }
 0x2ef   :  { %4596 = vmatpush1.msra.mxu1 %v2722_v59  ;;  %4411 = vmatprep.mubr.f32.mxu1 %v6548_v1 }
 0x2f0   :  { %4597 = vmatprep.subr.mxu1 %v2713_v9  ;;  %v7377_v14 = vpop.f32.mrf.mxu1 }
 0x2f1   :  { %4598 = vmatpush1.msra.mxu1 %v2712_v34  ;;  %6055 = vmatmul.mubr.msk.f32.gmra.mxu0 %vm2741_vm1, %v6031_v12 }
 0x2f2   :  { %6065 = vmatmul.mubr.msk.f32.gmra.mxu1 %vm2741_vm1, %v7375_v51  ;;  %v7384_v18 = vpop.f32.mrf.mxu1  ;;  %4518 = vmatprep.mubr.f32.mxu0 %v6548_v1 }
 0x2f3   :  { %4417 = vmatprep.mubr.f32.mxu1 %v6548_v1 }
 0x2f4   :  { %v7393_v29 = vpop.f32.mrf.mxu0 }
 0x2f5   :  { %6072 = vmatmul.mubr.msk.f32.vlgmr.msra.gmra.mxu0 %vm2741_vm1, %v7359_v31  ;;  %v7397_v32 = vpop.f32.mrf.mxu1 }
 0x2f6   :  { %6066 = vmatmul.mubr.msk.f32.gmra.mxu1 %vm2741_vm1, %v7391_v19  ;;  %v7401_v36 = vpop.f32.mrf.mxu0  ;;  %4524 = vmatprep.mubr.f32.mxu0 %v6548_v1 }
 0x2f7   :  { %v7404_v37 = vpop.f32.mrf.mxu1  ;;  %4423 = vmatprep.mubr.f32.mxu1 %v6548_v1 }
 0x2f9   :  { %v7412_v41 = vpop.f32.mrf.mxu0  ;;  %6073 = vmatmul.mubr.msk.f32.gmra.mxu0 %vm2741_vm1, %v7375_v51 }
 0x2fa   :  { %v7416_v44 = vpop.f32.mrf.mxu1  ;;  %6067 = vmatmul.mubr.msk.f32.gmra.mxu1 %vm2741_vm1, %v7410_v20  ;;  %4530 = vmatprep.mubr.f32.mxu0 %v6548_v1 }
 0x2fb   :  { %v7421_v21 = vpop.f32.mrf.mxu0  ;;  %4429 = vmatprep.mubr.f32.mxu1 %v6548_v1 }
 0x2fc   :  { %v7429_v53 = vpop.f32.mrf.mxu1 }
 0x2fd   :  { %v7431_v16 = vpop.f32.mrf.mxu0  ;;  %6074 = vmatmul.mubr.msk.f32.gmra.mxu0 %vm2741_vm1, %v7391_v19 }
 0x2fe   :  { %v7435_v39 = vpop.f32.mrf.mxu1  ;;  %6068 = vmatmul.mubr.msk.f32.gmra.mxu1 %vm2741_vm1, %v7427_v47  ;;  %4536 = vmatprep.mubr.f32.mxu0 %v6548_v1 }
 0x2ff   :  { %v7440_v57 = vpop.f32.mrf.mxu0  ;;  %4435 = vmatprep.mubr.f32.mxu1 %v6548_v1 }
 0x300   :  { %v7448_v28 = vpop.f32.mrf.mxu1 }
 0x301   :  { %v7450_v56 = vpop.f32.mrf.mxu0  ;;  %6075 = vmatmul.mubr.msk.f32.gmra.mxu0 %vm2741_vm1, %v7410_v20 }
 0x302   :  { %v7454_v22 = vpop.f32.mrf.mxu1  ;;  %6069 = vmatmul.mubr.msk.f32.gmra.mxu1 %vm2741_vm1, %v7446_v25  ;;  %4542 = vmatprep.mubr.f32.mxu0 %v6548_v1 }
 0x303   :  { %v7459_v42 = vpop.f32.mrf.mxu0  ;;  %4441 = vmatprep.mubr.f32.mxu1 %v6548_v1 }
 0x304   :  { %v7467_v54 = vpop.f32.mrf.mxu1 }
 0x305   :  { %v7469_v46 = vpop.f32.mrf.mxu0  ;;  %6076 = vmatmul.mubr.msk.f32.gmra.mxu0 %vm2741_vm1, %v7427_v47 }
 0x306   :  { %v7473_v23 = vpop.f32.mrf.mxu1  ;;  %6070 = vmatmul.mubr.msk.f32.gmra.mxu1 %vm2741_vm1, %v7465_v33  ;;  %4548 = vmatprep.mubr.f32.mxu0 %v6548_v1 }
 0x307   :  { %v7478_v26 = vpop.f32.mrf.mxu0  ;;  %4447 = vmatprep.mubr.f32.mxu1 %v6548_v1 }
 0x308   :  { %v7486_v49 = vpop.f32.mrf.mxu1 }
 0x309   :  { %v7488_v38 = vpop.f32.mrf.mxu0  ;;  %6077 = vmatmul.mubr.msk.f32.gmra.mxu0 %vm2741_vm1, %v7446_v25 }
 0x30a   :  { %v7492_v40 = vpop.f32.mrf.mxu1  ;;  %6071 = vmatmul.mubr.msk.f32.gmra.mxu1 %vm2741_vm1, %v7484_v24  ;;  %4554 = vmatprep.mubr.f32.mxu0 %v6548_v1 }
 0x30b   :  { %v7497_v52 = vpop.f32.mrf.mxu0  ;;  %4631 = vmatprep.mubr.f32.mxu1 %v6548_v1 }
 0x30c   :  { %v7500_v55 = vpop.f32.mrf.mxu1 }
 0x30d   :  { %v7502_v58 = vpop.f32.mrf.mxu0  ;;  %6078 = vmatmul.mubr.msk.f32.gmra.mxu0 %vm2741_vm1, %v7465_v33 }
 0x30e   :  { %v7506_v59 = vpop.f32.mrf.mxu1  ;;  %6080 = vmatmul.mubr.msk.f32.vlgmr.msra.gmra.mxu1 %vm2741_vm1, %v7359_v31  ;;  %4560 = vmatprep.mubr.f32.mxu0 %v6548_v1 }
 0x30f   :  { %v7511_v27 = vpop.f32.mrf.mxu0  ;;  %4637 = vmatprep.mubr.f32.mxu1 %v6548_v1 }
 0x310   :  { %v7514_v45 = vpop.f32.mrf.mxu1 }
 0x311   :  { %v7516_v61 = vpop.f32.mrf.mxu0  ;;  %6079 = vmatmul.mubr.msk.f32.gmra.mxu0 %vm2741_vm1, %v7484_v24 }
 0x312   :  { %v7520_v62 = vpop.f32.mrf.mxu1  ;;  %6081 = vmatmul.mubr.msk.f32.gmra.mxu1 %vm2741_vm1, %v7375_v51 }
 0x313   :  { %v7524_v63 = vpop.f32.mrf.mxu0  ;;  %4643 = vmatprep.mubr.f32.mxu1 %v6548_v1 }
 0x314   :  { %8255 = vst [vmem:[#allocation17_spill] sm:$0xff] %v7524_v63  ;;  %v7527_v2 = vpop.f32.mrf.mxu1 }
 0x315   :  { %8256 = vst [vmem:[#allocation18_spill] sm:$0xff] %v7527_v2  ;;  %v3195_v17 = vpop.f32.mrf.mxu0 }
 0x316   :  { %v7530_v48 = vadd.f32 %v3195_v17, %v7361_v50  ;;  %v7532_v34 = vpop.f32.mrf.mxu1  ;;  %6082 = vmatmul.mubr.msk.f32.gmra.mxu1 %vm2741_vm1, %v7391_v19 }
 0x317   :  { %v7536_v4 = vpop.f32.mrf.mxu0  ;;  %4649 = vmatprep.mubr.f32.mxu1 %v6548_v1 }
 0x318   :  { %v7539_v13 = vpop.f32.mrf.mxu1 }
 0x319   :  { %8257 = vst [vmem:[#allocation19_spill] sm:$0xff] %v7539_v13  ;;  %v3201_v30 = vpop.f32.mrf.mxu0 }
 0x31a   :  { %v7542_v0 = vadd.f32 %v3201_v30, %v7377_v14  ;;  %v7544_v6 = vpop.f32.mrf.mxu1  ;;  %6083 = vmatmul.mubr.msk.f32.gmra.mxu1 %vm2741_vm1, %v7410_v20 }
 0x31b   :  { %v7548_v10 = vpop.f32.mrf.mxu0  ;;  %4655 = vmatprep.mubr.f32.mxu1 %v6548_v1 }
 0x31c   :  { %v7551_v60 = vpop.f32.mrf.mxu1 }
 0x31d   :  { %8258 = vst [vmem:[#allocation20_spill] sm:$0xff] %v7551_v60  ;;  %v3207_v11 = vpop.f32.mrf.mxu0 }
 0x31e   :  { %v7554_v35 = vadd.f32 %v3207_v11, %v7397_v32  ;;  %v3082_v43 = vpop.f32.mrf.mxu1  ;;  %6084 = vmatmul.mubr.msk.f32.gmra.mxu1 %vm2741_vm1, %v7427_v47 }
 0x31f   :  { %v7558_v12 = vpop.f32.mrf.mxu0  ;;  %4661 = vmatprep.mubr.f32.mxu1 %v6548_v1 }
 0x320   :  { %v7561_v15 = vpop.f32.mrf.mxu1 }
 0x321   :  { %8259 = vst [vmem:[#allocation21_spill] sm:$0xff] %v7561_v15  ;;  %v3213_v5 = vpop.f32.mrf.mxu0 }
 0x322   :  { %v7564_v3 = vadd.f32 %v3213_v5, %v7416_v44  ;;  %v3088_v7 = vpop.f32.mrf.mxu1  ;;  %6085 = vmatmul.mubr.msk.f32.gmra.mxu1 %vm2741_vm1, %v7446_v25 }
 0x323   :  { %v7568_v31 = vpop.f32.mrf.mxu0  ;;  %4667 = vmatprep.mubr.f32.mxu1 %v6548_v1 }
 0x324   :  { %v7571_v50 = vpop.f32.mrf.mxu1 }
 0x325   :  { %8260 = vst [vmem:[#allocation22_spill] sm:$0xff] %v7571_v50  ;;  %v3219_v9 = vpop.f32.mrf.mxu0 }
 0x326   :  { %v7574_v51 = vadd.f32 %v3219_v9, %v7435_v39  ;;  %v3094_v14 = vpop.f32.mrf.mxu1  ;;  %6086 = vmatmul.mubr.msk.f32.gmra.mxu1 %vm2741_vm1, %v7465_v33 }
 0x327   :  { %v7578_v19 = vpop.f32.mrf.mxu0  ;;  %4673 = vmatprep.mubr.f32.mxu1 %v6548_v1 }
 0x328   :  { %v7581_v32 = vpop.f32.mrf.mxu1 }
 0x329   :  { %8261 = vst [vmem:[#allocation23_spill] sm:$0xff] %v7581_v32  ;;  %v3225_v20 = vpop.f32.mrf.mxu0 }
 0x32a   :  { %v7584_v44 = vadd.f32 %v3225_v20, %v7454_v22  ;;  %v3100_v47 = vpop.f32.mrf.mxu1  ;;  %6087 = vmatmul.mubr.msk.f32.gmra.mxu1 %vm2741_vm1, %v7484_v24 }
 0x32b   :  { %v7588_v39 = vpop.f32.mrf.mxu0 }
 0x32c   :  { %v7590_v25 = vpop.f32.mrf.mxu1 }
 0x32d   :  { %8262 = vst [vmem:[#allocation24_spill] sm:$0xff] %v7590_v25  ;;  %v3231_v17 = vpop.f32.mrf.mxu0 }
 0x32e   :  { %v7593_v33 = vadd.f32 %v3231_v17, %v7473_v23  ;;  %v3308_v30 = vpop.f32.mrf.mxu1 }
 0x32f   :  { %v7596_v1 = vadd.f32 %v3308_v30, %v7393_v29  ;;  %v7598_v11 = vpop.f32.mrf.mxu0 }
 0x330   :  { %v3310_v22 = vpop.f32.mrf.mxu1 }
 0x331   :  { %v3237_v5 = vpop.f32.mrf.mxu0 }
 0x332   :  { %v7601_v9 = vadd.f32 %v3237_v5, %v7492_v40  ;;  %v3314_v24 = vpop.f32.mrf.mxu1 }
 0x333   :  { %v7604_v20 = vadd.f32 %v3314_v24, %v7412_v41  ;;  %v7606_v25 = vpop.f32.mrf.mxu0 }
 0x334   :  { %v7608_v32 = vpop.f32.mrf.mxu1 }
 0x335   :  { %v3421_v23 = vpop.f32.mrf.mxu0 }
 0x336   :  { %v7611_v17 = vadd.f32 %v3421_v23, %v7506_v59  ;;  %v3320_v29 = vpop.f32.mrf.mxu1 }
 0x337   :  { %v7614_v30 = vadd.f32 %v3320_v29, %v7431_v16  ;;  %v7616_v50 = vpop.f32.mrf.mxu0 }
 0x338   :  { %v7618_v40 = vpop.f32.mrf.mxu1 }
 0x339   :  { %v3427_v5 = vpop.f32.mrf.mxu0 }
 0x33a   :  { %v7621_v41 = vadd.f32 %v3427_v5, %v7520_v62  ;;  %v3326_v24 = vpop.f32.mrf.mxu1 }
 0x33b   :  { %v7624_v15 = vadd.f32 %v3326_v24, %v7450_v56  ;;  %v7626_v60 = vpop.f32.mrf.mxu0 }
 0x33c   :  { %8263 = vst [vmem:[#allocation25_spill] sm:$0xff] %v7621_v41  ;;  %8264 = vst [vmem:[#allocation26_spill] sm:$0xff] %v7626_v60  ;;  %v7628_v59 = vpop.f32.mrf.mxu1 }
 0x33d   :  { %v3433_v23 = vpop.f32.mrf.mxu0 }
 0x33e   :  { %v7631_v16 = vadd.f32 %v3433_v23, %v7532_v34  ;;  %v3332_v29 = vpop.f32.mrf.mxu1 }
 0x33f   :  { %v7634_v13 = vadd.f32 %v3332_v29, %v7469_v46  ;;  %v7636_v2 = vpop.f32.mrf.mxu0 }
 0x340   :  { %8265 = vst [vmem:[#allocation27_spill] sm:$0xff] %v7631_v16  ;;  %8266 = vst [vmem:[#allocation28_spill] sm:$0xff] %v7636_v2  ;;  %v7638_v62 = vpop.f32.mrf.mxu1 }
 0x341   :  { %v3439_v5 = vpop.f32.mrf.mxu0 }
 0x342   :  { %v7641_v56 = vadd.f32 %v3439_v5, %v7544_v6  ;;  %v3338_v24 = vpop.f32.mrf.mxu1 }
 0x343   :  { %v7644_v41 = vadd.f32 %v3338_v24, %v7488_v38  ;;  %v7646_v60 = vpop.f32.mrf.mxu0 }
 0x344   :  { %8267 = vst [vmem:[#allocation29_spill] sm:$0xff] %v7641_v56  ;;  %8268 = vst [vmem:[#allocation30_spill] sm:$0xff] %v7646_v60  ;;  %v7648_v34 = vpop.f32.mrf.mxu1 }
 0x345   :  { %v3445_v23 = vpop.f32.mrf.mxu0 }
 0x346   :  { %v7650_v16 = vadd.f32 %v3445_v23, %v3082_v43  ;;  %v3344_v46 = vpop.f32.mrf.mxu1 }
 0x347   :  { %v7653_v29 = vadd.f32 %v3344_v46, %v7502_v58  ;;  %v7655_v2 = vpop.f32.mrf.mxu0  ;;  %v3198_v46 = vadd.f32 %v7536_v4, %v7366_v8 }
 0x348   :  { %8269 = vst [vmem:[#allocation31_spill] sm:$0xff] %v7650_v16  ;;  %v7657_v63 = vpop.f32.mrf.mxu1 }
 0x349   :  { %v3451_v6 = vpop.f32.mrf.mxu0 }
 0x34a   :  { %v7659_v5 = vadd.f32 %v3451_v6, %v3088_v7  ;;  %v3350_v38 = vpop.f32.mrf.mxu1 }
 0x34b   :  { %v7662_v24 = vadd.f32 %v3350_v38, %v7516_v61  ;;  %v7664_v56 = vpop.f32.mrf.mxu0 }
 0x34c   :  { %8270 = vst [vmem:[#allocation32_spill] sm:$0xff] %v7659_v5  ;;  %8271 = vst [vmem:[#allocation33_spill] sm:$0xff] %v7664_v56  ;;  %v7666_v60 = vpop.f32.mrf.mxu1 }
 0x34d   :  { %v3457_v43 = vpop.f32.mrf.mxu0 }
 0x34e   :  { %v7668_v23 = vadd.f32 %v3457_v43, %v3094_v14  ;;  %v3567_v58 = vpop.f32.mrf.mxu1  ;;  %v3204_v14 = vadd.f32 %v7548_v10, %v7384_v18 }
 0x34f   :  { %v7673_v16 = vadd.f32 %v3567_v58, %v7530_v48  ;;  %v7675_v7 = vpop.f32.mrf.mxu0  ;;  %v3311_v58 = vadd.f32 %v3310_v22, %v7401_v36  ;;  %v3317_v36 = vadd.f32 %v7608_v32, %v7421_v21  ;;  %v3323_v21 = vadd.f32 %v7618_v40, %v7440_v57 }
 0x350   :  { %8272 = vst [vmem:[#allocation34_spill] sm:$0xff] %v7668_v23  ;;  %v3569_v6 = vpop.f32.mrf.mxu1  ;;  %v3329_v57 = vadd.f32 %v7628_v59, %v7459_v42 }
 0x351   :  { %v7677_v5 = vadd.f32 %v3569_v6, %v3198_v46  ;;  %v3463_v61 = vpop.f32.mrf.mxu0  ;;  %v3210_v6 = vadd.f32 %v7558_v12, %v7404_v37  ;;  %v3216_v37 = vadd.f32 %v7568_v31, %v7429_v53  ;;  %v3222_v53 = vadd.f32 %v7578_v19, %v7448_v28 }
 0x352   :  { %v7679_v38 = vadd.f32 %v3463_v61, %v3100_v47  ;;  %v3573_v56 = vpop.f32.mrf.mxu1  ;;  %v3228_v28 = vadd.f32 %v7588_v39, %v7467_v54  ;;  %v3234_v54 = vadd.f32 %v7598_v11, %v7486_v49  ;;  %v3240_v49 = vadd.f32 %v7606_v25, %v7500_v55 }
 0x353   :  { %v7684_v43 = vadd.f32 %v3573_v56, %v7542_v0  ;;  %v7686_v23 = vpop.f32.mrf.mxu0  ;;  %v3424_v55 = vadd.f32 %v7616_v50, %v7514_v45  ;;  %v8275_v45 = vld [vmem:[#allocation26_spill] sm:$0xff] }
 0x354   :  { %v3575_v8 = vpop.f32.mrf.mxu1 }
 0x355   :  { %v7688_v48 = vadd.f32 %v3575_v8, %v3204_v14  ;;  %v3680_v4 = vpop.f32.mrf.mxu0 }
 0x356   :  { %v7692_v46 = vadd.f32 %v3680_v4, %v7596_v1  ;;  %v3579_v47 = vpop.f32.mrf.mxu1 }
 0x357   :  { %v7697_v18 = vadd.f32 %v3579_v47, %v7554_v35  ;;  %v3682_v0 = vpop.f32.mrf.mxu0 }
 0x358   :  { %v7699_v10 = vadd.f32 %v3682_v0, %v3311_v58  ;;  %v3581_v56 = vpop.f32.mrf.mxu1 }
 0x359   :  { %v7701_v61 = vadd.f32 %v3581_v56, %v3210_v6  ;;  %v3686_v14 = vpop.f32.mrf.mxu0 }
 0x35a   :  { %v7706_v1 = vadd.f32 %v3686_v14, %v7604_v20  ;;  %v3585_v22 = vpop.f32.mrf.mxu1 }
 0x35b   :  { %v7711_v35 = vadd.f32 %v3585_v22, %v7564_v3  ;;  %v3688_v12 = vpop.f32.mrf.mxu0 }
 0x35c   :  { %v7713_v8 = vadd.f32 %v3688_v12, %v3317_v36  ;;  %v3587_v4 = vpop.f32.mrf.mxu1  ;;  %v4881_v36 = vld [vmem:[#allocation8 + $0x40] sm:$0xff] }
 0x35d   :  { %v7715_v58 = vadd.f32 %v3587_v4, %v3216_v37  ;;  %v3692_v47 = vpop.f32.mrf.mxu0  ;;  %6248 = vmatprep.mubr.msk.f32.mxu0 %vm4889_vm2, %v4881_v36 }
 0x35e   :  { %v7720_v32 = vadd.f32 %v3692_v47, %v7614_v30  ;;  %v3591_v20 = vpop.f32.mrf.mxu1 }
 0x35f   :  { %v7725_v3 = vadd.f32 %v3591_v20, %v7574_v51  ;;  %v3694_v31 = vpop.f32.mrf.mxu0 }
 0x360   :  { %v7727_v6 = vadd.f32 %v3694_v31, %v3323_v21  ;;  %v3593_v0 = vpop.f32.mrf.mxu1 }
 0x361   :  { %v7729_v56 = vadd.f32 %v3593_v0, %v3222_v53  ;;  %v3698_v14 = vpop.f32.mrf.mxu0 }
 0x362   :  { %v7734_v30 = vadd.f32 %v3698_v14, %v7624_v15  ;;  %v3597_v40 = vpop.f32.mrf.mxu1  ;;  %v3335_v15 = vadd.f32 %v7638_v62, %v7478_v26  ;;  %v3341_v26 = vadd.f32 %v7648_v34, %v7497_v52  ;;  %v3347_v52 = vadd.f32 %v7657_v63, %v7511_v27 }
 0x363   :  { %v7739_v51 = vadd.f32 %v3597_v40, %v7584_v44  ;;  %v3700_v19 = vpop.f32.mrf.mxu0 }
 0x364   :  { %v7742_v22 = vadd.f32 %v3700_v19, %v3329_v57  ;;  %v3599_v37 = vpop.f32.mrf.mxu1 }
 0x365   :  { %v7744_v12 = vadd.f32 %v3599_v37, %v3228_v28  ;;  %v3704_v42 = vpop.f32.mrf.mxu0  ;;  %v8273_v37 = vld [vmem:[#allocation17_spill] sm:$0xff] }
 0x366   :  { %v7749_v59 = vadd.f32 %v3704_v42, %v7634_v13  ;;  %v3603_v4 = vpop.f32.mrf.mxu1  ;;  %v3353_v27 = vadd.f32 %v7666_v60, %v8273_v37  ;;  %v5149_v42 = vld [vmem:[#allocation8 + $0x80] sm:$0xff]  ;;  %v8282_v37 = vld [vmem:[#allocation20_spill] sm:$0xff] }
 0x367   :  { %v7754_v44 = vadd.f32 %v3603_v4, %v7593_v33  ;;  %v3706_v39 = vpop.f32.mrf.mxu0  ;;  %6304 = vmatprep.mubr.msk.f32.mxu1 %vm4889_vm2, %v5149_v42  ;;  %v8284_v42 = vld [vmem:[#allocation29_spill] sm:$0xff] }
 0x368   :  { %v7756_v47 = vadd.f32 %v3706_v39, %v3335_v15  ;;  %v3605_v21 = vpop.f32.mrf.mxu1  ;;  %v8274_v15 = vld [vmem:[#allocation18_spill] sm:$0xff] }
 0x369   :  { %v7758_v20 = vadd.f32 %v3605_v21, %v3234_v54  ;;  %v3710_v53 = vpop.f32.mrf.mxu0  ;;  %v3430_v50 = vadd.f32 %v8275_v45, %v8274_v15 }
 0x36a   :  { %v7763_v13 = vadd.f32 %v3710_v53, %v7644_v41  ;;  %v3609_v62 = vpop.f32.mrf.mxu1 }
 0x36b   :  { %v7768_v33 = vadd.f32 %v3609_v62, %v7601_v9  ;;  %v3712_v11 = vpop.f32.mrf.mxu0  ;;  %v8279_v62 = vld [vmem:[#allocation19_spill] sm:$0xff] }
 0x36c   :  { %v7770_v31 = vadd.f32 %v3712_v11, %v3341_v26  ;;  %v3611_v0 = vpop.f32.mrf.mxu1 }
 0x36d   :  { %v7772_v14 = vadd.f32 %v3611_v0, %v3240_v49  ;;  %v3716_v57 = vpop.f32.mrf.mxu0  ;;  %v8280_v49 = vld [vmem:[#allocation28_spill] sm:$0xff]  ;;  %v8281_v0 = vld [vmem:[#allocation27_spill] sm:$0xff] }
 0x36e   :  { %v7777_v41 = vadd.f32 %v3716_v57, %v7653_v29  ;;  %v3793_v34 = vpop.f32.mrf.mxu1  ;;  %v3436_v11 = vadd.f32 %v8280_v49, %v8279_v62  ;;  %v8286_v62 = vld [vmem:[#allocation31_spill] sm:$0xff] }
 0x36f   :  { %v7782_v25 = vadd.f32 %v3793_v34, %v7611_v17  ;;  %v3718_v9 = vpop.f32.mrf.mxu0  ;;  %v8276_v17 = vld [vmem:[#allocation25_spill] sm:$0xff] }
 0x370   :  { %v7784_v40 = vadd.f32 %v3718_v9, %v3347_v52  ;;  %v3795_v36 = vpop.f32.mrf.mxu1 }
 0x371   :  { %v7786_v28 = vadd.f32 %v3795_v36, %v3424_v55  ;;  %v3722_v19 = vpop.f32.mrf.mxu0 }
 0x372   :  { %v7791_v63 = vadd.f32 %v3722_v19, %v7662_v24  ;;  %v3799_v29 = vpop.f32.mrf.mxu1 }
 0x373   :  { %v7796_v4 = vadd.f32 %v3799_v29, %v8276_v17  ;;  %v3724_v54 = vpop.f32.mrf.mxu0 }
 0x374   :  { %v7799_v39 = vadd.f32 %v3724_v54, %v3353_v27  ;;  %v3801_v21 = vpop.f32.mrf.mxu1  ;;  %v8283_v27 = vld [vmem:[#allocation30_spill] sm:$0xff] }
 0x375   :  { %v7801_v53 = vadd.f32 %v3801_v21, %v3430_v50  ;;  %v3987_v60 = vpop.f32.mrf.mxu0  ;;  %v3442_v29 = vadd.f32 %v8283_v27, %v8282_v37  ;;  %v8288_v37 = vld [vmem:[#allocation33_spill] sm:$0xff] }
 0x376   :  { %8277 = vst [vmem:[#allocation17_spill] sm:$0xff] %v7799_v39  ;;  %v7804_v24 = vadd.f32 %v3987_v60, %v7673_v16  ;;  %v3805_v26 = vpop.f32.mrf.mxu1  ;;  %v8285_v60 = vld [vmem:[#allocation21_spill] sm:$0xff] }
 0x377   :  { %v7809_v57 = vadd.f32 %v3805_v26, %v8281_v0  ;;  %v3989_v52 = vpop.f32.mrf.mxu0  ;;  %v3448_v26 = vadd.f32 %v7655_v2, %v8285_v60  ;;  %v8290_v60 = vld [vmem:[#allocation23_spill] sm:$0xff] }
 0x378   :  { %8278 = vst [vmem:[#allocation18_spill] sm:$0xff] %v7804_v24  ;;  %v7812_v34 = vadd.f32 %v3989_v52, %v7677_v5  ;;  %v3807_v55 = vpop.f32.mrf.mxu1 }
 0x379   :  { %v7814_v9 = vadd.f32 %v3807_v55, %v3436_v11  ;;  %v3993_v36 = vpop.f32.mrf.mxu0 }
 0x37a   :  { %v7817_v19 = vadd.f32 %v3993_v36, %v7684_v43  ;;  %v3811_v16 = vpop.f32.mrf.mxu1 }
 0x37b   :  { %v7822_v15 = vadd.f32 %v3811_v16, %v8284_v42  ;;  %v3995_v45 = vpop.f32.mrf.mxu0  ;;  %v8287_v16 = vld [vmem:[#allocation22_spill] sm:$0xff] }
 0x37c   :  { %v7825_v50 = vadd.f32 %v3995_v45, %v7688_v48  ;;  %v3813_v5 = vpop.f32.mrf.mxu1  ;;  %v3454_v27 = vadd.f32 %v8288_v37, %v8287_v16 }
 0x37d   :  { %v7827_v17 = vadd.f32 %v3813_v5, %v3442_v29  ;;  %v3999_v54 = vpop.f32.mrf.mxu0  ;;  %v8289_v29 = vld [vmem:[#allocation32_spill] sm:$0xff] }
 0x37e   :  { %v7830_v21 = vadd.f32 %v3999_v54, %v7697_v18  ;;  %v3817_v43 = vpop.f32.mrf.mxu1 }
 0x37f   :  { %v7835_v49 = vadd.f32 %v3817_v43, %v8286_v62  ;;  %v4001_v11 = vpop.f32.mrf.mxu0  ;;  %v8291_v62 = vld [vmem:[#allocation34_spill] sm:$0xff] }
 0x380   :  { %v7838_v0 = vadd.f32 %v4001_v11, %v7701_v61  ;;  %v3819_v48 = vpop.f32.mrf.mxu1 }
 0x381   :  { %v7840_v52 = vadd.f32 %v3819_v48, %v3448_v26  ;;  %v4005_v55 = vpop.f32.mrf.mxu0  ;;  %v3460_v26 = vadd.f32 %v7675_v7, %v8290_v60 }
 0x382   :  { %v7843_v36 = vadd.f32 %v4005_v55, %v7711_v35  ;;  %v3823_v18 = vpop.f32.mrf.mxu1 }
 0x383   :  { %v7848_v2 = vadd.f32 %v3823_v18, %v8289_v29  ;;  %v4007_v42 = vpop.f32.mrf.mxu0 }
 0x384   :  { %v7851_v45 = vadd.f32 %v4007_v42, %v7715_v58  ;;  %v3825_v61 = vpop.f32.mrf.mxu1 }
 0x385   :  { %v7853_v5 = vadd.f32 %v3825_v61, %v3454_v27  ;;  %v4011_v54 = vpop.f32.mrf.mxu0  ;;  %v8293_v27 = vld [vmem:[#allocation24_spill] sm:$0xff] }
 0x386   :  { %v7856_v43 = vadd.f32 %v4011_v54, %v7725_v3  ;;  %v3829_v35 = vpop.f32.mrf.mxu1  ;;  %v3466_v29 = vadd.f32 %v7686_v23, %v8293_v27 }
 0x387   :  { %v7861_v11 = vadd.f32 %v3829_v35, %v8291_v62  ;;  %v4013_v48 = vpop.f32.mrf.mxu0 }
 0x388   :  { %v7864_v55 = vadd.f32 %v4013_v48, %v7729_v56  ;;  %v3831_v58 = vpop.f32.mrf.mxu1 }
 0x389   :  { %8292 = vst [vmem:[#allocation26_spill] sm:$0xff] %v7861_v11  ;;  %v7866_v18 = vadd.f32 %v3831_v58, %v3460_v26  ;;  %v4017_v16 = vpop.f32.mrf.mxu0 }
 0x38a   :  { %v7869_v37 = vadd.f32 %v4017_v16, %v7739_v51  ;;  %v3835_v3 = vpop.f32.mrf.mxu1 }
 0x38b   :  { %v7874_v7 = vadd.f32 %v3835_v3, %v7679_v38  ;;  %v4019_v42 = vpop.f32.mrf.mxu0 }
 0x38c   :  { %v7877_v61 = vadd.f32 %v4019_v42, %v7744_v12  ;;  %v3837_v56 = vpop.f32.mrf.mxu1 }
 0x38d   :  { %8294 = vst [vmem:[#allocation25_spill] sm:$0xff] %v7874_v7  ;;  %v7879_v54 = vadd.f32 %v3837_v56, %v3466_v29  ;;  %v4023_v35 = vpop.f32.mrf.mxu0 }
 0x38e   :  { %v7882_v60 = vadd.f32 %v4023_v35, %v7754_v44  ;;  %v4100_v51 = vpop.f32.mrf.mxu1 }
 0x38f   :  { %v7885_v26 = vadd.f32 %v4100_v51, %v7692_v46  ;;  %v7887_v62 = vpop.f32.mrf.mxu0 }
 0x390   :  { %v4102_v23 = vpop.f32.mrf.mxu1 }
 0x391   :  { %v7890_v38 = vadd.f32 %v4102_v23, %v7699_v10  ;;  %v4029_v48 = vpop.f32.mrf.mxu0 }
 0x392   :  { %v7893_v12 = vadd.f32 %v4029_v48, %v7768_v33  ;;  %v4106_v58 = vpop.f32.mrf.mxu1 }
 0x393   :  { %v7896_v16 = vadd.f32 %v4106_v58, %v7706_v1  ;;  %v7898_v44 = vpop.f32.mrf.mxu0 }
 0x394   :  { %v4108_v3 = vpop.f32.mrf.mxu1 }
 0x395   :  { %v4269_v46 = vadd.f32 %v4108_v3, %v7713_v8  ;;  %v4213_v27 = vpop.f32.mrf.mxu0 }
 0x396   :  { %v7902_v29 = vadd.f32 %v4213_v27, %v7782_v25  ;;  %v4112_v42 = vpop.f32.mrf.mxu1 }
 0x397   :  { %v7905_v10 = vadd.f32 %v4112_v42, %v7720_v32  ;;  %v4215_v56 = vpop.f32.mrf.mxu0 }
 0x398   :  { %8295 = vst [vmem:[#allocation19_spill] sm:$0xff] %v7902_v29  ;;  %v7908_v33 = vadd.f32 %v4215_v56, %v7786_v28  ;;  %v4114_v35 = vpop.f32.mrf.mxu1 }
 0x399   :  { %v7911_v1 = vadd.f32 %v4114_v35, %v7727_v6  ;;  %v4219_v51 = vpop.f32.mrf.mxu0 }
 0x39a   :  { %v7914_v23 = vadd.f32 %v4219_v51, %v7796_v4  ;;  %v7916_v8 = vpop.f32.mrf.mxu1 }
 0x39b   :  { %8296 = vst [vmem:[#allocation28_spill] sm:$0xff] %v7911_v1  ;;  %v4221_v25 = vpop.f32.mrf.mxu0 }
 0x39c   :  { %8297 = vst [vmem:[#allocation27_spill] sm:$0xff] %v7914_v23  ;;  %v7919_v48 = vadd.f32 %v4221_v25, %v7801_v53  ;;  %v4120_v32 = vpop.f32.mrf.mxu1 }
 0x39d   :  { %v7922_v58 = vadd.f32 %v4120_v32, %v7742_v22  ;;  %v4225_v28 = vpop.f32.mrf.mxu0 }
 0x39e   :  { %8298 = vst [vmem:[#allocation20_spill] sm:$0xff] %v7919_v48  ;;  %v7925_v3 = vadd.f32 %v4225_v28, %v7809_v57  ;;  %v7927_v6 = vpop.f32.mrf.mxu1 }
 0x39f   :  { %8299 = vst [vmem:[#allocation30_spill] sm:$0xff] %v7922_v58  ;;  %v4227_v27 = vpop.f32.mrf.mxu0 }
 0x3a0   :  { %8300 = vst [vmem:[#allocation29_spill] sm:$0xff] %v7925_v3  ;;  %v7930_v4 = vadd.f32 %v4227_v27, %v7814_v9  ;;  %v4126_v42 = vpop.f32.mrf.mxu1 }
 0x3a1   :  { %v7933_v56 = vadd.f32 %v4126_v42, %v7756_v47  ;;  %v4231_v53 = vpop.f32.mrf.mxu0 }
 0x3a2   :  { %8301 = vst [vmem:[#allocation21_spill] sm:$0xff] %v7930_v4  ;;  %v7936_v35 = vadd.f32 %v4231_v53, %v7822_v15  ;;  %v7938_v22 = vpop.f32.mrf.mxu1 }
 0x3a3   :  { %8302 = vst [vmem:[#allocation31_spill] sm:$0xff] %v7933_v56  ;;  %v4233_v51 = vpop.f32.mrf.mxu0 }
 0x3a4   :  { %8303 = vst [vmem:[#allocation22_spill] sm:$0xff] %v7936_v35  ;;  %v7941_v57 = vadd.f32 %v4233_v51, %v7827_v17  ;;  %v4132_v25 = vpop.f32.mrf.mxu1 }
 0x3a5   :  { %v7944_v32 = vadd.f32 %v4132_v25, %v7770_v31  ;;  %v4237_v9 = vpop.f32.mrf.mxu0 }
 0x3a6   :  { %8304 = vst [vmem:[#allocation33_spill] sm:$0xff] %v7941_v57  ;;  %v7947_v28 = vadd.f32 %v4237_v9, %v7835_v49  ;;  %v4136_v47 = vpop.f32.mrf.mxu1 }
 0x3a7   :  { %8305 = vst [vmem:[#allocation32_spill] sm:$0xff] %v7944_v32  ;;  %v4239_v27 = vpop.f32.mrf.mxu0 }
 0x3a8   :  { %8306 = vst [vmem:[#allocation23_spill] sm:$0xff] %v7947_v28  ;;  %v7950_v42 = vadd.f32 %v4239_v27, %v7840_v52  ;;  %v4138_v15 = vpop.f32.mrf.mxu1  ;;  %v8004_v28 = vpop.permute.xlu1 %4773 }
 0x3a9   :  { %v7953_v53 = vadd.f32 %v4138_v15, %v7784_v40  ;;  %v4243_v48 = vpop.f32.mrf.mxu0 }
 0x3aa   :  { %8307 = vst [vmem:[#allocation34_spill] sm:$0xff] %v7950_v42  ;;  %v7956_v17 = vadd.f32 %v4243_v48, %v7848_v2  ;;  %v4142_v51 = vpop.f32.mrf.mxu1 }
 0x3ab   :  { %8308 = vst [vmem:[#allocation24_spill] sm:$0xff] %v7953_v53  ;;  %v4245_v31 = vpop.f32.mrf.mxu0 }
 0x3ac   :  { %8309 = vst [vmem:[#allocation35_spill] sm:$0xff] %v7956_v17  ;;  %v7959_v25 = vadd.f32 %v4245_v31, %v7853_v5  ;;  %v7961_v49 = vpop.f32.mrf.mxu1 }
 0x3ad   :  { %8311 = vst [vmem:[#allocation37_spill] sm:$0xff] %v7961_v49  ;;  %v7963_v9 = vpop.f32.mrf.mxu0 }
 0x3ae   :  { %8310 = vst [vmem:[#allocation36_spill] sm:$0xff] %v7959_v25  ;;  %8312 = vst [vmem:[#allocation38_spill] sm:$0xff] %v7963_v9  ;;  %v7965_v4 = vpop.f32.mrf.mxu1  ;;  %v8020_v9 = vpop.permute.xlu1 %4763 }
 0x3af   :  { %8313 = vst [vmem:[#allocation39_spill] sm:$0xff] %v7965_v4  ;;  %v4251_v52 = vpop.f32.mrf.mxu0 }
 0x3b0   :  { %v7968_v27 = vadd.f32 %v4251_v52, %v7866_v18  ;;  %v7970_v40 = vpop.f32.mrf.mxu1 }
 0x3b1   :  { %v7972_v15 = vpop.f32.mrf.mxu0 }
 0x3b2   :  { %8314 = vst [vmem:[#allocation40_spill] sm:$0xff] %v7968_v27  ;;  %8315 = vst [vmem:[#allocation41_spill] sm:$0xff] %v7972_v15  ;;  %v7974_v2 = vpop.f32.mrf.mxu1 }
 0x3b3   :  { %v4257_v48 = vpop.f32.mrf.mxu0 }
 0x3b4   :  { %v7977_v5 = vadd.f32 %v4257_v48, %v7879_v54  ;;  %v7979_v31 = vpop.f32.mrf.mxu1 }
 0x3b5   :  { %v7981_v57 = vpop.f32.mrf.mxu0 }
 0x3b6   :  { %8316 = vst [vmem:[#allocation42_spill] sm:$0xff] %v7977_v5  ;;  %v7983_v42 = vpop.f32.mrf.mxu1 }
 0x3b7   :  { %v4522_v25 = vpop.f32.mrf.mxu0 }
 0x3b8   :  { %v7986_v18 = vadd.f32 %v4522_v25, %v7890_v38  ;;  %v4421_v52 = vpop.f32.mrf.mxu1 }
 0x3b9   :  { %v7988_v27 = vpop.f32.mrf.mxu0 }
 0x3ba   :  { %8317 = vst [vmem:[#allocation43_spill] sm:$0xff] %v7986_v18  ;;  %v7990_v29 = vpop.f32.mrf.mxu1 }
 0x3bb   :  { %v4528_v23 = vpop.f32.mrf.mxu0 }
 0x3bc   :  { %v7992_v1 = vadd.f32 %v4528_v23, %v4269_v46  ;;  %v4427_v54 = vpop.f32.mrf.mxu1  ;;  %v8010_v23 = vpop.permute.xlu0 %4768 }
 0x3bd   :  { %v7994_v48 = vpop.f32.mrf.mxu0 }
 0x3be   :  { %8318 = vst [vmem:[#allocation44_spill] sm:$0xff] %v7992_v1  ;;  %v7996_v5 = vpop.f32.mrf.mxu1 }
 0x3bf   :  { %v7998_v3 = vpop.f32.mrf.mxu0 }
 0x3c0   :  { %8319 = vst [vmem:[#allocation45_spill] sm:$0xff] %v7998_v3  ;;  %v4433_v58 = vpop.f32.mrf.mxu1  ;;  %v4297_v3 = vadd.f32 %v7887_v62, %v7758_v20  ;;  %v8023_v49 = vpop.permute.xlu0 %4758  ;;  %v4298_v20 = vadd.f32 %v4136_v47, %v7777_v41 }
 0x3c1   :  { %v4538_v35 = vpop.f32.mrf.mxu0  ;;  %v4705_v39 = vadd.f32 %v4433_v58, %v7864_v55 }
 0x3c2   :  { %v8000_v56 = vpop.f32.mrf.mxu1 }
 0x3c3   :  { %v8002_v38 = vpop.f32.mrf.mxu0 }
 0x3c4   :  { %8320 = vst [vmem:[#allocation46_spill] sm:$0xff] %v8002_v38  ;;  %v4439_v25 = vpop.f32.mrf.mxu1  ;;  %v4303_v38 = vadd.f32 %v7898_v44, %v7772_v14 }
 0x3c5   :  { %v4544_v18 = vpop.f32.mrf.mxu0 }
 0x3c6   :  { %v8006_v32 = vpop.f32.mrf.mxu1 }
 0x3c7   :  { %v8008_v46 = vpop.f32.mrf.mxu0 }
 0x3c8   :  { %8321 = vst [vmem:[#allocation47_spill] sm:$0xff] %v8008_v46  ;;  %v4445_v1 = vpop.f32.mrf.mxu1  ;;  %v4711_v46 = vadd.f32 %v4439_v25, %v7877_v61  ;;  %v4699_v25 = vadd.f32 %v4427_v54, %v7851_v45 }
 0x3c9   :  { %v4550_v17 = vpop.f32.mrf.mxu0  ;;  %v4717_v15 = vadd.f32 %v4445_v1, %v4297_v3  ;;  %v4292_v3 = vadd.f32 %v7938_v22, %v7763_v13 }
 0x3ca   :  { %v8014_v53 = vpop.f32.mrf.mxu1  ;;  %v4807_v41 = vadd.f32 %v8020_v9, %v4711_v46 }
 0x3cb   :  { %v8018_v7 = vpop.f32.mrf.mxu0  ;;  %v4813_v14 = vadd.f32 %v8010_v23, %v4717_v15  ;;  %v8041_v15 = vpop.permute.xlu1 %4753 }
 0x3cc   :  { %v4451_v11 = vpop.f32.mrf.mxu1 }
 0x3cd   :  { %v4723_v4 = vadd.f32 %v4451_v11, %v4303_v38  ;;  %v4556_v24 = vpop.f32.mrf.mxu0  ;;  %v4304_v11 = vadd.f32 %v4142_v51, %v7791_v63  ;;  %v4693_v63 = vadd.f32 %v4421_v52, %v7838_v0  ;;  %v4861_v45 = vmax.f32 %v4813_v14, 0.0  ;;  %v8049_v51 = vpop.permute.xlu0 %4748 }
 0x3ce   :  { %v8026_v62 = vpop.f32.mrf.mxu1  ;;  %v4718_v61 = vadd.f32 %v4556_v24, %v4298_v20  ;;  %v4801_v24 = vadd.f32 %v8023_v49, %v4705_v39  ;;  %v4687_v0 = vadd.f32 %v7979_v31, %v7825_v50  ;;  %v4795_v39 = vadd.f32 %v8041_v15, %v4699_v25 }
 0x3cf   :  { %8322 = vst [vmem:[#allocation48_spill] sm:$0xff] %v8026_v62  ;;  %v4819_v44 = vadd.f32 %v8004_v28, %v4723_v4  ;;  %v8031_v1 = vpop.f32.mrf.mxu0  ;;  %v4286_v4 = vadd.f32 %v7927_v6, %v7749_v59  ;;  %v4712_v62 = vadd.f32 %v4550_v17, %v4292_v3  ;;  %v4855_v17 = vmax.f32 %v4807_v41, 0.0  ;;  %v8066_v3 = vpop.permute.xlu1 %4743 }
 0x3d0   :  { %v4635_v38 = vpop.f32.mrf.mxu1  ;;  %v4814_v46 = vadd.f32 %v8010_v23, %v4718_v61  ;;  %v4694_v50 = vadd.f32 %v7994_v48, %v7905_v10  ;;  %v4843_v61 = vmax.f32 %v4795_v39, 0.0 }
 0x3d1   :  { %v4867_v47 = vmax.f32 %v4819_v44, 0.0  ;;  %v8039_v55 = vadd.f32 %v4635_v38, %v7908_v33  ;;  %v4562_v58 = vpop.f32.mrf.mxu0  ;;  %v4280_v33 = vadd.f32 %v7916_v8, %v7734_v30  ;;  %v4706_v54 = vadd.f32 %v4544_v18, %v4286_v4 }
 0x3d2   :  { %v4724_v13 = vadd.f32 %v4562_v58, %v4304_v11  ;;  %v8045_v22 = vpop.f32.mrf.mxu1  ;;  %v4808_v20 = vadd.f32 %v8020_v9, %v4712_v62  ;;  %v4681_v8 = vadd.f32 %v7970_v40, %v7812_v34  ;;  %v4789_v18 = vadd.f32 %v8049_v51, %v4693_v63  ;;  %v8076_v40 = vpop.permute.xlu0 %4738 }
 0x3d3   :  { %6232 = vmatprep.subr.mxu0 %v4867_v47  ;;  %v4700_v52 = vadd.f32 %v4538_v35, %v4280_v33  ;;  %v4849_v44 = vmax.f32 %v4801_v24, 0.0  ;;  %v4802_v35 = vadd.f32 %v8023_v49, %v4706_v54  ;;  %v4862_v31 = vmax.f32 %v4814_v46, 0.0 }
 0x3d4   :  { %v4820_v59 = vadd.f32 %v8004_v28, %v4724_v13  ;;  %v8055_v6 = vpop.f32.mrf.mxu1  ;;  %6233 = vmatpush3.msra.mxu0 %v4867_v47  ;;  %v4783_v11 = vadd.f32 %v8066_v3, %v4687_v0  ;;  %v4722_v34 = vadd.f32 %v8014_v53, %v7893_v12  ;;  %v4856_v10 = vmax.f32 %v4808_v20, 0.0 }
 0x3d5   :  { %6234 = vmatprep.subr.mxu0 %v4861_v45  ;;  %v4796_v38 = vadd.f32 %v8041_v15, %v4700_v52  ;;  %v4777_v25 = vadd.f32 %v8076_v40, %v4681_v8  ;;  %v4837_v41 = vmax.f32 %v4789_v18, 0.0  ;;  %v4688_v47 = vadd.f32 %v7988_v27, %v7896_v16 }
 0x3d6   :  { %v4868_v14 = vmax.f32 %v4820_v59, 0.0  ;;  %v8061_v30 = vpop.f32.mrf.mxu1  ;;  %6235 = vmatpush3.msra.mxu0 %v4861_v45  ;;  %v4716_v12 = vadd.f32 %v8006_v32, %v7882_v60  ;;  %v4790_v53 = vadd.f32 %v8049_v51, %v4694_v50  ;;  %v4850_v58 = vmax.f32 %v4802_v35, 0.0  ;;  %v8323_v35 = vld [vmem:[#allocation17_spill] sm:$0xff] }
 0x3d7   :  { %6236 = vmatprep.subr.mxu0 %v4855_v17  ;;  %v4831_v13 = vmax.f32 %v4783_v11, 0.0  ;;  %v4682_v63 = vadd.f32 %v7981_v57, %v7885_v26  ;;  %v4818_v24 = vadd.f32 %v8004_v28, %v4722_v34  ;;  %v4844_v16 = vmax.f32 %v4796_v38, 0.0  ;;  %v8326_v34 = vld [vmem:[#allocation39_spill] sm:$0xff] }
 0x3d8   :  { %v8071_v62 = vpop.f32.mrf.mxu1  ;;  %6237 = vmatpush3.msra.mxu0 %v4855_v17  ;;  %6288 = vmatprep.subr.mxu1 %v4868_v14  ;;  %v4710_v60 = vadd.f32 %v8000_v56, %v7869_v37  ;;  %v4825_v27 = vmax.f32 %v4777_v25, 0.0  ;;  %v4784_v45 = vadd.f32 %v8066_v3, %v4688_v47  ;;  %v4812_v33 = vadd.f32 %v8010_v23, %v4716_v12  ;;  %v4882_v37 = vld [vmem:[#allocation8 + $0x48] sm:$0xff] }
 0x3d9   :  { %6238 = vmatprep.subr.mxu0 %v4849_v44  ;;  %6289 = vmatpush3.msra.mxu1 %v4868_v14  ;;  %v4838_v26 = vmax.f32 %v4790_v53, 0.0  ;;  %v4704_v57 = vadd.f32 %v7996_v5, %v7856_v43  ;;  %v4778_v56 = vadd.f32 %v8076_v40, %v4682_v63  ;;  %v4866_v46 = vmax.f32 %v4818_v24, 0.0  ;;  %v4883_v5 = vld [vmem:[#allocation8 + $0x50] sm:$0xff]  ;;  %v5150_v25 = vld [vmem:[#allocation8 + $0x88] sm:$0xff]  ;;  %v8329_v53 = vld [vmem:[#allocation25_spill] sm:$0xff] }
 0x3da   :  { %v8079_v48 = vpop.f32.mrf.mxu1  ;;  %6239 = vmatpush3.msra.mxu0 %v4849_v44  ;;  %6290 = vmatprep.subr.mxu1 %v4862_v31  ;;  %v4698_v59 = vadd.f32 %v7990_v29, %v7843_v36  ;;  %v4806_v0 = vadd.f32 %v8020_v9, %v4710_v60  ;;  %v4832_v17 = vmax.f32 %v4784_v45, 0.0  ;;  %v4860_v43 = vmax.f32 %v4812_v33, 0.0  ;;  %v4884_v29 = vld [vmem:[#allocation8 + $0x58] sm:$0xff]  ;;  %v8328_v47 = vld [vmem:[#allocation38_spill] sm:$0xff]  ;;  %v4887_v45 = vld [vmem:[#allocation8 + $0x70] sm:$0xff] }
 0x3db   :  { %6240 = vmatprep.subr.mxu0 %v4843_v61  ;;  %6291 = vmatpush3.msra.mxu1 %v4862_v31  ;;  %v4692_v52 = vadd.f32 %v7983_v42, %v7830_v21  ;;  %v4800_v20 = vadd.f32 %v8023_v49, %v4704_v57  ;;  %v4826_v36 = vmax.f32 %v4778_v56, 0.0  ;;  %v4686_v8 = vadd.f32 %v7974_v2, %v7817_v19  ;;  %v4564_v21 = vpop.f32.mrf.mxu0  ;;  %v4885_v42 = vld [vmem:[#allocation8 + $0x60] sm:$0xff]  ;;  %v4886_v63 = vld [vmem:[#allocation8 + $0x68] sm:$0xff]  ;;  %v5151_v57 = vld [vmem:[#allocation8 + $0x90] sm:$0xff] }
 0x3dc   :  { %v8087_v4 = vpop.f32.mrf.mxu1  ;;  %6241 = vmatpush3.msra.mxu0 %v4843_v61  ;;  %6292 = vmatprep.subr.mxu1 %v4856_v10  ;;  %v4794_v18 = vadd.f32 %v8041_v15, %v4698_v59  ;;  %v4854_v44 = vmax.f32 %v4806_v0, 0.0  ;;  %v8324_v31 = vld [vmem:[#allocation37_spill] sm:$0xff]  ;;  %v8325_v61 = vld [vmem:[#allocation18_spill] sm:$0xff]  ;;  %v5152_v0 = vld [vmem:[#allocation8 + $0x98] sm:$0xff] }
 0x3dd   :  { %6242 = vmatprep.subr.mxu0 %v4837_v41  ;;  %6293 = vmatpush3.msra.mxu1 %v4856_v10  ;;  %v4305_v11 = vadd.f32 %v8324_v31, %v8323_v35  ;;  %v4680_v38 = vadd.f32 %v8326_v34, %v8325_v61  ;;  %v4788_v10 = vadd.f32 %v8049_v51, %v4692_v52  ;;  %v4848_v19 = vmax.f32 %v4800_v20, 0.0  ;;  %v4888_v52 = vld [vmem:[#allocation8 + $0x78] sm:$0xff]  ;;  %v8335_v35 = vld [vmem:[#allocation31_spill] sm:$0xff]  ;;  %v4873_v61 = vld [vmem:[#allocation8 + $0x8] sm:$0xff] }
 0x3de   :  { %v8094_v32 = vpop.f32.mrf.mxu1  ;;  %6243 = vmatpush3.msra.mxu0 %v4837_v41  ;;  %6294 = vmatprep.subr.mxu1 %v4850_v58  ;;  %v8327_v41 = vld [vmem:[#allocation26_spill] sm:$0xff]  ;;  %v4782_v24 = vadd.f32 %v8066_v3, %v4686_v8  ;;  %v8336_v31 = vld [vmem:[#allocation47_spill] sm:$0xff] }
 0x3df   :  { %6244 = vmatprep.subr.mxu0 %v4831_v13  ;;  %6295 = vmatpush3.msra.mxu1 %v4850_v58  ;;  %v4300_v12 = vadd.f32 %v8328_v47, %v8327_v41  ;;  %v8330_v58 = vld [vmem:[#allocation41_spill] sm:$0xff]  ;;  %v4725_v60 = vadd.f32 %v4564_v21, %v4305_v11  ;;  %v4836_v56 = vmax.f32 %v4788_v10, 0.0  ;;  %v8334_v21 = vld [vmem:[#allocation23_spill] sm:$0xff]  ;;  %v4707_v11 = vadd.f32 %v8336_v31, %v8335_v35  ;;  %v8339_v41 = vld [vmem:[#allocation46_spill] sm:$0xff] }
 0x3e0   :  { %v8100_v54 = vpop.f32.mrf.mxu1  ;;  %6245 = vmatpush3.msra.mxu0 %v4831_v13  ;;  %6296 = vmatprep.subr.mxu1 %v4844_v16  ;;  %v4306_v13 = vadd.f32 %v8330_v58, %v8329_v53  ;;  %v4830_v20 = vmax.f32 %v4782_v24, 0.0  ;;  %v4874_v58 = vld [vmem:[#allocation8 + $0x10] sm:$0xff]  ;;  %v8347_v35 = vld [vmem:[#allocation42_spill] sm:$0xff] }
 0x3e1   :  { %6246 = vmatprep.subr.mxu0 %v4825_v27  ;;  %6297 = vmatpush3.msra.mxu1 %v4844_v16  ;;  %v4842_v16 = vmax.f32 %v4794_v18, 0.0 }
 0x3e2   :  { %v4663_v39 = vpop.f32.mrf.mxu1  ;;  %6247 = vmatpush3.msra.mxu0 %v4825_v27  ;;  %6298 = vmatprep.subr.mxu1 %v4838_v26 }
 0x3e3   :  { %6249 = vmatmul.mubr.msk.f32.vlgmr.msra.gmra.mxu0 %vm4889_vm2, %v4882_v37  ;;  %6260 = vmatprep.subr.mxu0 %v4866_v46  ;;  %v4776_v37 = vadd.f32 %v8076_v40, %v4680_v38  ;;  %v8337_v38 = vld [vmem:[#allocation22_spill] sm:$0xff] }
 0x3e4   :  { %6299 = vmatpush3.msra.mxu1 %v4838_v26  ;;  %v8110_v14 = vpop.f32.mrf.mxu1  ;;  %6261 = vmatpush3.msra.mxu0 %v4866_v46  ;;  %v8331_v46 = vld [vmem:[#allocation24_spill] sm:$0xff]  ;;  %v4702_v10 = vadd.f32 %v8079_v48, %v8337_v38  ;;  %v4803_v48 = vadd.f32 %v8023_v49, %v4707_v11  ;;  %v4878_v11 = vld [vmem:[#allocation8 + $0x30] sm:$0xff] }
 0x3e5   :  { %6300 = vmatprep.subr.mxu1 %v4832_v17  ;;  %6262 = vmatprep.subr.mxu0 %v4860_v43  ;;  %v4719_v59 = vadd.f32 %v8031_v1, %v8331_v46  ;;  %v8349_v38 = vld [vmem:[#allocation40_spill] sm:$0xff] }
 0x3e6   :  { %6301 = vmatpush3.msra.mxu1 %v4832_v17  ;;  %v4669_v50 = vpop.f32.mrf.mxu1  ;;  %6251 = vmatprep.mubr.msk.f32.mxu0 %vm4889_vm2, %v4883_v5  ;;  %v8332_v17 = vld [vmem:[#allocation35_spill] sm:$0xff]  ;;  %v4851_v46 = vmax.f32 %v4803_v48, 0.0  ;;  %v8351_v48 = vld [vmem:[#allocation34_spill] sm:$0xff] }
 0x3e7   :  { %6263 = vmatpush3.msra.mxu0 %v4860_v43  ;;  %6302 = vmatprep.subr.mxu1 %v4826_v36  ;;  %v4720_v33 = vadd.f32 %v4669_v50, %v4300_v12  ;;  %v4714_v43 = vadd.f32 %v4663_v39, %v8332_v17  ;;  %v4872_v39 = vld [vmem:[#allocation8] sm:$0xff]  ;;  %v4815_v50 = vadd.f32 %v8010_v23, %v4719_v59 }
 0x3e8   :  { %6252 = vmatmul.mubr.msk.f32.gmra.mxu0 %vm4889_vm2, %v4884_v29  ;;  %6264 = vmatprep.subr.mxu0 %v4854_v44  ;;  %v8122_v2 = vpop.f32.mrf.mxu1  ;;  %v8333_v29 = vld [vmem:[#allocation32_spill] sm:$0xff] }
 0x3e9   :  { %6303 = vmatpush3.msra.mxu1 %v4826_v36  ;;  %6265 = vmatpush3.msra.mxu0 %v4854_v44  ;;  %v4821_v36 = vadd.f32 %v8004_v28, %v4725_v60  ;;  %v4713_v1 = vadd.f32 %v8018_v7, %v8333_v29  ;;  %v4816_v8 = vadd.f32 %v8010_v23, %v4720_v33  ;;  %v4824_v44 = vmax.f32 %v4776_v37, 0.0  ;;  %v4875_v60 = vld [vmem:[#allocation8 + $0x18] sm:$0xff]  ;;  %v8343_v37 = vld [vmem:[#allocation27_spill] sm:$0xff] }
 0x3ea   :  { %6266 = vmatprep.subr.mxu0 %v4848_v19  ;;  %v4675_v27 = vpop.f32.mrf.mxu1  ;;  %6254 = vmatprep.mubr.msk.f32.mxu0 %vm4889_vm2, %v4885_v42  ;;  %v4708_v42 = vadd.f32 %v8094_v32, %v8334_v21  ;;  %v4810_v7 = vadd.f32 %v8020_v9, %v4714_v43  ;;  %v4863_v12 = vmax.f32 %v4815_v50, 0.0  ;;  %v5154_v50 = vld [vmem:[#allocation8 + $0xa8] sm:$0xff] }
 0x3eb   :  { %v4726_v26 = vadd.f32 %v4675_v27, %v4306_v13  ;;  %6267 = vmatpush3.msra.mxu0 %v4848_v19  ;;  %6305 = vmatmul.mubr.msk.f32.vlgmr.msra.gmra.mxu1 %vm4889_vm2, %v5150_v25  ;;  %v4869_v34 = vmax.f32 %v4821_v36, 0.0  ;;  %v4809_v32 = vadd.f32 %v8020_v9, %v4713_v1  ;;  %v4864_v19 = vmax.f32 %v4816_v8, 0.0  ;;  %v8338_v25 = vld [vmem:[#allocation30_spill] sm:$0xff]  ;;  %v8340_v13 = vld [vmem:[#allocation29_spill] sm:$0xff]  ;;  %v8341_v27 = vld [vmem:[#allocation28_spill] sm:$0xff] }
 0x3ec   :  { %6255 = vmatmul.mubr.msk.f32.gmra.mxu0 %vm4889_vm2, %v4886_v63  ;;  %6268 = vmatprep.subr.mxu0 %v4842_v16  ;;  %v4701_v47 = vadd.f32 %v8339_v41, %v8338_v25  ;;  %v4804_v53 = vadd.f32 %v8023_v49, %v4708_v42  ;;  %v4696_v63 = vadd.f32 %v8061_v30, %v8340_v13  ;;  %v4858_v24 = vmax.f32 %v4810_v7, 0.0  ;;  %v4677_v1 = vpop.f32.mrf.mxu1  ;;  %v5153_v8 = vld [vmem:[#allocation8 + $0xa0] sm:$0xff]  ;;  %v5155_v25 = vld [vmem:[#allocation8 + $0xb0] sm:$0xff] }
 0x3ed   :  { %v4822_v5 = vadd.f32 %v8004_v28, %v4726_v26  ;;  %6269 = vmatpush3.msra.mxu0 %v4842_v16  ;;  %6257 = vmatprep.mubr.msk.f32.mxu0 %vm4889_vm2, %v4887_v45  ;;  %v4798_v16 = vadd.f32 %v8041_v15, %v4702_v10  ;;  %v8342_v45 = vld [vmem:[#allocation45_spill] sm:$0xff]  ;;  %v4857_v26 = vmax.f32 %v4809_v32, 0.0  ;;  %v4690_v30 = vadd.f32 %v8045_v22, %v8343_v37  ;;  %v4877_v22 = vld [vmem:[#allocation8 + $0x28] sm:$0xff]  ;;  %v4879_v32 = vld [vmem:[#allocation8 + $0x38] sm:$0xff] }
 0x3ee   :  { %6270 = vmatprep.subr.mxu0 %v4836_v56  ;;  %6307 = vmatprep.mubr.msk.f32.mxu1 %vm4889_vm2, %v5151_v57  ;;  %v4695_v33 = vadd.f32 %v8342_v45, %v8341_v27  ;;  %v4797_v57 = vadd.f32 %v8041_v15, %v4701_v47  ;;  %v4792_v59 = vadd.f32 %v8049_v51, %v4696_v63  ;;  %v8350_v47 = vld [vmem:[#allocation36_spill] sm:$0xff]  ;;  %v5441_v45 = vld [vmem:[#allocation8 + $0x100] sm:$0xff] }
 0x3ef   :  { %v4870_v18 = vmax.f32 %v4822_v5, 0.0  ;;  %6271 = vmatpush3.msra.mxu0 %v4836_v56  ;;  %6308 = vmatmul.mubr.msk.f32.gmra.mxu1 %vm4889_vm2, %v5152_v0  ;;  %v4852_v56 = vmax.f32 %v4804_v53, 0.0  ;;  %v4876_v0 = vld [vmem:[#allocation8 + $0x20] sm:$0xff]  ;;  %v4846_v17 = vmax.f32 %v4798_v16, 0.0  ;;  %v8344_v5 = vld [vmem:[#allocation19_spill] sm:$0xff]  ;;  %v4786_v29 = vadd.f32 %v8066_v3, %v4690_v30  ;;  %v8354_v37 = vld [vmem:[#allocation20_spill] sm:$0xff] }
 0x3f0   :  { %6258 = vmatmul.mubr.msk.f32.gmra.mxu0 %vm4889_vm2, %v4888_v52  ;;  %6272 = vmatprep.subr.mxu0 %v4830_v20  ;;  %v4791_v43 = vadd.f32 %v8049_v51, %v4695_v33  ;;  %v8345_v52 = vld [vmem:[#allocation48_spill] sm:$0xff]  ;;  %v4845_v36 = vmax.f32 %v4797_v57, 0.0  ;;  %v4727_v31 = vadd.f32 %v4677_v1, %v8347_v35  ;;  %v4721_v10 = vadd.f32 %v8122_v2, %v8349_v38 }
 0x3f1   :  { %6273 = vmatpush3.msra.mxu0 %v4830_v20  ;;  %6344 = vmatprep.subr.mxu1 %v4870_v18  ;;  %v4684_v20 = vadd.f32 %v8345_v52, %v8344_v5  ;;  %v4834_v7 = vmax.f32 %v4786_v29, 0.0  ;;  %v5156_v2 = vld [vmem:[#allocation8 + $0xb8] sm:$0xff]  ;;  %v4709_v13 = vadd.f32 %v8100_v54, %v8351_v48  ;;  %v8353_v54 = vld [vmem:[#allocation21_spill] sm:$0xff]  ;;  %v4691_v30 = vadd.f32 %v8055_v6, %v8354_v37  ;;  %v5447_v29 = vld [vmem:[#allocation8 + $0x130] sm:$0xff] }
 0x3f2   :  { %6274 = vmatprep.subr.mxu0 %v4824_v44  ;;  %6276 = vmatprep.mubr.msk.f32.mxu0 %vm4889_vm2, %v4872_v39  ;;  %v8346_v39 = vld [vmem:[#allocation44_spill] sm:$0xff]  ;;  %v4839_v21 = vmax.f32 %v4791_v43, 0.0  ;;  %v4823_v53 = vadd.f32 %v8004_v28, %v4727_v31  ;;  %v4817_v63 = vadd.f32 %v8010_v23, %v4721_v10  ;;  %v8352_v28 = vld [vmem:[#allocation33_spill] sm:$0xff]  ;;  %v5442_v23 = vld [vmem:[#allocation8 + $0x108] sm:$0xff]  ;;  %v4697_v33 = vadd.f32 %v8071_v62, %v8353_v54 }
 0x3f3   :  { %6275 = vmatpush3.msra.mxu0 %v4824_v44  ;;  %6345 = vmatpush3.msra.mxu1 %v4870_v18  ;;  %v4840_v18 = vmax.f32 %v4792_v59, 0.0  ;;  %v4785_v44 = vadd.f32 %v8066_v3, %v8346_v39  ;;  %v4780_v42 = vadd.f32 %v8076_v40, %v4684_v20  ;;  %v4703_v16 = vadd.f32 %v8087_v4, %v8352_v28  ;;  %v5297_v4 = vld [vmem:[#allocation8 + $0xd0] sm:$0xff]  ;;  %v5445_v5 = vld [vmem:[#allocation8 + $0x120] sm:$0xff]  ;;  %v5448_v1 = vld [vmem:[#allocation8 + $0x138] sm:$0xff]  ;;  %v5748_v28 = vpop.permute.xlu0 %5747 }
 0x3f4   :  { %6277 = vmatmul.mubr.msk.f32.vlgmr.msra.gmra.mxu0 %vm4889_vm2, %v4873_v61  ;;  %6316 = vmatprep.subr.mxu0 %v4869_v34  ;;  %v8348_v61 = vld [vmem:[#allocation43_spill] sm:$0xff]  ;;  %v4871_v27 = vmax.f32 %v4823_v53, 0.0  ;;  %v4865_v57 = vmax.f32 %v4817_v63, 0.0  ;;  %v4793_v59 = vadd.f32 %v8049_v51, %v4697_v33  ;;  %v4787_v6 = vadd.f32 %v8066_v3, %v4691_v30  ;;  %v5446_v51 = vld [vmem:[#allocation8 + $0x128] sm:$0xff]  ;;  %v5302_v3 = vld [vmem:[#allocation8 + $0xf8] sm:$0xff]  ;;  %v5743_v63 = vpop.permute.xlu1 %5742 }
 0x3f5   :  { %6346 = vmatprep.subr.mxu1 %v4864_v19  ;;  %6317 = vmatpush3.msra.mxu0 %v4869_v34  ;;  %v4779_v34 = vadd.f32 %v8076_v40, %v8348_v61  ;;  %v4828_v41 = vmax.f32 %v4780_v42, 0.0  ;;  %v5443_v62 = vld [vmem:[#allocation8 + $0x110] sm:$0xff]  ;;  %v4781_v52 = vadd.f32 %v8076_v40, %v8039_v55  ;;  %v5587_v55 = vld [vmem:[#allocation8 + $0x140] sm:$0xff]  ;;  %v5588_v40 = vld [vmem:[#allocation8 + $0x148] sm:$0xff] }
 0x3f6   :  { %6347 = vmatpush3.msra.mxu1 %v4864_v19  ;;  %6318 = vmatprep.subr.mxu0 %v4863_v12  ;;  %v4833_v19 = vmax.f32 %v4785_v44, 0.0  ;;  %v4841_v20 = vmax.f32 %v4793_v59, 0.0  ;;  %v5590_v39 = vld [vmem:[#allocation8 + $0x158] sm:$0xff]  ;;  %v5591_v44 = vld [vmem:[#allocation8 + $0x160] sm:$0xff] }
 0x3f7   :  { %6348 = vmatprep.subr.mxu1 %v4858_v24  ;;  %6279 = vmatprep.mubr.msk.f32.mxu0 %vm4889_vm2, %v4874_v58  ;;  %v4827_v58 = vmax.f32 %v4779_v34, 0.0  ;;  %v5594_v42 = vld [vmem:[#allocation8 + $0x178] sm:$0xff] }
 0x3f8   :  { %6319 = vmatpush3.msra.mxu0 %v4863_v12  ;;  %6349 = vmatpush3.msra.mxu1 %v4858_v24  ;;  %v4715_v12 = vadd.f32 %v8110_v14, %v8350_v47  ;;  %v5295_v24 = vld [vmem:[#allocation8 + $0xc0] sm:$0xff]  ;;  %v5296_v14 = vld [vmem:[#allocation8 + $0xc8] sm:$0xff] }
 0x3f9   :  { %6280 = vmatmul.mubr.msk.f32.gmra.mxu0 %vm4889_vm2, %v4875_v60  ;;  %6320 = vmatprep.subr.mxu0 %v4857_v26 }
 0x3fa   :  { %6350 = vmatprep.subr.mxu1 %v4852_v56  ;;  %6321 = vmatpush3.msra.mxu0 %v4857_v26  ;;  %v4811_v60 = vadd.f32 %v8020_v9, %v4715_v12  ;;  %v4805_v26 = vadd.f32 %v8023_v49, %v4709_v13  ;;  %v5298_v9 = vld [vmem:[#allocation8 + $0xd8] sm:$0xff] }
 0x3fb   :  { %6351 = vmatpush3.msra.mxu1 %v4852_v56  ;;  %6322 = vmatprep.subr.mxu0 %v4851_v46  ;;  %v4799_v56 = vadd.f32 %v8041_v15, %v4703_v16  ;;  %v5444_v49 = vld [vmem:[#allocation8 + $0x118] sm:$0xff]  ;;  %v5300_v15 = vld [vmem:[#allocation8 + $0xe8] sm:$0xff] }
 0x3fc   :  { %6352 = vmatprep.subr.mxu1 %v4846_v17  ;;  %6282 = vmatprep.mubr.msk.f32.mxu0 %vm4889_vm2, %v4876_v0  ;;  %v4853_v0 = vmax.f32 %v4805_v26, 0.0  ;;  %v5758_v26 = vpop.permute.xlu0 %5757 }
 0x3fd   :  { %6323 = vmatpush3.msra.mxu0 %v4851_v46  ;;  %6353 = vmatpush3.msra.mxu1 %v4846_v17  ;;  %v4859_v46 = vmax.f32 %v4811_v60, 0.0  ;;  %v5299_v17 = vld [vmem:[#allocation8 + $0xe0] sm:$0xff]  ;;  %v4847_v43 = vmax.f32 %v4799_v56, 0.0 }
 0x3fe   :  { %6283 = vmatmul.mubr.msk.f32.gmra.mxu0 %vm4889_vm2, %v4877_v22  ;;  %6324 = vmatprep.subr.mxu0 %v4845_v36  ;;  %v5301_v22 = vld [vmem:[#allocation8 + $0xf0] sm:$0xff] }
 0x3ff   :  { %6354 = vmatprep.subr.mxu1 %v4840_v18  ;;  %6310 = vmatprep.mubr.msk.f32.mxu1 %vm4889_vm2, %v5153_v8  ;;  %v4829_v8 = vmax.f32 %v4781_v52, 0.0 }
 0x400   :  { %6325 = vmatpush3.msra.mxu0 %v4845_v36  ;;  %6355 = vmatpush3.msra.mxu1 %v4840_v18  ;;  %v4835_v36 = vmax.f32 %v4787_v6, 0.0  ;;  %v5589_v18 = vld [vmem:[#allocation8 + $0x150] sm:$0xff] }
 0x401   :  { %6311 = vmatmul.mubr.msk.f32.gmra.mxu1 %vm4889_vm2, %v5154_v50  ;;  %6326 = vmatprep.subr.mxu0 %v4839_v21  ;;  %v5592_v50 = vld [vmem:[#allocation8 + $0x168] sm:$0xff] }
 0x402   :  { %6356 = vmatprep.subr.mxu1 %v4834_v7  ;;  %6285 = vmatprep.mubr.msk.f32.mxu0 %vm4889_vm2, %v4878_v11 }
 0x403   :  { %6327 = vmatpush3.msra.mxu0 %v4839_v21  ;;  %6357 = vmatpush3.msra.mxu1 %v4834_v7  ;;  %v5593_v21 = vld [vmem:[#allocation8 + $0x170] sm:$0xff] }
 0x404   :  { %6286 = vmatmul.mubr.msk.f32.gmra.mxu0 %vm4889_vm2, %v4879_v32  ;;  %6328 = vmatprep.subr.mxu0 %v4833_v19 }
 0x405   :  { %6358 = vmatprep.subr.mxu1 %v4828_v41  ;;  %6313 = vmatprep.mubr.msk.f32.mxu1 %vm4889_vm2, %v5155_v25 }
 0x406   :  { %6329 = vmatpush3.msra.mxu0 %v4833_v19  ;;  %6359 = vmatpush3.msra.mxu1 %v4828_v41 }
 0x407   :  { %6314 = vmatmul.mubr.msk.f32.gmra.mxu1 %vm4889_vm2, %v5156_v2  ;;  %6330 = vmatprep.subr.mxu0 %v4827_v58 }
 0x408   :  { %6331 = vmatpush3.msra.mxu0 %v4827_v58  ;;  %6332 = vmatprep.mubr.msk.f32.mxu0 %vm4889_vm2, %v5295_v24 }
 0x409   :  { %6333 = vmatmul.mubr.msk.f32.vlgmr.msra.gmra.mxu0 %vm4889_vm2, %v5296_v14  ;;  %6372 = vmatprep.subr.mxu0 %v4871_v27 }
 0x40a   :  { %6360 = vmatprep.mubr.msk.f32.mxu1 %vm4889_vm2, %v5441_v45  ;;  %6373 = vmatpush3.msra.mxu0 %v4871_v27  ;;  %v8234_v27 = vpop.permute.xlu1 %5752 }
 0x40b   :  { %6361 = vmatmul.mubr.msk.f32.vlgmr.msra.gmra.mxu1 %vm4889_vm2, %v5442_v23  ;;  %6374 = vmatprep.subr.mxu0 %v4865_v57 }
 0x40c   :  { %6335 = vmatprep.mubr.msk.f32.mxu0 %vm4889_vm2, %v5297_v4  ;;  %6375 = vmatpush3.msra.mxu0 %v4865_v57 }
 0x40d   :  { %6336 = vmatmul.mubr.msk.f32.gmra.mxu0 %vm4889_vm2, %v5298_v9  ;;  %6376 = vmatprep.subr.mxu0 %v4859_v46 }
 0x40e   :  { %6363 = vmatprep.mubr.msk.f32.mxu1 %vm4889_vm2, %v5443_v62  ;;  %6377 = vmatpush3.msra.mxu0 %v4859_v46  ;;  %v5807_v9 = vpop.permute.xlu1 %5806 }
 0x40f   :  { %6364 = vmatmul.mubr.msk.f32.gmra.mxu1 %vm4889_vm2, %v5444_v49  ;;  %6378 = vmatprep.subr.mxu0 %v4853_v0  ;;  %v5812_v49 = vpop.permute.xlu0 %5811 }
 0x410   :  { %6338 = vmatprep.mubr.msk.f32.mxu0 %vm4889_vm2, %v5299_v17  ;;  %6379 = vmatpush3.msra.mxu0 %v4853_v0 }
 0x411   :  { %6339 = vmatmul.mubr.msk.f32.gmra.mxu0 %vm4889_vm2, %v5300_v15  ;;  %6380 = vmatprep.subr.mxu0 %v4847_v43 }
 0x412   :  { %6366 = vmatprep.mubr.msk.f32.mxu1 %vm4889_vm2, %v5445_v5  ;;  %6381 = vmatpush3.msra.mxu0 %v4847_v43  ;;  %v8236_v6 = vpop.permute.xlu1 %5762 }
 0x413   :  { %6367 = vmatmul.mubr.msk.f32.gmra.mxu1 %vm4889_vm2, %v5446_v51  ;;  %6382 = vmatprep.subr.mxu0 %v4841_v20 }
 0x414   :  { %6341 = vmatprep.mubr.msk.f32.mxu0 %vm4889_vm2, %v5301_v22  ;;  %6383 = vmatpush3.msra.mxu0 %v4841_v20 }
 0x415   :  { %6342 = vmatmul.mubr.msk.f32.gmra.mxu0 %vm4889_vm2, %v5302_v3  ;;  %6384 = vmatprep.subr.mxu0 %v4835_v36 }
 0x416   :  { %6369 = vmatprep.mubr.msk.f32.mxu1 %vm4889_vm2, %v5447_v29  ;;  %6385 = vmatpush3.msra.mxu0 %v4835_v36 }
 0x417   :  { %6370 = vmatmul.mubr.msk.f32.gmra.mxu1 %vm4889_vm2, %v5448_v1  ;;  %6386 = vmatprep.subr.mxu0 %v4829_v8  ;;  %v5817_v1 = vpop.permute.xlu0 %5816 }
 0x418   :  { %6387 = vmatpush3.msra.mxu0 %v4829_v8  ;;  %6388 = vmatprep.mubr.msk.f32.mxu0 %vm4889_vm2, %v5587_v55 }
 0x419   :  { %6389 = vmatmul.mubr.msk.f32.vlgmr.msra.gmra.mxu0 %vm4889_vm2, %v5588_v40 }
 0x41a   :  { %6391 = vmatprep.mubr.msk.f32.mxu0 %vm4889_vm2, %v5589_v18 }
 0x41d   :  { %6392 = vmatmul.mubr.msk.f32.gmra.mxu0 %vm4889_vm2, %v5590_v39 }
 0x41e   :  { %6394 = vmatprep.mubr.msk.f32.mxu0 %vm4889_vm2, %v5591_v44 }
 0x421   :  { %6395 = vmatmul.mubr.msk.f32.gmra.mxu0 %vm4889_vm2, %v5592_v50 }
 0x422   :  { %6397 = vmatprep.mubr.msk.f32.mxu0 %vm4889_vm2, %v5593_v21  ;;  %v5768_v21 = vpop.permute.xlu1 %5767 }
 0x425   :  { %6398 = vmatmul.mubr.msk.f32.gmra.mxu0 %vm4889_vm2, %v5594_v42 }
 0x4a3   :  { %v6250_v35 = vpop.f32.mrf.mxu0 }
 0x4a5   :  { %v4980_v31 = vpop.f32.mrf.mxu0 }
 0x4a8   :  { %v6253_v11 = vpop.f32.mrf.mxu0 }
 0x4aa   :  { %v4990_v7 = vpop.f32.mrf.mxu0 }
 0x4ab   :  { %v6306_v10 = vpop.f32.mrf.mxu1 }
 0x4ac   :  { %v6256_v61 = vpop.f32.mrf.mxu0 }
 0x4ad   :  { %v5247_v25 = vpop.f32.mrf.mxu1 }
 0x4ae   :  { %v5000_v34 = vpop.f32.mrf.mxu0 }
 0x4af   :  { %v6309_v12 = vpop.f32.mrf.mxu1 }
 0x4b0   :  { %v6259_v38 = vpop.f32.mrf.mxu0 }
 0x4b1   :  { %v5257_v2 = vpop.f32.mrf.mxu1 }
 0x4b2   :  { %v5010_v32 = vpop.f32.mrf.mxu0 }
 0x4b4   :  { %v6278_v19 = vpop.f32.mrf.mxu0 }
 0x4b5   :  { %v5115_v37 = vadd.f32 %v6278_v19, %v6250_v35 }
 0x4b6   :  { %v5109_v41 = vpop.f32.mrf.mxu0 }
 0x4b7   :  { %v5110_v46 = vadd.f32 %v5109_v41, %v4980_v31  ;;  %v5287_v59 = vadd.f32 %v6306_v10, %v5115_v37  ;;  %v5773_v37 = vpop.permute.xlu1 %5772 }
 0x4b9   :  { %v6281_v47 = vpop.f32.mrf.mxu0  ;;  %v5286_v43 = vadd.f32 %v5247_v25, %v5110_v46 }
 0x4ba   :  { %v5125_v0 = vadd.f32 %v6281_v47, %v6253_v11 }
 0x4bb   :  { %v5119_v53 = vpop.f32.mrf.mxu0 }
 0x4bc   :  { %v5120_v5 = vadd.f32 %v5119_v53, %v4990_v7  ;;  %v5289_v22 = vadd.f32 %v6309_v12, %v5125_v0 }
 0x4be   :  { %v6284_v58 = vpop.f32.mrf.mxu0  ;;  %v5288_v8 = vadd.f32 %v5257_v2, %v5120_v5  ;;  %v5822_v2 = vpop.permute.xlu0 %5821 }
 0x4bf   :  { %v5135_v52 = vadd.f32 %v6284_v58, %v6256_v61 }
 0x4c0   :  { %v5129_v48 = vpop.f32.mrf.mxu0 }
 0x4c1   :  { %v6312_v13 = vpop.f32.mrf.mxu1  ;;  %v5130_v18 = vadd.f32 %v5129_v48, %v5000_v34 }
 0x4c2   :  { %v5291_v39 = vadd.f32 %v6312_v13, %v5135_v52 }
 0x4c3   :  { %v5267_v24 = vpop.f32.mrf.mxu1 }
 0x4c4   :  { %v6287_v14 = vpop.f32.mrf.mxu0  ;;  %v5290_v47 = vadd.f32 %v5267_v24, %v5130_v18 }
 0x4c5   :  { %v5145_v44 = vadd.f32 %v6287_v14, %v6259_v38 }
 0x4c6   :  { %v5139_v16 = vpop.f32.mrf.mxu0 }
 0x4c7   :  { %v6315_v60 = vpop.f32.mrf.mxu1  ;;  %v5140_v11 = vadd.f32 %v5139_v16, %v5010_v32 }
 0x4c8   :  { %v5293_v12 = vadd.f32 %v6315_v60, %v5145_v44 }
 0x4c9   :  { %v5277_v45 = vpop.f32.mrf.mxu1  ;;  %v6334_v23 = vpop.f32.mrf.mxu0 }
 0x4ca   :  { %v5433_v51 = vadd.f32 %v6334_v23, %v5287_v59  ;;  %v5292_v38 = vadd.f32 %v5277_v45, %v5140_v11  ;;  %v5827_v45 = vpop.permute.xlu0 %5826 }
 0x4cb   :  { %v5393_v54 = vpop.f32.mrf.mxu0  ;;  %v6362_v33 = vpop.f32.mrf.mxu1 }
 0x4cc   :  { %v5432_v3 = vadd.f32 %v5393_v54, %v5286_v43  ;;  %v5579_v55 = vadd.f32 %v6362_v33, %v5433_v51 }
 0x4cd   :  { %v6337_v57 = vpop.f32.mrf.mxu0  ;;  %v5539_v4 = vpop.f32.mrf.mxu1 }
 0x4ce   :  { %v5435_v40 = vadd.f32 %v6337_v57, %v5289_v22  ;;  %v5578_v42 = vadd.f32 %v5539_v4, %v5432_v3  ;;  %v5778_v3 = vpop.permute.xlu1 %5777 }
 0x4cf   :  { %v5403_v30 = vpop.f32.mrf.mxu0  ;;  %v6365_v56 = vpop.f32.mrf.mxu1 }
 0x4d0   :  { %v5434_v35 = vadd.f32 %v5403_v30, %v5288_v8  ;;  %v5581_v19 = vadd.f32 %v6365_v56, %v5435_v40 }
 0x4d1   :  { %v6340_v62 = vpop.f32.mrf.mxu0  ;;  %v5549_v17 = vpop.f32.mrf.mxu1 }
 0x4d2   :  { %v5437_v7 = vadd.f32 %v6340_v62, %v5291_v39  ;;  %v5580_v58 = vadd.f32 %v5549_v17, %v5434_v35 }
 0x4d3   :  { %v5413_v15 = vpop.f32.mrf.mxu0  ;;  %v6368_v36 = vpop.f32.mrf.mxu1 }
 0x4d4   :  { %v5436_v13 = vadd.f32 %v5413_v15, %v5290_v47  ;;  %v5583_v14 = vadd.f32 %v6368_v36, %v5437_v7 }
 0x4d5   :  { %v6343_v20 = vpop.f32.mrf.mxu0  ;;  %v5559_v61 = vpop.f32.mrf.mxu1 }
 0x4d6   :  { %v5439_v23 = vadd.f32 %v6343_v20, %v5293_v12  ;;  %v5582_v46 = vadd.f32 %v5559_v61, %v5436_v13 }
 0x4d7   :  { %v5423_v29 = vpop.f32.mrf.mxu0  ;;  %v6371_v54 = vpop.f32.mrf.mxu1 }
 0x4d8   :  { %v5438_v30 = vadd.f32 %v5423_v29, %v5292_v38  ;;  %v5585_v59 = vadd.f32 %v6371_v54, %v5439_v23 }
 0x4d9   :  { %v6390_v50 = vpop.f32.mrf.mxu0 }
 0x4da   :  { %v5725_v31 = vadd.f32 %v6390_v50, %v5579_v55 }
 0x4db   :  { %v5685_v10 = vpop.f32.mrf.mxu0 }
 0x4dc   :  { %v5781_v25 = vadd.f32 %v5748_v28, %v5725_v31  ;;  %v5724_v41 = vadd.f32 %v5685_v10, %v5578_v42  ;;  %v5837_v42 = vpop.permute.xlu1 %5836 }
 0x4dd   :  { %v6393_v53 = vpop.f32.mrf.mxu0 }
 0x4de   :  { %v5780_v34 = vadd.f32 %v5743_v63, %v5724_v41  ;;  %v5727_v48 = vadd.f32 %v6393_v53, %v5581_v19  ;;  %v5789_v32 = vmax.f32 %v5781_v25, 0.0  ;;  %v5569_v63 = vpop.f32.mrf.mxu1  ;;  %v5871_v19 = vlaneseq }
 0x4df   :  { %v5695_v33 = vpop.f32.mrf.mxu0 }
 0x4e0   :  { %v5788_v16 = vmax.f32 %v5780_v34, 0.0  ;;  %v5783_v57 = vadd.f32 %v5758_v26, %v5727_v48  ;;  %v5726_v4 = vadd.f32 %v5695_v33, %v5580_v58  ;;  %v5845_v0 = vmul.f32 %v5812_v49, %v5789_v32  ;;  %v5832_v49 = vpop.permute.xlu0 %5831  ;;  %v5869_v34 = vpop.permute.xlu1 %5868 }
 0x4e1   :  { %v6396_v28 = vpop.f32.mrf.mxu0  ;;  %v5584_v26 = vadd.f32 %v5569_v63, %v5438_v30  ;;  %v5872_v47 = vshrl.u32 %v5871_v19, 7 }
 0x4e2   :  { %v5844_v24 = vmul.f32 %v5807_v9, %v5788_v16  ;;  %v5782_v60 = vadd.f32 %v8234_v27, %v5726_v4  ;;  %v5729_v56 = vadd.f32 %v6396_v28, %v5583_v14  ;;  %v5791_v17 = vmax.f32 %v5783_v57, 0.0 }
 0x4e3   :  { %v5705_v62 = vpop.f32.mrf.mxu0 }
 0x4e4   :  { %v5790_v15 = vmax.f32 %v5782_v60, 0.0  ;;  %v5785_v43 = vadd.f32 %v5768_v21, %v5729_v56  ;;  %v5728_v5 = vadd.f32 %v5705_v62, %v5582_v46  ;;  %v5852_v52 = vadd.f32 %v5845_v0, %v5844_v24  ;;  %v5842_v61 = vpop.permute.xlu0 %5841 }
 0x4e5   :  { %v6399_v51 = vpop.f32.mrf.mxu0  ;;  %v5847_v36 = vmul.f32 %v5822_v2, %v5791_v17  ;;  %v5873_v2 = vsub.s32 0, %v5872_v47 }
 0x4e6   :  { %v5846_v20 = vmul.f32 %v5817_v1, %v5790_v15  ;;  %v5731_v22 = vadd.f32 %v6399_v51, %v5585_v59  ;;  %v5784_v9 = vadd.f32 %v8236_v6, %v5728_v5  ;;  %v5793_v55 = vmax.f32 %v5785_v43, 0.0 }
 0x4e7   :  { %v5715_v27 = vpop.f32.mrf.mxu0  ;;  %v5874_v38 = vrot.slane %v5869_v34, %v5873_v2 }
 0x4e8   :  { %v5853_v29 = vadd.f32 %v5852_v52, %v5846_v20  ;;  %v5730_v8 = vadd.f32 %v5715_v27, %v5584_v26  ;;  %v5792_v40 = vmax.f32 %v5784_v9, 0.0  ;;  %v5787_v18 = vadd.f32 %v5778_v3, %v5731_v22 }
 0x4e9   :  { %v5849_v35 = vmul.f32 %v5832_v49, %v5793_v55 }
 0x4ea   :  { %v5854_v39 = vadd.f32 %v5853_v29, %v5847_v36  ;;  %v5786_v44 = vadd.f32 %v5773_v37, %v5730_v8  ;;  %v5848_v50 = vmul.f32 %v5827_v45, %v5792_v40  ;;  %v5795_v1 = vmax.f32 %v5787_v18, 0.0 }
 0x4ec   :  { %v5794_v21 = vmax.f32 %v5786_v44, 0.0  ;;  %v5855_v31 = vadd.f32 %v5854_v39, %v5848_v50  ;;  %v5851_v6 = vmul.f32 %v5842_v61, %v5795_v1 }
 0x4ee   :  { %v5850_v11 = vmul.f32 %v5837_v42, %v5794_v21  ;;  %v5856_v7 = vadd.f32 %v5855_v31, %v5849_v35 }
 0x4f0   :  { %v5857_v10 = vadd.f32 %v5856_v7, %v5850_v11 }
 0x4f2   :  { %v5858_v25 = vadd.f32 %v5857_v10, %v5851_v6 }
 0x4f4   :  { %v5859_v41 = vrot.slane %v5858_v25, 4 }
 0x4f6   :  { %v5860_v12 = vadd.f32 %v5859_v41, %v5858_v25 }
 0x4f8   :  { %v5861_v53 = vrot.slane %v5860_v12, 2 }
 0x4fa   :  { %v5862_v58 = vadd.f32 %v5861_v53, %v5860_v12 }
 0x4fc   :  { %v5863_v48 = vrot.slane %v5862_v58, 1 }
 0x4fe   :  { %v5864_v13 = vadd.f32 %v5863_v48, %v5862_v58 }
 0x500   :  { %v5875_v14 = vadd.f32 %v5874_v38, %v5864_v13 }
 0x502   :  { %v5876_v23 = vmax.f32 %v5875_v14, 0.0 }
 0x504   :  { %5877 = vst [vmem:[%s8254_s11] sm:$0x1] %v5876_v23 }
 0x505   :  { %5882 = vsyncpa [#allocation4], 1 }
 0x506   :  { %5883 = vsyncpa [#allocation6], 1 }
 0x507   :  { %5884 = vsyncpa [#allocation9], 1 }
 0x508   :  { %5885 = vsyncpa [#allocation12], 1 }

</bundles_post_ra>
